<compile_context>
chip_gen: v6e
topology: v6e:2x2x1
jax: 0.10.0
libtpu: 0.0.40
codegen_flags: <defaults>
</compile_context>

<pallas_src>
import jax
import jax.numpy as jnp
from jax.experimental import pallas as pl
from jax.experimental.pallas import tpu as pltpu

KH, KW, OC = 5, 34, 20          # Conv2d(1, 20, kernel_size=(5, 34))
DNN_IN, DNN_H1, DNN_H2 = 2390, 256, 32
FC1_IN, FC1_OUT, FC2_OUT = 52, 128, 2


def acrnet_kernel(x_ref, cw_ref, cb_ref, d_ref,
                  w1_ref, b1_ref, w2_ref, b2_ref,
                  w3c_ref, w3d_ref, b3_ref, w4_ref, b4_ref, o_ref):
    TN, H, _ = x_ref.shape
    H_out = H - KH + 1

    # --- Conv2d(1, 20, (5, 34)) as ONE MXU contraction ---------------------
    # Project every input row against every tap at once:
    #   y[n, h, kh*OC + c] = sum_w x[n, h, w] * cw[kh, w, c]
    # (M = TN*H, K = 34, N = KH*OC = 100), then combine the KH taps with
    # sublane-shifted, lane-sliced adds before the max-pool.
    xb = x_ref[...].astype(jnp.bfloat16)                     # in-kernel cast
    cwb = cw_ref[...].astype(jnp.bfloat16)                   # (KW, KH*OC)
    y = jnp.einsum('nhw,wk->nhk', xb, cwb,
                   preferred_element_type=jnp.float32)       # (TN, H, 100) f32
    acc = y[:, 0:H_out, 0:OC]
    for kh in range(1, KH):                                  # static unroll
        acc = acc + y[:, kh:kh + H_out, kh * OC:(kh + 1) * OC]

    # max_pool1d over the full conv length then ReLU; the bias is constant
    # along the pooled axis so it is added after the max (identical result).
    cnn_feat = jnp.maximum(jnp.max(acc, axis=1) + cb_ref[...], 0.0)  # (TN, 20)

    # --- DNN branch: relu(fc1(dnn_feature)) -> fc2 -------------------------
    # dnn_feature / w1 arrive in f32 (single HBM pass) and are cast to bf16
    # here; accumulation stays f32 via preferred_element_type.
    db = d_ref[...].astype(jnp.bfloat16)
    w1b = w1_ref[...].astype(jnp.bfloat16)
    h1 = jnp.dot(db, w1b, preferred_element_type=jnp.float32) + b1_ref[...]
    h1 = jnp.maximum(h1, 0.0)                                         # f32
    h2 = jnp.dot(h1, w2_ref[...],
                 preferred_element_type=jnp.float32) + b2_ref[...]    # (TN, 32)

    # --- merged head: concat(cnn_feat, h2) @ w3 == cnn_feat@w3c + h2@w3d ---
    h3 = (jnp.dot(cnn_feat, w3c_ref[...], preferred_element_type=jnp.float32)
          + jnp.dot(h2, w3d_ref[...], preferred_element_type=jnp.float32)
          + b3_ref[...])
    h3 = jnp.maximum(h3, 0.0)
    logits = jnp.dot(h3, w4_ref[...],
                     preferred_element_type=jnp.float32) + b4_ref[...]  # (TN, 2)

    # --- log_softmax over dim 1 (f32 element-wise) --------------------------
    m = jnp.max(logits, axis=1, keepdims=True)
    z = logits - m
    lse = jnp.log(jnp.sum(jnp.exp(z), axis=1, keepdims=True))
    o_ref[...] = z - lse


def _vmem_capacity_bytes():
    """Per-core VMEM capacity; conservative (v7x-class) fallback."""
    try:
        return int(pltpu.get_tpu_info().vmem_capacity_bytes)
    except Exception:
        return 64 * 1024 * 1024


def _round8(v):
    return max(8, ((v + 7) // 8) * 8)


def _choose_tile(n, vmem_cap):
    """Pick (batch tile, vmem_limit_bytes) per TPU generation."""
    big_vmem = vmem_cap >= 100 * 1024 * 1024          # v5e / v6e (128 MiB)
    if big_vmem:
        # 1 TensorCore, lots of VMEM -> favour big tiles / few grid steps.
        # (dnn tile is streamed in f32 now, so 1024 keeps the working set
        #  ~45 MB well inside the 80 MiB limit.)
        max_tile, vmem_limit = 1024, 80 * 1024 * 1024
        tn = n if n <= max_tile else max_tile
    else:
        # v7x-class: 64 MiB VMEM, 2 TensorCores.  Keep the limit well under
        # physical and make sure the parallel batch axis has >= ~4 steps so
        # both cores stay busy.
        max_tile, vmem_limit = 512, 40 * 1024 * 1024
        if n <= 64:
            tn = n
        elif n <= max_tile:
            tn = min(max_tile, _round8(-(-n // 4)))
            if tn >= n:
                tn = n
        else:
            tn = max_tile
    return tn, vmem_limit


def acrnet_forward(seq, ss3, ss8, acc, dnn_feature, params):
    # torch.cat((seq, ss3, ss8, acc), -1) and squeeze the C=1 channel.
    cnn = jnp.concatenate([seq, ss3, ss8, acc], axis=-1)
    N, _, H, W = cnn.shape
    assert W == KW, f"concatenated width must be {KW}, got {W}"
    assert H >= KH, f"sequence length must be >= {KH}"

    # All per-sample streams stay f32 in HBM (single pass); bf16 casts happen
    # inside the kernel right before the MXU dots.
    x = cnn.reshape(N, H, W)

    # Conv weight reorganised once to (KW, KH*OC) for the single contraction:
    # cw2[w, kh*OC + c] = conv_w[kh, w, c].
    cw2 = jnp.transpose(params['conv_w'], (1, 0, 2)).reshape(KW, KH * OC)

    # Split fc1's weight so the kernel never concatenates (N,20)|(N,32).
    w3c = params['w3'][:OC]          # (20, 128)
    w3d = params['w3'][OC:]          # (32, 128)

    TN, vmem_limit = _choose_tile(N, _vmem_capacity_bytes())
    grid = (pl.cdiv(N, TN),)

    inputs = (x, cw2, params['conv_b'], dnn_feature,
              params['w1'], params['b1'], params['w2'], params['b2'],
              w3c, w3d, params['b3'], params['w4'], params['b4'])

    flops = 2 * N * (H * KW * KH * OC + DNN_IN * DNN_H1 + DNN_H1 * DNN_H2
                     + FC1_IN * FC1_OUT + FC1_OUT * FC2_OUT)
    bytes_accessed = (sum(int(a.size) * a.dtype.itemsize for a in inputs)
                      + N * FC2_OUT * 4)
    cost = pl.CostEstimate(flops=flops, transcendentals=3 * N,
                           bytes_accessed=bytes_accessed)

    def run(single_buffer_weights):
        def tiled(block):
            return pl.BlockSpec(
                block, lambda i, _nd=len(block): (i,) + (0,) * (_nd - 1))

        def resident(shape):
            kwargs = {}
            if single_buffer_weights:
                # Constant-index resident weights don't need double buffers.
                kwargs['pipeline_mode'] = pl.Buffered(buffer_count=1)
            return pl.BlockSpec(
                shape, lambda i, _nd=len(shape): (0,) * _nd, **kwargs)

        in_specs = [
            tiled((TN, H, KW)),              # x            (pipelined along N)
            resident((KW, KH * OC)),         # conv_w (KW, 100)   (resident)
            resident((1, OC)),               # conv_b
            tiled((TN, DNN_IN)),             # dnn_feature  (pipelined along N)
            resident((DNN_IN, DNN_H1)),      # w1
            resident((1, DNN_H1)),           # b1
            resident((DNN_H1, DNN_H2)),      # w2
            resident((1, DNN_H2)),           # b2
            resident((OC, FC1_OUT)),         # w3_cnn
            resident((DNN_H2, FC1_OUT)),     # w3_dnn
            resident((1, FC1_OUT)),          # b3
            resident((FC1_OUT, FC2_OUT)),    # w4
            resident((1, FC2_OUT)),          # b4
        ]

        out = pl.pallas_call(
            acrnet_kernel,
            out_shape=jax.ShapeDtypeStruct((N, FC2_OUT), jnp.float32),
            grid=grid,
            in_specs=in_specs,
            out_specs=pl.BlockSpec((TN, FC2_OUT), lambda i: (i, 0)),
            compiler_params=pltpu.CompilerParams(
                dimension_semantics=("parallel",),   # megacore sharding (v7x)
                vmem_limit_bytes=vmem_limit),
            cost_estimate=cost,
        )(*inputs)
        return jax.block_until_ready(out)

    try:
        return run(True)
    except Exception:
        # Fallback for jax builds that reject pipeline_mode=pl.Buffered(1);
        # everything else is identical (just double-buffered weights).
        return run(False)


def acrnet_reference(seq, ss3, ss8, acc, dnn_feature, params):
    """Plain-JAX reference mirroring the PyTorch forward (same bf16 operand
    precision as the kernel for the conv and dnn_fc1 matmuls)."""
    cnn = jnp.concatenate([seq, ss3, ss8, acc], axis=-1)
    N, _, H, W = cnn.shape
    x = cnn.reshape(N, H, W).astype(jnp.bfloat16)
    cw = params['conv_w'].astype(jnp.bfloat16)
    H_out = H - KH + 1
    conv = jnp.zeros((N, H_out, OC), jnp.float32)
    for kh in range(KH):
        conv = conv + jnp.einsum('nhw,wc->nhc', x[:, kh:kh + H_out, :], cw[kh],
                                 preferred_element_type=jnp.float32)
    conv = conv + params['conv_b'][:, None, :]
    cnn_feat = jnp.maximum(jnp.max(conv, axis=1), 0.0)
    h1 = jnp.dot(dnn_feature.astype(jnp.bfloat16),
                 params['w1'].astype(jnp.bfloat16),
                 preferred_element_type=jnp.float32) + params['b1']
    h1 = jnp.maximum(h1, 0.0)
    h2 = h1 @ params['w2'] + params['b2']
    xcat = jnp.concatenate([cnn_feat, h2], axis=1)
    h3 = jnp.maximum(xcat @ params['w3'] + params['b3'], 0.0)
    logits = h3 @ params['w4'] + params['b4']
    return jax.nn.log_softmax(logits, axis=1)


def init_params(key):
    ks = jax.random.split(key, 6)

    def linear(k, fan_in, fan_out):
        bound = 1.0 / jnp.sqrt(float(fan_in))
        kw, kb = jax.random.split(k)
        w = jax.random.uniform(kw, (fan_in, fan_out), jnp.float32, -bound, bound)
        b = jax.random.uniform(kb, (1, fan_out), jnp.float32, -bound, bound)
        return w, b

    # Conv weights stored torch-style (OC, 1, KH, KW), transposed to (KH, KW, OC).
    cbound = 1.0 / jnp.sqrt(float(KH * KW))
    kcw, kcb = jax.random.split(ks[0])
    conv_w_t = jax.random.uniform(kcw, (OC, 1, KH, KW), jnp.float32, -cbound, cbound)
    conv_w = jnp.transpose(conv_w_t[:, 0, :, :], (1, 2, 0))        # (KH, KW, OC)
    conv_b = jax.random.uniform(kcb, (1, OC), jnp.float32, -cbound, cbound)

    w1, b1 = linear(ks[1], DNN_IN, DNN_H1)
    w2, b2 = linear(ks[2], DNN_H1, DNN_H2)
    w3, b3 = linear(ks[3], FC1_IN, FC1_OUT)
    w4, b4 = linear(ks[4], FC1_OUT, FC2_OUT)

    return dict(conv_w=conv_w, conv_b=conv_b,
                w1=w1, b1=b1, w2=w2, b2=b2, w3=w3, b3=b3, w4=w4, b4=b4)


if __name__ == "__main__":
    key = jax.random.PRNGKey(0)
    kp, k1, k2, k3, k4, k5 = jax.random.split(key, 6)

    params = init_params(kp)

    N, H = 2, 16  # batch=2, sequence length=16 (conv output length = 12)
    # Feature widths 21 + 3 + 8 + 2 = 34 (seq one-hot-ish, ss3, ss8, acc).
    seq = jax.random.uniform(k1, (N, 1, H, 21), jnp.float32)
    ss3 = jax.random.uniform(k2, (N, 1, H, 3), jnp.float32)
    ss8 = jax.random.uniform(k3, (N, 1, H, 8), jnp.float32)
    acc = jax.random.uniform(k4, (N, 1, H, 2), jnp.float32)
    dnn_feature = jax.random.normal(k5, (N, DNN_IN), jnp.float32)

    out = acrnet_forward(seq, ss3, ss8, acc, dnn_feature, params)
    out = jax.block_until_ready(out)

    ref = acrnet_reference(seq, ss3, ss8, acc, dnn_feature, params)
    assert out.shape == (N, FC2_OUT)
    assert jnp.allclose(out, ref, atol=2e-3, rtol=2e-3), (out, ref)

    print("KERNEL_OK")
</pallas_src>

<mosaic_0001>
module attributes {stable_mosaic.version = 11 : i64} {
  func.func @acrnet_kernel(%arg0: i32, %arg1: memref<2x16x34xf32, #tpu.memory_space<vmem>>, %arg2: memref<34x100xf32, #tpu.memory_space<vmem>>, %arg3: memref<1x20xf32, #tpu.memory_space<vmem>>, %arg4: memref<2x2390xf32, #tpu.memory_space<vmem>>, %arg5: memref<2390x256xf32, #tpu.memory_space<vmem>>, %arg6: memref<1x256xf32, #tpu.memory_space<vmem>>, %arg7: memref<256x32xf32, #tpu.memory_space<vmem>>, %arg8: memref<1x32xf32, #tpu.memory_space<vmem>>, %arg9: memref<20x128xf32, #tpu.memory_space<vmem>>, %arg10: memref<32x128xf32, #tpu.memory_space<vmem>>, %arg11: memref<1x128xf32, #tpu.memory_space<vmem>>, %arg12: memref<128x2xf32, #tpu.memory_space<vmem>>, %arg13: memref<1x2xf32, #tpu.memory_space<vmem>>, %arg14: memref<2x2xf32, #tpu.memory_space<vmem>>) attributes {dimension_semantics = [#tpu.dimension_semantics<parallel>], iteration_bounds = array<i64: 1>, scalar_prefetch = 0 : i64, scratch_operands = 0 : i64, tpu.core_type = #tpu.core_type<tc>, window_params = [{transform_indices = @transform_0, window_bounds = array<i64: 2, 16, 34>}, {pipeline_mode = #tpu.pipeline_mode<synchronous>, transform_indices = @transform_1, window_bounds = array<i64: 34, 100>}, {pipeline_mode = #tpu.pipeline_mode<synchronous>, transform_indices = @transform_2, window_bounds = array<i64: 1, 20>}, {transform_indices = @transform_3, window_bounds = array<i64: 2, 2390>}, {pipeline_mode = #tpu.pipeline_mode<synchronous>, transform_indices = @transform_4, window_bounds = array<i64: 2390, 256>}, {pipeline_mode = #tpu.pipeline_mode<synchronous>, transform_indices = @transform_5, window_bounds = array<i64: 1, 256>}, {pipeline_mode = #tpu.pipeline_mode<synchronous>, transform_indices = @transform_6, window_bounds = array<i64: 256, 32>}, {pipeline_mode = #tpu.pipeline_mode<synchronous>, transform_indices = @transform_7, window_bounds = array<i64: 1, 32>}, {pipeline_mode = #tpu.pipeline_mode<synchronous>, transform_indices = @transform_8, window_bounds = array<i64: 20, 128>}, {pipeline_mode = #tpu.pipeline_mode<synchronous>, transform_indices = @transform_9, window_bounds = array<i64: 32, 128>}, {pipeline_mode = #tpu.pipeline_mode<synchronous>, transform_indices = @transform_10, window_bounds = array<i64: 1, 128>}, {pipeline_mode = #tpu.pipeline_mode<synchronous>, transform_indices = @transform_11, window_bounds = array<i64: 128, 2>}, {pipeline_mode = #tpu.pipeline_mode<synchronous>, transform_indices = @transform_12, window_bounds = array<i64: 1, 2>}, {transform_indices = @transform_13, window_bounds = array<i64: 2, 2>}]} {
    %c0 = arith.constant 0 : index
    %c0_0 = arith.constant 0 : index
    %c0_1 = arith.constant 0 : index
    %0 = vector.load %arg1[%c0, %c0_0, %c0_1] : memref<2x16x34xf32, #tpu.memory_space<vmem>>, vector<2x16x34xf32>
    %1 = arith.truncf %0 : vector<2x16x34xf32> to vector<2x16x34xbf16>
    %c0_2 = arith.constant 0 : index
    %c0_3 = arith.constant 0 : index
    %2 = vector.load %arg2[%c0_2, %c0_3] : memref<34x100xf32, #tpu.memory_space<vmem>>, vector<34x100xf32>
    %3 = arith.truncf %2 : vector<34x100xf32> to vector<34x100xbf16>
    "tpu.trace_start"() <{level = 10 : i32, message = "nhw,wk->nhk"}> : () -> ()
    %cst = arith.constant dense<0.000000e+00> : vector<2x16x100xf32>
    %4 = tpu.matmul %1, %3, %cst {dimension_numbers = #tpu.dot_dimension_numbers<[2], [0], [0, 1], [1], [0, 0, 0, 1, 1, 1], [], []>} : vector<2x16x34xbf16>, vector<34x100xbf16>, vector<2x16x100xf32> -> vector<2x16x100xf32>
    "tpu.trace_stop"() : () -> ()
    %5 = vector.extract_strided_slice %4 {offsets = [0, 0, 0], sizes = [2, 12, 20], strides = [1, 1, 1]} : vector<2x16x100xf32> to vector<2x12x20xf32>
    %6 = vector.extract_strided_slice %4 {offsets = [0, 1, 20], sizes = [2, 12, 20], strides = [1, 1, 1]} : vector<2x16x100xf32> to vector<2x12x20xf32>
    %7 = arith.addf %5, %6 : vector<2x12x20xf32>
    %8 = vector.extract_strided_slice %4 {offsets = [0, 2, 40], sizes = [2, 12, 20], strides = [1, 1, 1]} : vector<2x16x100xf32> to vector<2x12x20xf32>
    %9 = arith.addf %7, %8 : vector<2x12x20xf32>
    %10 = vector.extract_strided_slice %4 {offsets = [0, 3, 60], sizes = [2, 12, 20], strides = [1, 1, 1]} : vector<2x16x100xf32> to vector<2x12x20xf32>
    %11 = arith.addf %9, %10 : vector<2x12x20xf32>
    %12 = vector.extract_strided_slice %4 {offsets = [0, 4, 80], sizes = [2, 12, 20], strides = [1, 1, 1]} : vector<2x16x100xf32> to vector<2x12x20xf32>
    %13 = arith.addf %11, %12 : vector<2x12x20xf32>
    %cst_4 = arith.constant dense<0xFF800000> : vector<2x20xf32>
    %14 = vector.multi_reduction <maximumf>, %13, %cst_4 [1] : vector<2x12x20xf32> to vector<2x20xf32>
    %c0_5 = arith.constant 0 : index
    %c0_6 = arith.constant 0 : index
    %15 = vector.load %arg3[%c0_5, %c0_6] : memref<1x20xf32, #tpu.memory_space<vmem>>, vector<1x20xf32>
    %16 = vector.broadcast %15 : vector<1x20xf32> to vector<2x20xf32>
    %17 = arith.addf %14, %16 : vector<2x20xf32>
    %cst_7 = arith.constant 0.000000e+00 : f32
    %18 = vector.broadcast %cst_7 : f32 to vector<2x20xf32>
    %19 = arith.maximumf %17, %18 : vector<2x20xf32>
    %c0_8 = arith.constant 0 : index
    %c0_9 = arith.constant 0 : index
    %20 = vector.load %arg4[%c0_8, %c0_9] : memref<2x2390xf32, #tpu.memory_space<vmem>>, vector<2x2390xf32>
    %21 = arith.truncf %20 : vector<2x2390xf32> to vector<2x2390xbf16>
    %c0_10 = arith.constant 0 : index
    %c0_11 = arith.constant 0 : index
    %22 = vector.load %arg5[%c0_10, %c0_11] : memref<2390x256xf32, #tpu.memory_space<vmem>>, vector<2390x256xf32>
    %23 = arith.truncf %22 : vector<2390x256xf32> to vector<2390x256xbf16>
    %cst_12 = arith.constant dense<0.000000e+00> : vector<2x256xf32>
    %24 = tpu.matmul %21, %23, %cst_12 {dimension_numbers = #tpu.dot_dimension_numbers<[1], [0], [0], [1], [0, 0, 1, 1], [], []>} : vector<2x2390xbf16>, vector<2390x256xbf16>, vector<2x256xf32> -> vector<2x256xf32>
    %c0_13 = arith.constant 0 : index
    %c0_14 = arith.constant 0 : index
    %25 = vector.load %arg6[%c0_13, %c0_14] : memref<1x256xf32, #tpu.memory_space<vmem>>, vector<1x256xf32>
    %26 = vector.broadcast %25 : vector<1x256xf32> to vector<2x256xf32>
    %27 = arith.addf %24, %26 : vector<2x256xf32>
    %cst_15 = arith.constant 0.000000e+00 : f32
    %28 = vector.broadcast %cst_15 : f32 to vector<2x256xf32>
    %29 = arith.maximumf %27, %28 : vector<2x256xf32>
    %c0_16 = arith.constant 0 : index
    %c0_17 = arith.constant 0 : index
    %30 = vector.load %arg7[%c0_16, %c0_17] : memref<256x32xf32, #tpu.memory_space<vmem>>, vector<256x32xf32>
    %cst_18 = arith.constant dense<0.000000e+00> : vector<2x32xf32>
    %31 = tpu.matmul %29, %30, %cst_18 {dimension_numbers = #tpu.dot_dimension_numbers<[1], [0], [0], [1], [0, 0, 1, 1], [], []>} : vector<2x256xf32>, vector<256x32xf32>, vector<2x32xf32> -> vector<2x32xf32>
    %c0_19 = arith.constant 0 : index
    %c0_20 = arith.constant 0 : index
    %32 = vector.load %arg8[%c0_19, %c0_20] : memref<1x32xf32, #tpu.memory_space<vmem>>, vector<1x32xf32>
    %33 = vector.broadcast %32 : vector<1x32xf32> to vector<2x32xf32>
    %34 = arith.addf %31, %33 : vector<2x32xf32>
    %c0_21 = arith.constant 0 : index
    %c0_22 = arith.constant 0 : index
    %35 = vector.load %arg9[%c0_21, %c0_22] : memref<20x128xf32, #tpu.memory_space<vmem>>, vector<20x128xf32>
    %cst_23 = arith.constant dense<0.000000e+00> : vector<2x128xf32>
    %36 = tpu.matmul %19, %35, %cst_23 {dimension_numbers = #tpu.dot_dimension_numbers<[1], [0], [0], [1], [0, 0, 1, 1], [], []>} : vector<2x20xf32>, vector<20x128xf32>, vector<2x128xf32> -> vector<2x128xf32>
    %c0_24 = arith.constant 0 : index
    %c0_25 = arith.constant 0 : index
    %37 = vector.load %arg10[%c0_24, %c0_25] : memref<32x128xf32, #tpu.memory_space<vmem>>, vector<32x128xf32>
    %cst_26 = arith.constant dense<0.000000e+00> : vector<2x128xf32>
    %38 = tpu.matmul %34, %37, %cst_26 {dimension_numbers = #tpu.dot_dimension_numbers<[1], [0], [0], [1], [0, 0, 1, 1], [], []>} : vector<2x32xf32>, vector<32x128xf32>, vector<2x128xf32> -> vector<2x128xf32>
    %39 = arith.addf %36, %38 : vector<2x128xf32>
    %c0_27 = arith.constant 0 : index
    %c0_28 = arith.constant 0 : index
    %40 = vector.load %arg11[%c0_27, %c0_28] : memref<1x128xf32, #tpu.memory_space<vmem>>, vector<1x128xf32>
    %41 = vector.broadcast %40 : vector<1x128xf32> to vector<2x128xf32>
    %42 = arith.addf %39, %41 : vector<2x128xf32>
    %cst_29 = arith.constant 0.000000e+00 : f32
    %43 = vector.broadcast %cst_29 : f32 to vector<2x128xf32>
    %44 = arith.maximumf %42, %43 : vector<2x128xf32>
    %c0_30 = arith.constant 0 : index
    %c0_31 = arith.constant 0 : index
    %45 = vector.load %arg12[%c0_30, %c0_31] : memref<128x2xf32, #tpu.memory_space<vmem>>, vector<128x2xf32>
    %cst_32 = arith.constant dense<0.000000e+00> : vector<2x2xf32>
    %46 = tpu.matmul %44, %45, %cst_32 {dimension_numbers = #tpu.dot_dimension_numbers<[1], [0], [0], [1], [0, 0, 1, 1], [], []>} : vector<2x128xf32>, vector<128x2xf32>, vector<2x2xf32> -> vector<2x2xf32>
    %c0_33 = arith.constant 0 : index
    %c0_34 = arith.constant 0 : index
    %47 = vector.load %arg13[%c0_33, %c0_34] : memref<1x2xf32, #tpu.memory_space<vmem>>, vector<1x2xf32>
    %48 = vector.broadcast %47 : vector<1x2xf32> to vector<2x2xf32>
    %49 = arith.addf %46, %48 : vector<2x2xf32>
    %cst_35 = arith.constant dense<0xFF800000> : vector<2xf32>
    %50 = vector.multi_reduction <maximumf>, %49, %cst_35 [1] : vector<2x2xf32> to vector<2xf32>
    %51 = vector.shape_cast %50 : vector<2xf32> to vector<2x1xf32>
    %52 = vector.broadcast %51 : vector<2x1xf32> to vector<2x2xf32>
    %53 = arith.subf %49, %52 : vector<2x2xf32>
    %54 = math.exp %53 : vector<2x2xf32>
    %cst_36 = arith.constant dense<0.000000e+00> : vector<2xf32>
    %55 = vector.multi_reduction <add>, %54, %cst_36 [1] : vector<2x2xf32> to vector<2xf32>
    %56 = vector.shape_cast %55 : vector<2xf32> to vector<2x1xf32>
    %57 = math.log %56 : vector<2x1xf32>
    %58 = vector.broadcast %57 : vector<2x1xf32> to vector<2x2xf32>
    %59 = arith.subf %53, %58 : vector<2x2xf32>
    %c0_37 = arith.constant 0 : index
    %c0_38 = arith.constant 0 : index
    %60 = vector.load %arg14[%c0_37, %c0_38] : memref<2x2xf32, #tpu.memory_space<vmem>>, vector<2x2xf32>
    tpu.vector_store %arg14[%c0_37, %c0_38], %59 {strides = array<i32>} : memref<2x2xf32, #tpu.memory_space<vmem>>, vector<2x2xf32>,
    return
  }
  func.func @transform_0(%arg0: i32) -> (i32, i32, i32) {
    %c0_i32 = arith.constant 0 : i32
    %c0_i32_0 = arith.constant 0 : i32
    %c0_i32_1 = arith.constant 0 : i32
    return %arg0, %c0_i32, %c0_i32_0 : i32, i32, i32
  }
  func.func @transform_1(%arg0: i32) -> (i32, i32) {
    %c0_i32 = arith.constant 0 : i32
    %c0_i32_0 = arith.constant 0 : i32
    %c0_i32_1 = arith.constant 0 : i32
    return %c0_i32, %c0_i32_0 : i32, i32
  }
  func.func @transform_2(%arg0: i32) -> (i32, i32) {
    %c0_i32 = arith.constant 0 : i32
    %c0_i32_0 = arith.constant 0 : i32
    %c0_i32_1 = arith.constant 0 : i32
    return %c0_i32, %c0_i32_0 : i32, i32
  }
  func.func @transform_3(%arg0: i32) -> (i32, i32) {
    %c0_i32 = arith.constant 0 : i32
    %c0_i32_0 = arith.constant 0 : i32
    return %arg0, %c0_i32 : i32, i32
  }
  func.func @transform_4(%arg0: i32) -> (i32, i32) {
    %c0_i32 = arith.constant 0 : i32
    %c0_i32_0 = arith.constant 0 : i32
    %c0_i32_1 = arith.constant 0 : i32
    return %c0_i32, %c0_i32_0 : i32, i32
  }
  func.func @transform_5(%arg0: i32) -> (i32, i32) {
    %c0_i32 = arith.constant 0 : i32
    %c0_i32_0 = arith.constant 0 : i32
    %c0_i32_1 = arith.constant 0 : i32
    return %c0_i32, %c0_i32_0 : i32, i32
  }
  func.func @transform_6(%arg0: i32) -> (i32, i32) {
    %c0_i32 = arith.constant 0 : i32
    %c0_i32_0 = arith.constant 0 : i32
    %c0_i32_1 = arith.constant 0 : i32
    return %c0_i32, %c0_i32_0 : i32, i32
  }
  func.func @transform_7(%arg0: i32) -> (i32, i32) {
    %c0_i32 = arith.constant 0 : i32
    %c0_i32_0 = arith.constant 0 : i32
    %c0_i32_1 = arith.constant 0 : i32
    return %c0_i32, %c0_i32_0 : i32, i32
  }
  func.func @transform_8(%arg0: i32) -> (i32, i32) {
    %c0_i32 = arith.constant 0 : i32
    %c0_i32_0 = arith.constant 0 : i32
    %c0_i32_1 = arith.constant 0 : i32
    return %c0_i32, %c0_i32_0 : i32, i32
  }
  func.func @transform_9(%arg0: i32) -> (i32, i32) {
    %c0_i32 = arith.constant 0 : i32
    %c0_i32_0 = arith.constant 0 : i32
    %c0_i32_1 = arith.constant 0 : i32
    return %c0_i32, %c0_i32_0 : i32, i32
  }
  func.func @transform_10(%arg0: i32) -> (i32, i32) {
    %c0_i32 = arith.constant 0 : i32
    %c0_i32_0 = arith.constant 0 : i32
    %c0_i32_1 = arith.constant 0 : i32
    return %c0_i32, %c0_i32_0 : i32, i32
  }
  func.func @transform_11(%arg0: i32) -> (i32, i32) {
    %c0_i32 = arith.constant 0 : i32
    %c0_i32_0 = arith.constant 0 : i32
    %c0_i32_1 = arith.constant 0 : i32
    return %c0_i32, %c0_i32_0 : i32, i32
  }
  func.func @transform_12(%arg0: i32) -> (i32, i32) {
    %c0_i32 = arith.constant 0 : i32
    %c0_i32_0 = arith.constant 0 : i32
    %c0_i32_1 = arith.constant 0 : i32
    return %c0_i32, %c0_i32_0 : i32, i32
  }
  func.func @transform_13(%arg0: i32) -> (i32, i32) {
    %c0_i32 = arith.constant 0 : i32
    %c0_i32_0 = arith.constant 0 : i32
    return %arg0, %c0_i32 : i32, i32
  }
}

module attributes {stable_mosaic.version = 11 : i64} {
  func.func @acrnet_kernel(%arg0: i32, %arg1: memref<2x16x34xf32, #tpu.memory_space<vmem>>, %arg2: memref<34x100xf32, #tpu.memory_space<vmem>>, %arg3: memref<1x20xf32, #tpu.memory_space<vmem>>, %arg4: memref<2x2390xf32, #tpu.memory_space<vmem>>, %arg5: memref<2390x256xf32, #tpu.memory_space<vmem>>, %arg6: memref<1x256xf32, #tpu.memory_space<vmem>>, %arg7: memref<256x32xf32, #tpu.memory_space<vmem>>, %arg8: memref<1x32xf32, #tpu.memory_space<vmem>>, %arg9: memref<20x128xf32, #tpu.memory_space<vmem>>, %arg10: memref<32x128xf32, #tpu.memory_space<vmem>>, %arg11: memref<1x128xf32, #tpu.memory_space<vmem>>, %arg12: memref<128x2xf32, #tpu.memory_space<vmem>>, %arg13: memref<1x2xf32, #tpu.memory_space<vmem>>, %arg14: memref<2x2xf32, #tpu.memory_space<vmem>>) attributes {dimension_semantics = [#tpu.dimension_semantics<parallel>], iteration_bounds = array<i64: 1>, scalar_prefetch = 0 : i64, scratch_operands = 0 : i64, tpu.core_type = #tpu.core_type<tc>, window_params = [{transform_indices = @transform_0, window_bounds = array<i64: 2, 16, 34>}, {pipeline_mode = #tpu.pipeline_mode<synchronous>, transform_indices = @transform_1, window_bounds = array<i64: 34, 100>}, {pipeline_mode = #tpu.pipeline_mode<synchronous>, transform_indices = @transform_2, window_bounds = array<i64: 1, 20>}, {transform_indices = @transform_3, window_bounds = array<i64: 2, 2390>}, {pipeline_mode = #tpu.pipeline_mode<synchronous>, transform_indices = @transform_4, window_bounds = array<i64: 2390, 256>}, {pipeline_mode = #tpu.pipeline_mode<synchronous>, transform_indices = @transform_5, window_bounds = array<i64: 1, 256>}, {pipeline_mode = #tpu.pipeline_mode<synchronous>, transform_indices = @transform_6, window_bounds = array<i64: 256, 32>}, {pipeline_mode = #tpu.pipeline_mode<synchronous>, transform_indices = @transform_7, window_bounds = array<i64: 1, 32>}, {pipeline_mode = #tpu.pipeline_mode<synchronous>, transform_indices = @transform_8, window_bounds = array<i64: 20, 128>}, {pipeline_mode = #tpu.pipeline_mode<synchronous>, transform_indices = @transform_9, window_bounds = array<i64: 32, 128>}, {pipeline_mode = #tpu.pipeline_mode<synchronous>, transform_indices = @transform_10, window_bounds = array<i64: 1, 128>}, {pipeline_mode = #tpu.pipeline_mode<synchronous>, transform_indices = @transform_11, window_bounds = array<i64: 128, 2>}, {pipeline_mode = #tpu.pipeline_mode<synchronous>, transform_indices = @transform_12, window_bounds = array<i64: 1, 2>}, {transform_indices = @transform_13, window_bounds = array<i64: 2, 2>}]} {
    %c0 = arith.constant 0 : index
    %c0_0 = arith.constant 0 : index
    %c0_1 = arith.constant 0 : index
    %0 = vector.load %arg1[%c0, %c0_0, %c0_1] : memref<2x16x34xf32, #tpu.memory_space<vmem>>, vector<2x16x34xf32>
    %1 = arith.truncf %0 : vector<2x16x34xf32> to vector<2x16x34xbf16>
    %c0_2 = arith.constant 0 : index
    %c0_3 = arith.constant 0 : index
    %2 = vector.load %arg2[%c0_2, %c0_3] : memref<34x100xf32, #tpu.memory_space<vmem>>, vector<34x100xf32>
    %3 = arith.truncf %2 : vector<34x100xf32> to vector<34x100xbf16>
    "tpu.trace_start"() <{level = 10 : i32, message = "nhw,wk->nhk"}> : () -> ()
    %cst = arith.constant dense<0.000000e+00> : vector<2x16x100xf32>
    %4 = tpu.matmul %1, %3, %cst {dimension_numbers = #tpu.dot_dimension_numbers<[2], [0], [0, 1], [1], [0, 0, 0, 1, 1, 1], [], []>} : vector<2x16x34xbf16>, vector<34x100xbf16>, vector<2x16x100xf32> -> vector<2x16x100xf32>
    "tpu.trace_stop"() : () -> ()
    %5 = vector.extract_strided_slice %4 {offsets = [0, 0, 0], sizes = [2, 12, 20], strides = [1, 1, 1]} : vector<2x16x100xf32> to vector<2x12x20xf32>
    %6 = vector.extract_strided_slice %4 {offsets = [0, 1, 20], sizes = [2, 12, 20], strides = [1, 1, 1]} : vector<2x16x100xf32> to vector<2x12x20xf32>
    %7 = arith.addf %5, %6 : vector<2x12x20xf32>
    %8 = vector.extract_strided_slice %4 {offsets = [0, 2, 40], sizes = [2, 12, 20], strides = [1, 1, 1]} : vector<2x16x100xf32> to vector<2x12x20xf32>
    %9 = arith.addf %7, %8 : vector<2x12x20xf32>
    %10 = vector.extract_strided_slice %4 {offsets = [0, 3, 60], sizes = [2, 12, 20], strides = [1, 1, 1]} : vector<2x16x100xf32> to vector<2x12x20xf32>
    %11 = arith.addf %9, %10 : vector<2x12x20xf32>
    %12 = vector.extract_strided_slice %4 {offsets = [0, 4, 80], sizes = [2, 12, 20], strides = [1, 1, 1]} : vector<2x16x100xf32> to vector<2x12x20xf32>
    %13 = arith.addf %11, %12 : vector<2x12x20xf32>
    %cst_4 = arith.constant dense<0xFF800000> : vector<2x20xf32>
    %14 = vector.multi_reduction <maximumf>, %13, %cst_4 [1] : vector<2x12x20xf32> to vector<2x20xf32>
    %c0_5 = arith.constant 0 : index
    %c0_6 = arith.constant 0 : index
    %15 = vector.load %arg3[%c0_5, %c0_6] : memref<1x20xf32, #tpu.memory_space<vmem>>, vector<1x20xf32>
    %16 = vector.broadcast %15 : vector<1x20xf32> to vector<2x20xf32>
    %17 = arith.addf %14, %16 : vector<2x20xf32>
    %cst_7 = arith.constant 0.000000e+00 : f32
    %18 = vector.broadcast %cst_7 : f32 to vector<2x20xf32>
    %19 = arith.maximumf %17, %18 : vector<2x20xf32>
    %c0_8 = arith.constant 0 : index
    %c0_9 = arith.constant 0 : index
    %20 = vector.load %arg4[%c0_8, %c0_9] : memref<2x2390xf32, #tpu.memory_space<vmem>>, vector<2x2390xf32>
    %21 = arith.truncf %20 : vector<2x2390xf32> to vector<2x2390xbf16>
    %c0_10 = arith.constant 0 : index
    %c0_11 = arith.constant 0 : index
    %22 = vector.load %arg5[%c0_10, %c0_11] : memref<2390x256xf32, #tpu.memory_space<vmem>>, vector<2390x256xf32>
    %23 = arith.truncf %22 : vector<2390x256xf32> to vector<2390x256xbf16>
    %cst_12 = arith.constant dense<0.000000e+00> : vector<2x256xf32>
    %24 = tpu.matmul %21, %23, %cst_12 {dimension_numbers = #tpu.dot_dimension_numbers<[1], [0], [0], [1], [0, 0, 1, 1], [], []>} : vector<2x2390xbf16>, vector<2390x256xbf16>, vector<2x256xf32> -> vector<2x256xf32>
    %c0_13 = arith.constant 0 : index
    %c0_14 = arith.constant 0 : index
    %25 = vector.load %arg6[%c0_13, %c0_14] : memref<1x256xf32, #tpu.memory_space<vmem>>, vector<1x256xf32>
    %26 = vector.broadcast %25 : vector<1x256xf32> to vector<2x256xf32>
    %27 = arith.addf %24, %26 : vector<2x256xf32>
    %cst_15 = arith.constant 0.000000e+00 : f32
    %28 = vector.broadcast %cst_15 : f32 to vector<2x256xf32>
    %29 = arith.maximumf %27, %28 : vector<2x256xf32>
    %c0_16 = arith.constant 0 : index
    %c0_17 = arith.constant 0 : index
    %30 = vector.load %arg7[%c0_16, %c0_17] : memref<256x32xf32, #tpu.memory_space<vmem>>, vector<256x32xf32>
    %cst_18 = arith.constant dense<0.000000e+00> : vector<2x32xf32>
    %31 = tpu.matmul %29, %30, %cst_18 {dimension_numbers = #tpu.dot_dimension_numbers<[1], [0], [0], [1], [0, 0, 1, 1], [], []>} : vector<2x256xf32>, vector<256x32xf32>, vector<2x32xf32> -> vector<2x32xf32>
    %c0_19 = arith.constant 0 : index
    %c0_20 = arith.constant 0 : index
    %32 = vector.load %arg8[%c0_19, %c0_20] : memref<1x32xf32, #tpu.memory_space<vmem>>, vector<1x32xf32>
    %33 = vector.broadcast %32 : vector<1x32xf32> to vector<2x32xf32>
    %34 = arith.addf %31, %33 : vector<2x32xf32>
    %c0_21 = arith.constant 0 : index
    %c0_22 = arith.constant 0 : index
    %35 = vector.load %arg9[%c0_21, %c0_22] : memref<20x128xf32, #tpu.memory_space<vmem>>, vector<20x128xf32>
    %cst_23 = arith.constant dense<0.000000e+00> : vector<2x128xf32>
    %36 = tpu.matmul %19, %35, %cst_23 {dimension_numbers = #tpu.dot_dimension_numbers<[1], [0], [0], [1], [0, 0, 1, 1], [], []>} : vector<2x20xf32>, vector<20x128xf32>, vector<2x128xf32> -> vector<2x128xf32>
    %c0_24 = arith.constant 0 : index
    %c0_25 = arith.constant 0 : index
    %37 = vector.load %arg10[%c0_24, %c0_25] : memref<32x128xf32, #tpu.memory_space<vmem>>, vector<32x128xf32>
    %cst_26 = arith.constant dense<0.000000e+00> : vector<2x128xf32>
    %38 = tpu.matmul %34, %37, %cst_26 {dimension_numbers = #tpu.dot_dimension_numbers<[1], [0], [0], [1], [0, 0, 1, 1], [], []>} : vector<2x32xf32>, vector<32x128xf32>, vector<2x128xf32> -> vector<2x128xf32>
    %39 = arith.addf %36, %38 : vector<2x128xf32>
    %c0_27 = arith.constant 0 : index
    %c0_28 = arith.constant 0 : index
    %40 = vector.load %arg11[%c0_27, %c0_28] : memref<1x128xf32, #tpu.memory_space<vmem>>, vector<1x128xf32>
    %41 = vector.broadcast %40 : vector<1x128xf32> to vector<2x128xf32>
    %42 = arith.addf %39, %41 : vector<2x128xf32>
    %cst_29 = arith.constant 0.000000e+00 : f32
    %43 = vector.broadcast %cst_29 : f32 to vector<2x128xf32>
    %44 = arith.maximumf %42, %43 : vector<2x128xf32>
    %c0_30 = arith.constant 0 : index
    %c0_31 = arith.constant 0 : index
    %45 = vector.load %arg12[%c0_30, %c0_31] : memref<128x2xf32, #tpu.memory_space<vmem>>, vector<128x2xf32>
    %cst_32 = arith.constant dense<0.000000e+00> : vector<2x2xf32>
    %46 = tpu.matmul %44, %45, %cst_32 {dimension_numbers = #tpu.dot_dimension_numbers<[1], [0], [0], [1], [0, 0, 1, 1], [], []>} : vector<2x128xf32>, vector<128x2xf32>, vector<2x2xf32> -> vector<2x2xf32>
    %c0_33 = arith.constant 0 : index
    %c0_34 = arith.constant 0 : index
    %47 = vector.load %arg13[%c0_33, %c0_34] : memref<1x2xf32, #tpu.memory_space<vmem>>, vector<1x2xf32>
    %48 = vector.broadcast %47 : vector<1x2xf32> to vector<2x2xf32>
    %49 = arith.addf %46, %48 : vector<2x2xf32>
    %cst_35 = arith.constant dense<0xFF800000> : vector<2xf32>
    %50 = vector.multi_reduction <maximumf>, %49, %cst_35 [1] : vector<2x2xf32> to vector<2xf32>
    %51 = vector.shape_cast %50 : vector<2xf32> to vector<2x1xf32>
    %52 = vector.broadcast %51 : vector<2x1xf32> to vector<2x2xf32>
    %53 = arith.subf %49, %52 : vector<2x2xf32>
    %54 = math.exp %53 : vector<2x2xf32>
    %cst_36 = arith.constant dense<0.000000e+00> : vector<2xf32>
    %55 = vector.multi_reduction <add>, %54, %cst_36 [1] : vector<2x2xf32> to vector<2xf32>
    %56 = vector.shape_cast %55 : vector<2xf32> to vector<2x1xf32>
    %57 = math.log %56 : vector<2x1xf32>
    %58 = vector.broadcast %57 : vector<2x1xf32> to vector<2x2xf32>
    %59 = arith.subf %53, %58 : vector<2x2xf32>
    %c0_37 = arith.constant 0 : index
    %c0_38 = arith.constant 0 : index
    %60 = vector.load %arg14[%c0_37, %c0_38] : memref<2x2xf32, #tpu.memory_space<vmem>>, vector<2x2xf32>
    tpu.vector_store %arg14[%c0_37, %c0_38], %59 {strides = array<i32>} : memref<2x2xf32, #tpu.memory_space<vmem>>, vector<2x2xf32>,
    return
  }
  func.func @transform_0(%arg0: i32) -> (i32, i32, i32) {
    %c0_i32 = arith.constant 0 : i32
    %c0_i32_0 = arith.constant 0 : i32
    %c0_i32_1 = arith.constant 0 : i32
    return %arg0, %c0_i32, %c0_i32_0 : i32, i32, i32
  }
  func.func @transform_1(%arg0: i32) -> (i32, i32) {
    %c0_i32 = arith.constant 0 : i32
    %c0_i32_0 = arith.constant 0 : i32
    %c0_i32_1 = arith.constant 0 : i32
    return %c0_i32, %c0_i32_0 : i32, i32
  }
  func.func @transform_2(%arg0: i32) -> (i32, i32) {
    %c0_i32 = arith.constant 0 : i32
    %c0_i32_0 = arith.constant 0 : i32
    %c0_i32_1 = arith.constant 0 : i32
    return %c0_i32, %c0_i32_0 : i32, i32
  }
  func.func @transform_3(%arg0: i32) -> (i32, i32) {
    %c0_i32 = arith.constant 0 : i32
    %c0_i32_0 = arith.constant 0 : i32
    return %arg0, %c0_i32 : i32, i32
  }
  func.func @transform_4(%arg0: i32) -> (i32, i32) {
    %c0_i32 = arith.constant 0 : i32
    %c0_i32_0 = arith.constant 0 : i32
    %c0_i32_1 = arith.constant 0 : i32
    return %c0_i32, %c0_i32_0 : i32, i32
  }
  func.func @transform_5(%arg0: i32) -> (i32, i32) {
    %c0_i32 = arith.constant 0 : i32
    %c0_i32_0 = arith.constant 0 : i32
    %c0_i32_1 = arith.constant 0 : i32
    return %c0_i32, %c0_i32_0 : i32, i32
  }
  func.func @transform_6(%arg0: i32) -> (i32, i32) {
    %c0_i32 = arith.constant 0 : i32
    %c0_i32_0 = arith.constant 0 : i32
    %c0_i32_1 = arith.constant 0 : i32
    return %c0_i32, %c0_i32_0 : i32, i32
  }
  func.func @transform_7(%arg0: i32) -> (i32, i32) {
    %c0_i32 = arith.constant 0 : i32
    %c0_i32_0 = arith.constant 0 : i32
    %c0_i32_1 = arith.constant 0 : i32
    return %c0_i32, %c0_i32_0 : i32, i32
  }
  func.func @transform_8(%arg0: i32) -> (i32, i32) {
    %c0_i32 = arith.constant 0 : i32
    %c0_i32_0 = arith.constant 0 : i32
    %c0_i32_1 = arith.constant 0 : i32
    return %c0_i32, %c0_i32_0 : i32, i32
  }
  func.func @transform_9(%arg0: i32) -> (i32, i32) {
    %c0_i32 = arith.constant 0 : i32
    %c0_i32_0 = arith.constant 0 : i32
    %c0_i32_1 = arith.constant 0 : i32
    return %c0_i32, %c0_i32_0 : i32, i32
  }
  func.func @transform_10(%arg0: i32) -> (i32, i32) {
    %c0_i32 = arith.constant 0 : i32
    %c0_i32_0 = arith.constant 0 : i32
    %c0_i32_1 = arith.constant 0 : i32
    return %c0_i32, %c0_i32_0 : i32, i32
  }
  func.func @transform_11(%arg0: i32) -> (i32, i32) {
    %c0_i32 = arith.constant 0 : i32
    %c0_i32_0 = arith.constant 0 : i32
    %c0_i32_1 = arith.constant 0 : i32
    return %c0_i32, %c0_i32_0 : i32, i32
  }
  func.func @transform_12(%arg0: i32) -> (i32, i32) {
    %c0_i32 = arith.constant 0 : i32
    %c0_i32_0 = arith.constant 0 : i32
    %c0_i32_1 = arith.constant 0 : i32
    return %c0_i32, %c0_i32_0 : i32, i32
  }
  func.func @transform_13(%arg0: i32) -> (i32, i32) {
    %c0_i32 = arith.constant 0 : i32
    %c0_i32_0 = arith.constant 0 : i32
    return %arg0, %c0_i32 : i32, i32
  }
}

</mosaic_0001>

<bundles_post_ra>
// kernel: tpu_custom_call.1
= control target key start
LH: loop header
LB: loop body
LE: loop exit
PB: predicated region body
PF: predicated region fallthrough
CT: control target
= control target key end

     0   :  { %18 = vsyncpa [#allocation3], 0  ;;  %s3156_s0 = inlined_call_operand.hbm [shape: f32[2,16,34], index: 0, kind: input, shape index: {}]   ;;  %s3157_s1 = inlined_call_operand.hbm [shape: f32[34,100], index: 1, kind: input, shape index: {}]   ;;  %s3158_s2 = inlined_call_operand.hbm [shape: f32[1,20], index: 2, kind: input, shape index: {}]   ;;  %s3159_s3 = inlined_call_operand.hbm [shape: f32[2,2390], index: 3, kind: input, shape index: {}]   ;;  %s3160_s4 = inlined_call_operand.hbm [shape: f32[2390,256], index: 4, kind: input, shape index: {}]   ;;  %s3161_s5 = inlined_call_operand.hbm [shape: f32[1,256], index: 5, kind: input, shape index: {}]   ;;  %s3162_s6 = inlined_call_operand.vmem [shape: f32[256,32], index: 6, kind: input, shape index: {}]   ;;  %s3163_s7 = inlined_call_operand.hbm [shape: f32[1,32], index: 7, kind: input, shape index: {}]   ;;  %s3164_s8 = inlined_call_operand.hbm [shape: f32[20,128], index: 8, kind: input, shape index: {}]   ;;  %s3165_s9 = inlined_call_operand.hbm [shape: f32[32,128], index: 9, kind: input, shape index: {}]   ;;  %s3166_s10 = inlined_call_operand.hbm [shape: f32[1,128], index: 10, kind: input, shape index: {}]   ;;  %s3167_s11 = inlined_call_operand.vmem [shape: f32[128,2], index: 11, kind: input, shape index: {}]   ;;  %s3168_s12 = inlined_call_operand.hbm [shape: f32[1,2], index: 12, kind: input, shape index: {}]   ;;  %s3169_s13 = inlined_call_operand.hbm [shape: f32[2,2], index: 13, kind: output, shape index: {}]  }
   0x1   :  { %19 = vsyncpa [#allocation6], 0 }
   0x2   :  { %20 = vsyncpa [#allocation9], 0 }
   0x3   :  { %21 = vsyncpa [#allocation12], 0 }
   0x4   :  { %22 = vsyncpa [#allocation15], 0 }
   0x5   :  { %23 = vsyncpa [#allocation18], 0 }
   0x6   :  { %24 = vsyncpa [#allocation4], 0  ;;  %s2685_s25 = smov [#allocation5]   ;;  %s2686_s27 = smov [#allocation8]  }
   0x7   :  { %s42_s26 = sshll.u32 %s2685_s25, 4  ;;  %s65_s28 = sshll.u32 %s2686_s27, 4  ;;  %s43_s26 = int_to_ptr.vmem [resolvable:$true] %s42_s26  ;;  %s66_s28 = int_to_ptr.vmem [resolvable:$true] %s65_s28 }
   0x8   :  { %s2439_s29 = scalar_lea.vmem %s43_s26, 640  ;;  %p2444_p1 = scmp.lt.s32.totalorder %s43_s26, %s43_s26 }
   0x9   :  { %p2440_p0 = scmp.ne.s32.totalorder %s43_s26, %s2439_s29  ;;  %p2445_p2 = scmp.lt.s32.totalorder %s2439_s29, %s2439_s29 }
   0xb   :  { %p2446_p3 = por %p2445_p2, %p2444_p1 }
   0xd   :  { %p2447_p4 = pnand %p2446_p3, %p2440_p0 }
   0xf   :  { %2450 = shalt.err (!%p2447_p4)
}
  0x10   :  { %s2687_s30 = smov 128   ;;  %s2688_s14 = smov 8  }
  0x11   :  { %48 = dma.hbm_to_vmem [thread:$0]  %s3157_s1, 640, %s43_s26, [#allocation6], %s2687_s30, %s2687_s30, %s2688_s14  }
  0x12   :  { %s2459_s17 = scalar_lea.vmem %s66_s28, 608  ;;  %p2464_p6 = scmp.lt.s32.totalorder %s66_s28, %s66_s28 }
  0x13   :  { %p2460_p5 = scmp.ne.s32.totalorder %s66_s28, %s2459_s17  ;;  %p2465_p7 = scmp.lt.s32.totalorder %s2459_s17, %s2459_s17 }
  0x15   :  { %p2466_p8 = por %p2465_p7, %p2464_p6 }
  0x17   :  { %p2467_p9 = pnand %p2466_p8, %p2460_p5 }
  0x19   :  { %2470 = shalt.err (!%p2467_p9)
}
  0x1a   :  { %68 = dma.hbm_to_vmem [thread:$0]  %s3159_s3, 608, %s66_s28, [#allocation9]  }
  0x1b   :  { %s2689_s20 = smov [#allocation11]   ;;  %s2690_s22 = smov [#allocation14]  }
  0x1c   :  { %s87_s21 = sshll.u32 %s2689_s20, 4  ;;  %s108_s23 = sshll.u32 %s2690_s22, 4  ;;  %s88_s21 = int_to_ptr.vmem [resolvable:$true] %s87_s21  ;;  %s109_s23 = int_to_ptr.vmem [resolvable:$true] %s108_s23 }
  0x1d   :  { %s2479_s24 = scalar_lea.vmem %s88_s21, 32  ;;  %p2484_p11 = scmp.lt.s32.totalorder %s88_s21, %s88_s21 }
  0x1e   :  { %p2480_p10 = scmp.ne.s32.totalorder %s88_s21, %s2479_s24  ;;  %p2485_p12 = scmp.lt.s32.totalorder %s2479_s24, %s2479_s24 }
  0x20   :  { %p2486_p13 = por %p2485_p12, %p2484_p11 }
  0x22   :  { %p2487_p0 = pnand %p2486_p13, %p2480_p10 }
  0x24   :  { %2490 = shalt.err (!%p2487_p0)
}
  0x25   :  { %90 = dma.hbm_to_vmem [thread:$0]  %s3161_s5, 32, %s88_s21, [#allocation12]  }
  0x26   :  { %s2499_s26 = scalar_lea.vmem %s109_s23, 384  ;;  %p2504_p2 = scmp.lt.s32.totalorder %s109_s23, %s109_s23 }
  0x27   :  { %p2500_p1 = scmp.ne.s32.totalorder %s109_s23, %s2499_s26  ;;  %p2505_p3 = scmp.lt.s32.totalorder %s2499_s26, %s2499_s26 }
  0x29   :  { %p2506_p4 = por %p2505_p3, %p2504_p2 }
  0x2b   :  { %p2507_p5 = pnand %p2506_p4, %p2500_p1 }
  0x2d   :  { %2510 = shalt.err (!%p2507_p5)
}
  0x2e   :  { %114 = dma.hbm_to_vmem [thread:$0]  %s3164_s8, 384, %s109_s23, [#allocation15], %s2687_s30, %s2687_s30, %s2688_s14  }
  0x2f   :  { %s2691_s28 = smov [#allocation17]   ;;  %s2692_s15 = smov [#allocation2]  }
  0x30   :  { %s133_s29 = sshll.u32 %s2691_s28, 4  ;;  %s30_s16 = sshll.u32 %s2692_s15, 4  ;;  %s134_s29 = int_to_ptr.vmem [resolvable:$true] %s133_s29  ;;  %s31_s16 = int_to_ptr.vmem [resolvable:$true] %s30_s16 }
  0x31   :  { %s2519_s5 = scalar_lea.vmem %s134_s29, 16  ;;  %s2523_s17 = scalar_lea.vmem %s134_s29, 32 }
  0x32   :  { %p2520_p6 = scmp.ne.s32.totalorder %s134_s29, %s2519_s5  ;;  %p2524_p7 = scmp.lt.s32.totalorder %s134_s29, %s134_s29 }
  0x33   :  { %p2525_p8 = scmp.lt.s32.totalorder %s2523_s17, %s2519_s5 }
  0x35   :  { %p2526_p9 = por %p2525_p8, %p2524_p7 }
  0x37   :  { %p2527_p10 = pnand %p2526_p9, %p2520_p6 }
  0x39   :  { %2530 = shalt.err (!%p2527_p10)
}
  0x3a   :  { %136 = dma.hbm_to_vmem [thread:$0]  %s3166_s10, 16, %s134_s29, [#allocation18]  }
  0x3b   :  { %s2539_s20 = scalar_lea.vmem %s31_s16, 512  ;;  %p2544_p12 = scmp.lt.s32.totalorder %s31_s16, %s31_s16 }
  0x3c   :  { %p2540_p11 = scmp.ne.s32.totalorder %s31_s16, %s2539_s20  ;;  %p2545_p13 = scmp.lt.s32.totalorder %s2539_s20, %s2539_s20 }
  0x3e   :  { %p2546_p0 = por %p2545_p13, %p2544_p12 }
  0x40   :  { %p2547_p1 = pnand %p2546_p0, %p2540_p11 }
  0x42   :  { %2550 = shalt.err (!%p2547_p1)
}
  0x43   :  { %36 = dma.hbm_to_vmem [thread:$0]  %s3156_s0, 512, %s31_s16, [#allocation3], %s2687_s30, %s2687_s30, %s2688_s14  }
  0x44   :  { %s2693_s22 = smov [#allocation7]   ;;  %s2694_s24 = smov [#allocation10]  }
  0x45   :  { %s55_s23 = sshll.u32 %s2693_s22, 4  ;;  %s74_s1 = sshll.u32 %s2694_s24, 4  ;;  %s56_s23 = int_to_ptr.vmem [resolvable:$true] %s55_s23  ;;  %s75_s1 = int_to_ptr.vmem [resolvable:$true] %s74_s1 }
  0x46   :  { %s2559_s10 = scalar_lea.vmem %s56_s23, 16  ;;  %s2563_s25 = scalar_lea.vmem %s56_s23, 32 }
  0x47   :  { %p2560_p2 = scmp.ne.s32.totalorder %s56_s23, %s2559_s10  ;;  %p2564_p3 = scmp.lt.s32.totalorder %s56_s23, %s56_s23 }
  0x48   :  { %p2565_p4 = scmp.lt.s32.totalorder %s2563_s25, %s2559_s10 }
  0x4a   :  { %p2566_p5 = por %p2565_p4, %p2564_p3 }
  0x4c   :  { %p2567_p6 = pnand %p2566_p5, %p2560_p2 }
  0x4e   :  { %2570 = shalt.err (!%p2567_p6)
}
  0x4f   :  { %58 = dma.hbm_to_vmem [thread:$0]  %s3158_s2, 16, %s56_s23, [#allocation6]  }
  0x50   :  { %s2579_s27 = scalar_lea.vmem %s75_s1, 76544  ;;  %p2584_p8 = scmp.lt.s32.totalorder %s75_s1, %s75_s1 }
  0x51   :  { %p2580_p7 = scmp.ne.s32.totalorder %s75_s1, %s2579_s27  ;;  %p2585_p9 = scmp.lt.s32.totalorder %s2579_s27, %s2579_s27 }
  0x53   :  { %p2586_p10 = por %p2585_p9, %p2584_p8 }
  0x55   :  { %p2587_p11 = pnand %p2586_p10, %p2580_p7 }
  0x57   :  { %2590 = shalt.err (!%p2587_p11)
}
  0x58   :  { %s2695_s0 = smov 256   ;;  %s2696_s28 = smov 16  }
  0x59   :  { %80 = dma.hbm_to_vmem [thread:$0]  %s3160_s4, 76544, %s75_s1, [#allocation9], %s2695_s0, %s2695_s0, %s2696_s28  }
  0x5a   :  { %s2697_s16 = smov [#allocation13]   ;;  %s2698_s17 = smov [#allocation16]  }
  0x5b   :  { %s99_s5 = sshll.u32 %s2697_s16, 4  ;;  %s120_s18 = sshll.u32 %s2698_s17, 4  ;;  %s100_s5 = int_to_ptr.vmem [resolvable:$true] %s99_s5  ;;  %s121_s18 = int_to_ptr.vmem [resolvable:$true] %s120_s18 }
  0x5c   :  { %s2599_s2 = scalar_lea.vmem %s100_s5, 16  ;;  %s2603_s19 = scalar_lea.vmem %s100_s5, 32 }
  0x5d   :  { %p2600_p12 = scmp.ne.s32.totalorder %s100_s5, %s2599_s2  ;;  %p2604_p13 = scmp.lt.s32.totalorder %s100_s5, %s100_s5 }
  0x5e   :  { %p2605_p0 = scmp.lt.s32.totalorder %s2603_s19, %s2599_s2 }
  0x60   :  { %p2606_p1 = por %p2605_p0, %p2604_p13 }
  0x62   :  { %p2607_p2 = pnand %p2606_p1, %p2600_p12 }
  0x64   :  { %2610 = shalt.err (!%p2607_p2)
}
  0x65   :  { %102 = dma.hbm_to_vmem [thread:$0]  %s3163_s7, 16, %s100_s5, [#allocation12]  }
  0x66   :  { %s2619_s21 = scalar_lea.vmem %s121_s18, 512  ;;  %p2624_p4 = scmp.lt.s32.totalorder %s121_s18, %s121_s18 }
  0x67   :  { %p2620_p3 = scmp.ne.s32.totalorder %s121_s18, %s2619_s21  ;;  %p2625_p5 = scmp.lt.s32.totalorder %s2619_s21, %s2619_s21 }
  0x69   :  { %p2626_p6 = por %p2625_p5, %p2624_p4 }
  0x6b   :  { %p2627_p7 = pnand %p2626_p6, %p2620_p3 }
  0x6d   :  { %2630 = shalt.err (!%p2627_p7)
}
  0x6e   :  { %126 = dma.hbm_to_vmem [thread:$0]  %s3165_s9, 512, %s121_s18, [#allocation15], %s2687_s30, %s2687_s30, %s2688_s14  }
  0x6f   :  { %s2699_s23 = smov [#allocation19]  }
  0x70   :  { %s145_s24 = sshll.u32 %s2699_s23, 4  ;;  %s146_s24 = int_to_ptr.vmem [resolvable:$true] %s145_s24 }
  0x71   :  { %s2639_s1 = scalar_lea.vmem %s146_s24, 16  ;;  %s2643_s7 = scalar_lea.vmem %s146_s24, 32 }
  0x72   :  { %p2640_p8 = scmp.ne.s32.totalorder %s146_s24, %s2639_s1  ;;  %p2644_p9 = scmp.lt.s32.totalorder %s146_s24, %s146_s24 }
  0x73   :  { %p2645_p10 = scmp.lt.s32.totalorder %s2643_s7, %s2639_s1 }
  0x75   :  { %p2646_p11 = por %p2645_p10, %p2644_p9 }
  0x77   :  { %p2647_p12 = pnand %p2646_p11, %p2640_p8 }
  0x79   :  { %2650 = shalt.err (!%p2647_p12)
}
  0x7a   :  { %148 = dma.hbm_to_vmem [thread:$0]  %s3168_s12, 16, %s146_s24, [#allocation18]  }
  0x7b   :  { %2671 = dma.done.wait [#allocation3], 512  }
  0x7c   :  { %2672 = vsyncadd [#allocation3], 4294966784 }
  0x7d   :  { %2673 = dma.done.wait [#allocation6], 656  }
  0x7e   :  { %2674 = vsyncadd [#allocation6], 4294966640 }
  0x7f   :  { %2675 = dma.done.wait [#allocation9], 77152  }
  0x80   :  { %2676 = vsyncadd [#allocation9], 4294890144 }
  0x81   :  { %2677 = dma.done.wait [#allocation12], 48  }
  0x82   :  { %2678 = vsyncadd [#allocation12], 4294967248 }
  0x83   :  { %2679 = dma.done.wait [#allocation15], 896  }
  0x84   :  { %2680 = vsyncadd [#allocation15], 4294966400 }
  0x85   :  { %2681 = dma.done.wait [#allocation18], 32  }
  0x86   :  { %2682 = vsyncadd [#allocation18], 4294967264  ;;  %v193_v0 = vld [vmem:[#allocation5 + $0x20] sm:$0x3]  ;;  %vm204_vm0 = vcmask 1040384   ;;  %v545_v1 = vld [vmem:[#allocation10 + $0xe8] sm:$0xff] }
  0x87   :  { %v547_v2 = vld [vmem:[#allocation10 + $0xf8] sm:$0xff]  ;;  %v196_v3 = vpack.c.bf16 %v193_v0, %v193_v0  ;;  %v544_v5 = vld [vmem:[#allocation10 + $0xe0] sm:$0xff]  ;;  %v546_v6 = vld [vmem:[#allocation10 + $0xf0] sm:$0xff]  ;;  %vm197_vm1 = vcmask 277504   ;;  %vm261_vm2 = vcmask 1046528   ;;  %s2701_s9 = smov 88  }
  0x88   :  { %v1129_v4 = vpack.c.bf16 %v547_v2, %v545_v1  ;;  %v191_v7 = vld [vmem:[#allocation5 + $0x10] sm:$0xff]  ;;  %v1128_v8 = vpack.c.bf16 %v546_v6, %v544_v5  ;;  %v192_v9 = vld [vmem:[#allocation5 + $0x18] sm:$0xff]  ;;  %v543_v11 = vld [vmem:[#allocation10 + $0xd8] sm:$0xff]  ;;  %s2702_s12 = smov 108   ;;  %vm284_vm3 = vcmask 1045504   ;;  %s2703_s30 = smov 68  }
  0x89   :  { %v541_v10 = vld [vmem:[#allocation10 + $0xc8] sm:$0xff]  ;;  %2397 = vmatprep.subr.msk.bf16.mxu0 %vm204_vm0, %v196_v3  ;;  %v206_v12 = vsel %vm204_vm0, %v196_v3, 0  ;;  %v195_v13 = vpack.c.bf16 %v192_v9, %v191_v7  ;;  %v540_v15 = vld [vmem:[#allocation10 + $0xc0] sm:$0xff]  ;;  %v542_v16 = vld [vmem:[#allocation10 + $0xd0] sm:$0xff]  ;;  %vm307_vm4 = vcmask 1044480   ;;  %vm330_vm5 = vcmask 1043456  }
  0x8a   :  { %1437 = vmatprep.subr.bf16.mxu1 %v1129_v4  ;;  %v1127_v14 = vpack.c.bf16 %v543_v11, %v541_v10  ;;  %v189_v17 = vld [vmem:[#allocation5] sm:$0xff]  ;;  %2333 = vmatpush3.bf16.msra.mxu0 %v206_v12  ;;  %v1126_v18 = vpack.c.bf16 %v542_v16, %v540_v15  ;;  %v190_v19 = vld [vmem:[#allocation5 + $0x8] sm:$0xff]  ;;  %v537_v20 = vld [vmem:[#allocation10 + $0xa8] sm:$0xff]  ;;  %s2704_s14 = smov 48   ;;  %vm1430_vm6 = vcmask 1042432   ;;  %vm1426_vm7 = vcmask 703488  }
  0x8b   :  { %1438 = vmatpush1.bf16.msra.mxu1 %v1128_v8  ;;  %v539_v21 = vld [vmem:[#allocation10 + $0xb8] sm:$0xff]  ;;  %2334 = vmatprep.subr.bf16.mxu0 %v195_v13  ;;  %v194_v22 = vpack.c.bf16 %v190_v19, %v189_v17  ;;  %v536_v24 = vld [vmem:[#allocation10 + $0xa0] sm:$0xff]  ;;  %v538_v25 = vld [vmem:[#allocation10 + $0xb0] sm:$0xff]  ;;  %vm2707_vm8 = vmmov 0   ;;  %vm355_vm9 = vcmask 158720   ;;  %vm353_vm10 = vcmask 162816  }
  0x8c   :  { %1439 = vmatprep.subr.bf16.mxu1 %v1127_v14  ;;  %v1125_v23 = vpack.c.bf16 %v539_v21, %v537_v20  ;;  %v183_v26 = vld [vmem:[#allocation2] sm:$0xff]  ;;  %v184_v27 = vld [vmem:[#allocation2 + $0x8] sm:$0xff]  ;;  %v185_v28 = vld [vmem:[#allocation2 + $0x10] sm:$0xff]  ;;  %v1124_v34 = vpack.c.bf16 %v538_v25, %v536_v24  ;;  %vm1965_vm11 = vcmask 261120   ;;  %vm2042_vm12 = vcmask 1041409  }
  0x8d   :  { %v186_v29 = vld [vmem:[#allocation2 + $0x18] sm:$0xff]  ;;  %v187_v30 = vpack.c.bf16 %v184_v27, %v183_v26  ;;  %v535_v32 = vld [vmem:[#allocation10 + $0x98] sm:$0xff]  ;;  %v532_v36 = vld [vmem:[#allocation10 + $0x80] sm:$0xff]  ;;  %vm2221_vm13 = vcmask 9216  }
  0x8e   :  { %v533_v31 = vld [vmem:[#allocation10 + $0x88] sm:$0xff]  ;;  %2335 = vmatpush3.bf16.msra.mxu0 %v195_v13  ;;  %v611_v35 = vld [vmem:[#allocation10 + $0x2f8] sm:$0xff]  ;;  %v534_v37 = vld [vmem:[#allocation10 + $0x90] sm:$0xff]  ;;  %v188_v46 = vpack.c.bf16 %v186_v29, %v185_v28 }
  0x8f   :  { %v609_v33 = vld [vmem:[#allocation10 + $0x2e8] sm:$0xff]  ;;  %1440 = vmatpush1.bf16.msra.mxu1 %v1126_v18  ;;  %2336 = vmatprep.subr.bf16.mxu0 %v194_v22  ;;  %v1123_v38 = vpack.c.bf16 %v535_v32, %v533_v31  ;;  %v608_v40 = vld [vmem:[#allocation10 + $0x2e0] sm:$0xff]  ;;  %v610_v41 = vld [vmem:[#allocation10 + $0x2f0] sm:$0xff]  ;;  %v1122_v47 = vpack.c.bf16 %v534_v37, %v532_v36 }
  0x90   :  { %1441 = vmatprep.subr.bf16.mxu1 %v1125_v23  ;;  %v1161_v39 = vpack.c.bf16 %v611_v35, %v609_v33  ;;  %v529_v42 = vld [vmem:[#allocation10 + $0x68] sm:$0xff]  ;;  %2338 = vmatprep.mubr.msk.bf16.mxu0 %vm197_vm1, %v187_v30  ;;  %v531_v43 = vld [vmem:[#allocation10 + $0x78] sm:$0xff]  ;;  %v1160_v48 = vpack.c.bf16 %v610_v41, %v608_v40  ;;  %v528_v49 = vld [vmem:[#allocation10 + $0x60] sm:$0xff] }
  0x91   :  { %v605_v44 = vld [vmem:[#allocation10 + $0x2c8] sm:$0xff]  ;;  %v607_v45 = vld [vmem:[#allocation10 + $0x2d8] sm:$0xff]  ;;  %v530_v50 = vld [vmem:[#allocation10 + $0x70] sm:$0xff]  ;;  %v1121_v51 = vpack.c.bf16 %v531_v43, %v529_v42  ;;  %v2700_v43 = vmov 1983009808  }
  0x92   :  { %2337 = vmatpush3.bf16.msra.mxu0 %v194_v22  ;;  %v1159_v52 = vpack.c.bf16 %v607_v45, %v605_v44  ;;  %v604_v53 = vld [vmem:[#allocation10 + $0x2c0] sm:$0xff]  ;;  %v606_v54 = vld [vmem:[#allocation10 + $0x2d0] sm:$0xff]  ;;  %v525_v55 = vld [vmem:[#allocation10 + $0x48] sm:$0xff]  ;;  %v1120_v59 = vpack.c.bf16 %v530_v50, %v528_v49  ;;  %v396_v44 = vunpack.c.l.s4 %v2700_v43  ;;  %v398_v45 = vlaneseq }
  0x93   :  { %1442 = vmatpush1.bf16.msra.mxu1 %v1124_v34  ;;  %1478 = vmatprep.subr.bf16.mxu0 %v1161_v39  ;;  %v527_v56 = vld [vmem:[#allocation10 + $0x58] sm:$0xff]  ;;  %v601_v57 = vld [vmem:[#allocation10 + $0x2a8] sm:$0xff]  ;;  %v1158_v60 = vpack.c.bf16 %v606_v54, %v604_v53  ;;  %v524_v61 = vld [vmem:[#allocation10 + $0x40] sm:$0xff] }
  0x94   :  { %1443 = vmatprep.subr.bf16.mxu1 %v1123_v38  ;;  %v603_v58 = vld [vmem:[#allocation10 + $0x2b8] sm:$0xff]  ;;  %v526_v62 = vld [vmem:[#allocation10 + $0x50] sm:$0xff]  ;;  %v1119_v63 = vpack.c.bf16 %v527_v56, %v525_v55  ;;  %v600_v1 = vld [vmem:[#allocation10 + $0x2a0] sm:$0xff] }
  0x95   :  { %2339 = vmatmul.mubr.msk.bf16.vlgmr.msra.gmra.mxu0 %vm197_vm1, %v188_v46  ;;  %v1157_v0 = vpack.c.bf16 %v603_v58, %v601_v57  ;;  %v602_v2 = vld [vmem:[#allocation10 + $0x2b0] sm:$0xff]  ;;  %v521_v3 = vld [vmem:[#allocation10 + $0x28] sm:$0xff]  ;;  %v523_v4 = vld [vmem:[#allocation10 + $0x38] sm:$0xff]  ;;  %v1118_v7 = vpack.c.bf16 %v526_v62, %v524_v61  ;;  %v397_v58 = vunpack.c.0.s8 %v396_v44 }
  0x96   :  { %1479 = vmatpush1.bf16.msra.mxu0 %v1160_v48  ;;  %v597_v5 = vld [vmem:[#allocation10 + $0x288] sm:$0xff]  ;;  %v599_v6 = vld [vmem:[#allocation10 + $0x298] sm:$0xff]  ;;  %v1156_v8 = vpack.c.bf16 %v602_v2, %v600_v1  ;;  %v520_v9 = vld [vmem:[#allocation10 + $0x20] sm:$0xff]  ;;  %v1117_v11 = vpack.c.bf16 %v523_v4, %v521_v3 }
  0x97   :  { %1444 = vmatpush1.bf16.msra.mxu1 %v1122_v47  ;;  %1480 = vmatprep.subr.bf16.mxu0 %v1159_v52  ;;  %v522_v10 = vld [vmem:[#allocation10 + $0x30] sm:$0xff]  ;;  %v1155_v12 = vpack.c.bf16 %v599_v6, %v597_v5  ;;  %v596_v13 = vld [vmem:[#allocation10 + $0x280] sm:$0xff]  ;;  %v517_v15 = vld [vmem:[#allocation10 + $0x8] sm:$0xff] }
  0x98   :  { %1445 = vmatprep.subr.bf16.mxu1 %v1121_v51  ;;  %v598_v14 = vld [vmem:[#allocation10 + $0x290] sm:$0xff]  ;;  %v519_v16 = vld [vmem:[#allocation10 + $0x18] sm:$0xff]  ;;  %v593_v17 = vld [vmem:[#allocation10 + $0x268] sm:$0xff]  ;;  %v1116_v19 = vpack.c.bf16 %v522_v10, %v520_v9 }
  0x99   :  { %v595_v18 = vld [vmem:[#allocation10 + $0x278] sm:$0xff]  ;;  %v1154_v20 = vpack.c.bf16 %v598_v14, %v596_v13  ;;  %v516_v21 = vld [vmem:[#allocation10] sm:$0xff]  ;;  %v518_v22 = vld [vmem:[#allocation10 + $0x10] sm:$0xff]  ;;  %v1115_v23 = vpack.c.bf16 %v519_v16, %v517_v15 }
  0x9a   :  { %1481 = vmatpush1.bf16.msra.mxu0 %v1158_v60  ;;  %v1153_v24 = vpack.c.bf16 %v595_v18, %v593_v17  ;;  %v592_v25 = vld [vmem:[#allocation10 + $0x260] sm:$0xff]  ;;  %v594_v26 = vld [vmem:[#allocation10 + $0x270] sm:$0xff]  ;;  %v577_v27 = vld [vmem:[#allocation10 + $0x1e8] sm:$0xff]  ;;  %v1114_v31 = vpack.c.bf16 %v518_v22, %v516_v21 }
  0x9b   :  { %1446 = vmatpush1.bf16.msra.mxu1 %v1120_v59  ;;  %1482 = vmatprep.subr.bf16.mxu0 %v1157_v0  ;;  %v579_v28 = vld [vmem:[#allocation10 + $0x1f8] sm:$0xff]  ;;  %v589_v29 = vld [vmem:[#allocation10 + $0x248] sm:$0xff]  ;;  %v1152_v32 = vpack.c.bf16 %v594_v26, %v592_v25  ;;  %v576_v33 = vld [vmem:[#allocation10 + $0x1e0] sm:$0xff]  ;;  %v2826_v59 = vshrl.u32 %v398_v45, 7 }
  0x9c   :  { %1447 = vmatprep.subr.bf16.mxu1 %v1119_v63  ;;  %v591_v30 = vld [vmem:[#allocation10 + $0x258] sm:$0xff]  ;;  %v578_v34 = vld [vmem:[#allocation10 + $0x1f0] sm:$0xff]  ;;  %v1145_v35 = vpack.c.bf16 %v579_v28, %v577_v27  ;;  %v588_v37 = vld [vmem:[#allocation10 + $0x240] sm:$0xff] }
  0x9d   :  { %v1151_v36 = vpack.c.bf16 %v591_v30, %v589_v29  ;;  %v590_v38 = vld [vmem:[#allocation10 + $0x250] sm:$0xff]  ;;  %v573_v39 = vld [vmem:[#allocation10 + $0x1c8] sm:$0xff]  ;;  %v575_v40 = vld [vmem:[#allocation10 + $0x1d8] sm:$0xff]  ;;  %v1144_v46 = vpack.c.bf16 %v578_v34, %v576_v33 }
  0x9e   :  { %1483 = vmatpush1.bf16.msra.mxu0 %v1156_v8  ;;  %v585_v41 = vld [vmem:[#allocation10 + $0x228] sm:$0xff]  ;;  %v587_v42 = vld [vmem:[#allocation10 + $0x238] sm:$0xff]  ;;  %v1150_v47 = vpack.c.bf16 %v590_v38, %v588_v37  ;;  %v572_v48 = vld [vmem:[#allocation10 + $0x1c0] sm:$0xff]  ;;  %v1143_v50 = vpack.c.bf16 %v575_v40, %v573_v39  ;;  %v2829_v8 = vsub.s32 %v397_v58, %v2826_v59 }
  0x9f   :  { %1448 = vmatpush1.bf16.msra.mxu1 %v1118_v7  ;;  %1484 = vmatprep.subr.bf16.mxu0 %v1155_v12  ;;  %v574_v49 = vld [vmem:[#allocation10 + $0x1d0] sm:$0xff]  ;;  %v1149_v51 = vpack.c.bf16 %v587_v42, %v585_v41  ;;  %v584_v52 = vld [vmem:[#allocation10 + $0x220] sm:$0xff]  ;;  %v569_v54 = vld [vmem:[#allocation10 + $0x1a8] sm:$0xff] }
  0xa0   :  { %1449 = vmatprep.subr.bf16.mxu1 %v1117_v11  ;;  %v586_v53 = vld [vmem:[#allocation10 + $0x230] sm:$0xff]  ;;  %v571_v55 = vld [vmem:[#allocation10 + $0x1b8] sm:$0xff]  ;;  %v581_v56 = vld [vmem:[#allocation10 + $0x208] sm:$0xff]  ;;  %v1142_v60 = vpack.c.bf16 %v574_v49, %v572_v48 }
  0xa1   :  { %v583_v57 = vld [vmem:[#allocation10 + $0x218] sm:$0xff]  ;;  %v1148_v61 = vpack.c.bf16 %v586_v53, %v584_v52  ;;  %v568_v62 = vld [vmem:[#allocation10 + $0x1a0] sm:$0xff]  ;;  %v570_v63 = vld [vmem:[#allocation10 + $0x1b0] sm:$0xff]  ;;  %v1141_v0 = vpack.c.bf16 %v571_v55, %v569_v54 }
  0xa2   :  { %1485 = vmatpush1.bf16.msra.mxu0 %v1154_v20  ;;  %v1147_v1 = vpack.c.bf16 %v583_v57, %v581_v56  ;;  %v580_v2 = vld [vmem:[#allocation10 + $0x200] sm:$0xff]  ;;  %v582_v3 = vld [vmem:[#allocation10 + $0x210] sm:$0xff]  ;;  %v565_v4 = vld [vmem:[#allocation10 + $0x188] sm:$0xff]  ;;  %v1140_v9 = vpack.c.bf16 %v570_v63, %v568_v62 }
  0xa3   :  { %1450 = vmatpush1.bf16.msra.mxu1 %v1116_v19  ;;  %1486 = vmatprep.subr.bf16.mxu0 %v1153_v24  ;;  %v567_v5 = vld [vmem:[#allocation10 + $0x198] sm:$0xff]  ;;  %v641_v6 = vld [vmem:[#allocation10 + $0x3e8] sm:$0xff]  ;;  %v1146_v10 = vpack.c.bf16 %v582_v3, %v580_v2  ;;  %v564_v11 = vld [vmem:[#allocation10 + $0x180] sm:$0xff] }
  0xa4   :  { %1451 = vmatprep.subr.bf16.mxu1 %v1115_v23  ;;  %v643_v7 = vld [vmem:[#allocation10 + $0x3f8] sm:$0xff]  ;;  %v566_v12 = vld [vmem:[#allocation10 + $0x190] sm:$0xff]  ;;  %v640_v13 = vld [vmem:[#allocation10 + $0x3e0] sm:$0xff]  ;;  %v1139_v14 = vpack.c.bf16 %v567_v5, %v565_v4 }
  0xa5   :  { %v1177_v15 = vpack.c.bf16 %v643_v7, %v641_v6  ;;  %v642_v16 = vld [vmem:[#allocation10 + $0x3f0] sm:$0xff]  ;;  %v561_v17 = vld [vmem:[#allocation10 + $0x168] sm:$0xff]  ;;  %v384_v18 = vld [vmem:[#allocation8] sm:$0xff]  ;;  %v1138_v24 = vpack.c.bf16 %v566_v12, %v564_v11 }
  0xa6   :  { %1487 = vmatpush1.bf16.msra.mxu0 %v1152_v32  ;;  %v563_v19 = vld [vmem:[#allocation10 + $0x178] sm:$0xff]  ;;  %v637_v20 = vld [vmem:[#allocation10 + $0x3c8] sm:$0xff]  ;;  %v394_v22 = vcombine.high %v384_v18, %v384_v18  ;;  %v2832_v23 = vrot.slane %v384_v18, %v2829_v8  ;;  %v1176_v25 = vpack.c.bf16 %v642_v16, %v640_v13  ;;  %v560_v26 = vld [vmem:[#allocation10 + $0x160] sm:$0xff] }
  0xa7   :  { %1452 = vmatpush1.bf16.msra.mxu1 %v1114_v31  ;;  %1488 = vmatprep.subr.bf16.mxu0 %v1151_v36  ;;  %v639_v21 = vld [vmem:[#allocation10 + $0x3d8] sm:$0xff]  ;;  %v562_v27 = vld [vmem:[#allocation10 + $0x170] sm:$0xff]  ;;  %v1137_v29 = vpack.c.bf16 %v563_v19, %v561_v17  ;;  %v636_v31 = vld [vmem:[#allocation10 + $0x3c0] sm:$0xff] }
  0xa8   :  { %1453 = vmatprep.subr.bf16.mxu1 %v1145_v35  ;;  %v409_v28 = vcombine.high %v2832_v23, %v2832_v23  ;;  %v1175_v30 = vpack.c.bf16 %v639_v21, %v637_v20  ;;  %v638_v32 = vld [vmem:[#allocation10 + $0x3d0] sm:$0xff]  ;;  %v557_v33 = vld [vmem:[#allocation10 + $0x148] sm:$0xff]  ;;  %v2837_v34 = vrot.slane %v394_v22, %v2829_v8  ;;  %v559_v35 = vld [vmem:[#allocation10 + $0x158] sm:$0xff]  ;;  %v1136_v40 = vpack.c.bf16 %v562_v27, %v560_v26 }
  0xa9   :  { %v633_v36 = vld [vmem:[#allocation10 + $0x3a8] sm:$0xff]  ;;  %v635_v37 = vld [vmem:[#allocation10 + $0x3b8] sm:$0xff]  ;;  %v1174_v41 = vpack.c.bf16 %v638_v32, %v636_v31  ;;  %v556_v42 = vld [vmem:[#allocation10 + $0x140] sm:$0xff]  ;;  %v1135_v44 = vpack.c.bf16 %v559_v35, %v557_v33 }
  0xaa   :  { %1489 = vmatpush1.bf16.msra.mxu0 %v1150_v47  ;;  %v498_v38 = vpack.c.bf16 %v409_v28, %v409_v28  ;;  %v410_v39 = vcombine.high %v2837_v34, %v2837_v34  ;;  %v558_v43 = vld [vmem:[#allocation10 + $0x150] sm:$0xff]  ;;  %v1173_v45 = vpack.c.bf16 %v635_v37, %v633_v36  ;;  %v553_v48 = vld [vmem:[#allocation10 + $0x128] sm:$0xff]  ;;  %v631_v52 = vld [vmem:[#allocation10 + $0x398] sm:$0xff]  ;;  %v497_v28 = vpack.c.bf16 %v2832_v23, %v2832_v23 }
  0xab   :  { %1454 = vmatpush2.bf16.msra.mxu1 %v1144_v46  ;;  %1490 = vmatprep.subr.bf16.mxu0 %v1149_v51  ;;  %v632_v46 = vld [vmem:[#allocation10 + $0x3a0] sm:$0xff]  ;;  %v634_v47 = vld [vmem:[#allocation10 + $0x3b0] sm:$0xff]  ;;  %v629_v51 = vld [vmem:[#allocation10 + $0x388] sm:$0xff]  ;;  %v1134_v53 = vpack.c.bf16 %v558_v43, %v556_v42 }
  0xac   :  { %1455 = vmatprep.subr.bf16.mxu1 %v1143_v50  ;;  %v500_v49 = vpack.c.bf16 %v410_v39, %v410_v39  ;;  %v555_v50 = vld [vmem:[#allocation10 + $0x138] sm:$0xff]  ;;  %1469 = vmatprep.mubr.bf16.mxu1 %v498_v38  ;;  %v1172_v54 = vpack.c.bf16 %v634_v47, %v632_v46  ;;  %v552_v55 = vld [vmem:[#allocation10 + $0x120] sm:$0xff]  ;;  %v554_v56 = vld [vmem:[#allocation10 + $0x130] sm:$0xff]  ;;  %v1171_v58 = vpack.c.bf16 %v631_v52, %v629_v51 }
  0xad   :  { %v1133_v57 = vpack.c.bf16 %v555_v50, %v553_v48  ;;  %v549_v62 = vld [vmem:[#allocation10 + $0x108] sm:$0xff]  ;;  %v551_v63 = vld [vmem:[#allocation10 + $0x118] sm:$0xff]  ;;  %v1132_v2 = vpack.c.bf16 %v554_v56, %v552_v55  ;;  %v548_v4 = vld [vmem:[#allocation10 + $0x100] sm:$0xff] }
  0xae   :  { %1491 = vmatpush1.bf16.msra.mxu0 %v1148_v61  ;;  %1510 = vmatprep.mubr.bf16.mxu0 %v500_v49  ;;  %v630_v61 = vld [vmem:[#allocation10 + $0x390] sm:$0xff]  ;;  %v1131_v6 = vpack.c.bf16 %v551_v63, %v549_v62  ;;  %v621_v11 = vld [vmem:[#allocation10 + $0x348] sm:$0xff]  ;;  %v623_v12 = vld [vmem:[#allocation10 + $0x358] sm:$0xff] }
  0xaf   :  { %1456 = vmatpush2.bf16.msra.mxu1 %v1142_v60  ;;  %1492 = vmatprep.subr.bf16.mxu0 %v1147_v1  ;;  %v628_v60 = vld [vmem:[#allocation10 + $0x380] sm:$0xff]  ;;  %v627_v1 = vld [vmem:[#allocation10 + $0x378] sm:$0xff]  ;;  %v550_v5 = vld [vmem:[#allocation10 + $0x110] sm:$0xff]  ;;  %v1167_v19 = vpack.c.bf16 %v623_v12, %v621_v11 }
  0xb0   :  { %1457 = vmatprep.subr.bf16.mxu1 %v1141_v0  ;;  %v625_v0 = vld [vmem:[#allocation10 + $0x368] sm:$0xff]  ;;  %v1170_v3 = vpack.c.bf16 %v630_v61, %v628_v60  ;;  %v620_v17 = vld [vmem:[#allocation10 + $0x340] sm:$0xff]  ;;  %v622_v18 = vld [vmem:[#allocation10 + $0x350] sm:$0xff] }
  0xb1   :  { %v1169_v7 = vpack.c.bf16 %v627_v1, %v625_v0  ;;  %v673_v13 = vld [vmem:[#allocation10 + $0x4e8] sm:$0xff]  ;;  %v672_v21 = vld [vmem:[#allocation10 + $0x4e0] sm:$0xff]  ;;  %v674_v22 = vld [vmem:[#allocation10 + $0x4f0] sm:$0xff] }
  0xb2   :  { %1493 = vmatpush1.bf16.msra.mxu0 %v1146_v10  ;;  %v626_v10 = vld [vmem:[#allocation10 + $0x370] sm:$0xff]  ;;  %v669_v26 = vld [vmem:[#allocation10 + $0x4c8] sm:$0xff]  ;;  %v671_v27 = vld [vmem:[#allocation10 + $0x4d8] sm:$0xff] }
  0xb3   :  { %1458 = vmatpush2.bf16.msra.mxu1 %v1140_v9  ;;  %1494 = vmatprep.subr.bf16.mxu0 %v1177_v15  ;;  %v624_v9 = vld [vmem:[#allocation10 + $0x360] sm:$0xff]  ;;  %v1130_v15 = vpack.c.bf16 %v550_v5, %v548_v4  ;;  %v618_v32 = vld [vmem:[#allocation10 + $0x330] sm:$0xff]  ;;  %v1191_v35 = vpack.c.bf16 %v671_v27, %v669_v26  ;;  %v613_v38 = vld [vmem:[#allocation10 + $0x308] sm:$0xff] }
  0xb4   :  { %1459 = vmatprep.subr.bf16.mxu1 %v1139_v14  ;;  %v675_v14 = vld [vmem:[#allocation10 + $0x4f8] sm:$0xff]  ;;  %v1168_v16 = vpack.c.bf16 %v626_v10, %v624_v9  ;;  %v616_v31 = vld [vmem:[#allocation10 + $0x320] sm:$0xff]  ;;  %v670_v37 = vld [vmem:[#allocation10 + $0x4d0] sm:$0xff] }
  0xb5   :  { %v1193_v20 = vpack.c.bf16 %v675_v14, %v673_v13  ;;  %v668_v36 = vld [vmem:[#allocation10 + $0x4c0] sm:$0xff]  ;;  %v615_v39 = vld [vmem:[#allocation10 + $0x318] sm:$0xff]  ;;  %v1164_v23 = vpack.c.bf16 %v618_v32, %v616_v31  ;;  %v666_v48 = vld [vmem:[#allocation10 + $0x4b0] sm:$0xff] }
  0xb6   :  { %1495 = vmatpush2.bf16.msra.mxu0 %v1176_v25  ;;  %v619_v25 = vld [vmem:[#allocation10 + $0x338] sm:$0xff]  ;;  %v1190_v42 = vpack.c.bf16 %v670_v37, %v668_v36  ;;  %v612_v43 = vld [vmem:[#allocation10 + $0x300] sm:$0xff]  ;;  %v661_v49 = vld [vmem:[#allocation10 + $0x488] sm:$0xff] }
  0xb7   :  { %1460 = vmatpush2.bf16.msra.mxu1 %v1138_v24  ;;  %1496 = vmatprep.subr.bf16.mxu0 %v1175_v30  ;;  %v617_v24 = vld [vmem:[#allocation10 + $0x328] sm:$0xff]  ;;  %v1192_v30 = vpack.c.bf16 %v674_v22, %v672_v21  ;;  %v664_v47 = vld [vmem:[#allocation10 + $0x4a0] sm:$0xff]  ;;  %v663_v50 = vld [vmem:[#allocation10 + $0x498] sm:$0xff] }
  0xb8   :  { %1461 = vmatprep.subr.bf16.mxu1 %v1137_v29  ;;  %v1166_v29 = vpack.c.bf16 %v622_v18, %v620_v17  ;;  %v1165_v33 = vpack.c.bf16 %v619_v25, %v617_v24  ;;  %v737_v51 = vld [vmem:[#allocation10 + $0x6e8] sm:$0xff]  ;;  %v739_v52 = vld [vmem:[#allocation10 + $0x6f8] sm:$0xff]  ;;  %v660_v55 = vld [vmem:[#allocation10 + $0x480] sm:$0xff] }
  0xb9   :  { %v662_v56 = vld [vmem:[#allocation10 + $0x490] sm:$0xff]  ;;  %v736_v60 = vld [vmem:[#allocation10 + $0x6e0] sm:$0xff]  ;;  %v657_v62 = vld [vmem:[#allocation10 + $0x468] sm:$0xff] }
  0xba   :  { %1497 = vmatpush2.bf16.msra.mxu0 %v1174_v41  ;;  %v667_v41 = vld [vmem:[#allocation10 + $0x4b8] sm:$0xff]  ;;  %v738_v61 = vld [vmem:[#allocation10 + $0x6f0] sm:$0xff]  ;;  %v733_v0 = vld [vmem:[#allocation10 + $0x6c8] sm:$0xff] }
  0xbb   :  { %1462 = vmatpush2.bf16.msra.mxu1 %v1136_v40  ;;  %1498 = vmatprep.subr.bf16.mxu0 %v1173_v45  ;;  %v665_v40 = vld [vmem:[#allocation10 + $0x4a8] sm:$0xff]  ;;  %v1163_v45 = vpack.c.bf16 %v615_v39, %v613_v38  ;;  %v659_v63 = vld [vmem:[#allocation10 + $0x478] sm:$0xff]  ;;  %v1224_v4 = vpack.c.bf16 %v738_v61, %v736_v60  ;;  %v656_v5 = vld [vmem:[#allocation10 + $0x460] sm:$0xff] }
  0xbc   :  { %1463 = vmatprep.subr.bf16.mxu1 %v1135_v44  ;;  %v614_v44 = vld [vmem:[#allocation10 + $0x310] sm:$0xff]  ;;  %v1189_v46 = vpack.c.bf16 %v667_v41, %v665_v40  ;;  %v735_v1 = vld [vmem:[#allocation10 + $0x6d8] sm:$0xff]  ;;  %v732_v10 = vld [vmem:[#allocation10 + $0x6c0] sm:$0xff] }
  0xbd   :  { %v1223_v9 = vpack.c.bf16 %v735_v1, %v733_v0  ;;  %v734_v11 = vld [vmem:[#allocation10 + $0x6d0] sm:$0xff]  ;;  %v653_v12 = vld [vmem:[#allocation10 + $0x448] sm:$0xff]  ;;  %v655_v13 = vld [vmem:[#allocation10 + $0x458] sm:$0xff] }
  0xbe   :  { %1499 = vmatpush2.bf16.msra.mxu0 %v1172_v54  ;;  %v1188_v54 = vpack.c.bf16 %v666_v48, %v664_v47  ;;  %v729_v14 = vld [vmem:[#allocation10 + $0x6a8] sm:$0xff]  ;;  %v652_v17 = vld [vmem:[#allocation10 + $0x440] sm:$0xff]  ;;  %v654_v18 = vld [vmem:[#allocation10 + $0x450] sm:$0xff] }
  0xbf   :  { %1464 = vmatpush2.bf16.msra.mxu1 %v1134_v53  ;;  %1500 = vmatprep.subr.bf16.mxu0 %v1171_v58  ;;  %v1162_v53 = vpack.c.bf16 %v614_v44, %v612_v43  ;;  %v1225_v58 = vpack.c.bf16 %v739_v52, %v737_v51  ;;  %v730_v22 = vld [vmem:[#allocation10 + $0x6b0] sm:$0xff]  ;;  %v649_v24 = vld [vmem:[#allocation10 + $0x428] sm:$0xff]  ;;  %v651_v25 = vld [vmem:[#allocation10 + $0x438] sm:$0xff] }
  0xc0   :  { %1465 = vmatprep.subr.bf16.mxu1 %v1133_v57  ;;  %v1187_v57 = vpack.c.bf16 %v663_v50, %v661_v49  ;;  %v725_v26 = vld [vmem:[#allocation10 + $0x688] sm:$0xff]  ;;  %v727_v27 = vld [vmem:[#allocation10 + $0x698] sm:$0xff]  ;;  %v648_v31 = vld [vmem:[#allocation10 + $0x420] sm:$0xff] }
  0xc1   :  { %v650_v32 = vld [vmem:[#allocation10 + $0x430] sm:$0xff]  ;;  %v724_v36 = vld [vmem:[#allocation10 + $0x680] sm:$0xff]  ;;  %v645_v38 = vld [vmem:[#allocation10 + $0x408] sm:$0xff] }
  0xc2   :  { %1501 = vmatpush2.bf16.msra.mxu0 %v1170_v3  ;;  %v1186_v3 = vpack.c.bf16 %v662_v56, %v660_v55  ;;  %v726_v37 = vld [vmem:[#allocation10 + $0x690] sm:$0xff]  ;;  %v647_v41 = vld [vmem:[#allocation10 + $0x418] sm:$0xff]  ;;  %v1180_v44 = vpack.c.bf16 %v650_v32, %v648_v31  ;;  %v720_v51 = vld [vmem:[#allocation10 + $0x660] sm:$0xff] }
  0xc3   :  { %1466 = vmatpush2.bf16.msra.mxu1 %v1132_v2  ;;  %1502 = vmatprep.subr.bf16.mxu0 %v1169_v7  ;;  %v499_v2 = vpack.c.bf16 %v2837_v34, %v2837_v34  ;;  %v1185_v7 = vpack.c.bf16 %v659_v63, %v657_v62  ;;  %v646_v47 = vld [vmem:[#allocation10 + $0x410] sm:$0xff]  ;;  %v1179_v49 = vpack.c.bf16 %v647_v41, %v645_v38  ;;  %v707_v55 = vld [vmem:[#allocation10 + $0x5f8] sm:$0xff]  ;;  %v717_v56 = vld [vmem:[#allocation10 + $0x648] sm:$0xff] }
  0xc4   :  { %1467 = vmatprep.subr.bf16.mxu1 %v1131_v6  ;;  %v658_v6 = vld [vmem:[#allocation10 + $0x470] sm:$0xff]  ;;  %v704_v62 = vld [vmem:[#allocation10 + $0x5e0] sm:$0xff]  ;;  %v695_v31 = vld [vmem:[#allocation10 + $0x598] sm:$0xff] }
  0xc5   :  { %v1184_v34 = vpack.c.bf16 %v658_v6, %v656_v5  ;;  %v722_v52 = vld [vmem:[#allocation10 + $0x670] sm:$0xff]  ;;  %v701_v5 = vld [vmem:[#allocation10 + $0x5c8] sm:$0xff]  ;;  %v703_v6 = vld [vmem:[#allocation10 + $0x5d8] sm:$0xff] }
  0xc6   :  { %1503 = vmatpush2.bf16.msra.mxu0 %v1168_v16  ;;  %v1222_v16 = vpack.c.bf16 %v734_v11, %v732_v10  ;;  %v1216_v61 = vpack.c.bf16 %v722_v52, %v720_v51  ;;  %v706_v63 = vld [vmem:[#allocation10 + $0x5f0] sm:$0xff]  ;;  %v769_v32 = vld [vmem:[#allocation10 + $0x7e8] sm:$0xff] }
  0xc7   :  { %1468 = vmatpush2.bf16.msra.mxu1 %v1130_v15  ;;  %1504 = vmatprep.subr.bf16.mxu0 %v1167_v19  ;;  %v731_v15 = vld [vmem:[#allocation10 + $0x6b8] sm:$0xff]  ;;  %v728_v19 = vld [vmem:[#allocation10 + $0x6a0] sm:$0xff]  ;;  %v1208_v10 = vpack.c.bf16 %v706_v63, %v704_v62  ;;  %v694_v38 = vld [vmem:[#allocation10 + $0x590] sm:$0xff] }
  0xc8   :  { %1519 = vmatprep.subr.bf16.mxu1 %v1193_v20  ;;  %v1183_v20 = vpack.c.bf16 %v655_v13, %v653_v12  ;;  %v1221_v21 = vpack.c.bf16 %v731_v15, %v729_v14  ;;  %v700_v12 = vld [vmem:[#allocation10 + $0x5c0] sm:$0xff]  ;;  %v702_v13 = vld [vmem:[#allocation10 + $0x5d0] sm:$0xff]  ;;  %v1207_v14 = vpack.c.bf16 %v703_v6, %v701_v5  ;;  %v681_v5 = vld [vmem:[#allocation10 + $0x528] sm:$0xff] }
  0xc9   :  { %v690_v51 = vld [vmem:[#allocation10 + $0x570] sm:$0xff]  ;;  %v684_v63 = vld [vmem:[#allocation10 + $0x540] sm:$0xff]  ;;  %v683_v6 = vld [vmem:[#allocation10 + $0x538] sm:$0xff] }
  0xca   :  { %1470 = vmatmul.mubr.bf16.vlgmr.msra.gmra.mxu1 %v497_v28  ;;  %1505 = vmatpush2.bf16.msra.mxu0 %v1166_v29  ;;  %v1182_v28 = vpack.c.bf16 %v654_v18, %v652_v17  ;;  %v1220_v29 = vpack.c.bf16 %v730_v22, %v728_v19  ;;  %v697_v17 = vld [vmem:[#allocation10 + $0x5a8] sm:$0xff]  ;;  %v699_v18 = vld [vmem:[#allocation10 + $0x5b8] sm:$0xff] }
  0xcb   :  { %1520 = vmatpush1.bf16.msra.mxu1 %v1192_v30  ;;  %1506 = vmatprep.subr.bf16.mxu0 %v1165_v33  ;;  %v1181_v30 = vpack.c.bf16 %v651_v25, %v649_v24  ;;  %v385_v33 = vld [vmem:[#allocation8 + $0x8] sm:$0xff]  ;;  %v698_v25 = vld [vmem:[#allocation10 + $0x5b0] sm:$0xff] }
  0xcc   :  { %1521 = vmatprep.subr.bf16.mxu1 %v1191_v35  ;;  %v1219_v35 = vpack.c.bf16 %v727_v27, %v725_v26  ;;  %v2846_v39 = vrot.slane %v385_v33, %v2829_v8  ;;  %v411_v40 = vcombine.high %v385_v33, %v385_v33  ;;  %v709_v19 = vld [vmem:[#allocation10 + $0x608] sm:$0xff]  ;;  %v696_v24 = vld [vmem:[#allocation10 + $0x5a0] sm:$0xff]  ;;  %v1205_v26 = vpack.c.bf16 %v699_v18, %v697_v17  ;;  %v771_v33 = vld [vmem:[#allocation10 + $0x7f8] sm:$0xff] }
  0xcd   :  { %v1241_v41 = vpack.c.bf16 %v771_v33, %v769_v32  ;;  %v677_v17 = vld [vmem:[#allocation10 + $0x508] sm:$0xff]  ;;  %v679_v18 = vld [vmem:[#allocation10 + $0x518] sm:$0xff] }
  0xce   :  { %1507 = vmatpush2.bf16.msra.mxu0 %v1164_v23  ;;  %v721_v23 = vld [vmem:[#allocation10 + $0x668] sm:$0xff]  ;;  %v426_v43 = vcombine.high %v2846_v39, %v2846_v39  ;;  %v2851_v48 = vrot.slane %v411_v40, %v2829_v8  ;;  %v803_v33 = vld [vmem:[#allocation10 + $0x8f8] sm:$0xff] }
  0xcf   :  { %1522 = vmatpush1.bf16.msra.mxu1 %v1190_v42  ;;  %1508 = vmatprep.subr.bf16.mxu0 %v1163_v45  ;;  %v723_v42 = vld [vmem:[#allocation10 + $0x678] sm:$0xff]  ;;  %v1218_v45 = vpack.c.bf16 %v726_v37, %v724_v36  ;;  %v692_v37 = vld [vmem:[#allocation10 + $0x580] sm:$0xff]  ;;  %v801_v32 = vld [vmem:[#allocation10 + $0x8e8] sm:$0xff] }
  0xd0   :  { %1523 = vmatprep.subr.bf16.mxu1 %v1189_v46  ;;  %v644_v46 = vld [vmem:[#allocation10 + $0x400] sm:$0xff]  ;;  %v1217_v50 = vpack.c.bf16 %v723_v42, %v721_v23  ;;  %v770_v42 = vld [vmem:[#allocation10 + $0x7f0] sm:$0xff] }
  0xd1   :  { %v1178_v60 = vpack.c.bf16 %v646_v47, %v644_v46  ;;  %v768_v23 = vld [vmem:[#allocation10 + $0x7e0] sm:$0xff]  ;;  %v767_v46 = vld [vmem:[#allocation10 + $0x7d8] sm:$0xff]  ;;  %v1202_v47 = vpack.c.bf16 %v694_v38, %v692_v37  ;;  %v750_v38 = vld [vmem:[#allocation10 + $0x750] sm:$0xff] }
  0xd2   :  { %1509 = vmatpush2.bf16.msra.mxu0 %v1162_v53  ;;  %v705_v53 = vld [vmem:[#allocation10 + $0x5e8] sm:$0xff]  ;;  %v748_v37 = vld [vmem:[#allocation10 + $0x740] sm:$0xff] }
  0xd3   :  { %1524 = vmatpush1.bf16.msra.mxu1 %v1188_v54  ;;  %1560 = vmatprep.subr.bf16.mxu0 %v1225_v58  ;;  %v502_v54 = vpack.c.bf16 %v426_v43, %v426_v43  ;;  %v427_v58 = vcombine.high %v2851_v48, %v2851_v48  ;;  %v1209_v1 = vpack.c.bf16 %v707_v55, %v705_v53  ;;  %v689_v43 = vld [vmem:[#allocation10 + $0x568] sm:$0xff]  ;;  %v766_v55 = vld [vmem:[#allocation10 + $0x7d0] sm:$0xff] }
  0xd4   :  { %1525 = vmatprep.subr.bf16.mxu1 %v1187_v57  ;;  %v719_v57 = vld [vmem:[#allocation10 + $0x658] sm:$0xff] }
  0xd5   :  { %1511 = vmatmul.mubr.bf16.vlgmr.msra.gmra.mxu0 %v499_v2  ;;  %1551 = vmatprep.mubr.bf16.mxu1 %v502_v54  ;;  %v504_v0 = vpack.c.bf16 %v427_v58, %v427_v58  ;;  %v1215_v2 = vpack.c.bf16 %v719_v57, %v717_v56  ;;  %v764_v54 = vld [vmem:[#allocation10 + $0x7c0] sm:$0xff]  ;;  %v685_v56 = vld [vmem:[#allocation10 + $0x548] sm:$0xff]  ;;  %v687_v57 = vld [vmem:[#allocation10 + $0x558] sm:$0xff] }
  0xd6   :  { %1561 = vmatpush1.bf16.msra.mxu0 %v1224_v4  ;;  %v718_v4 = vld [vmem:[#allocation10 + $0x650] sm:$0xff]  ;;  %v761_v58 = vld [vmem:[#allocation10 + $0x7a8] sm:$0xff]  ;;  %v1238_v62 = vpack.c.bf16 %v766_v55, %v764_v54 }
  0xd7   :  { %1526 = vmatpush1.bf16.msra.mxu1 %v1186_v3  ;;  %1562 = vmatprep.subr.bf16.mxu0 %v1223_v9  ;;  %v716_v3 = vld [vmem:[#allocation10 + $0x640] sm:$0xff]  ;;  %v715_v9 = vld [vmem:[#allocation10 + $0x638] sm:$0xff] }
  0xd8   :  { %1527 = vmatprep.subr.bf16.mxu1 %v1185_v7  ;;  %v713_v7 = vld [vmem:[#allocation10 + $0x628] sm:$0xff]  ;;  %1592 = vmatprep.mubr.bf16.mxu0 %v504_v0  ;;  %v1214_v11 = vpack.c.bf16 %v718_v4, %v716_v3  ;;  %v686_v0 = vld [vmem:[#allocation10 + $0x550] sm:$0xff]  ;;  %v760_v3 = vld [vmem:[#allocation10 + $0x7a0] sm:$0xff] }
  0xd9   :  { %v1213_v15 = vpack.c.bf16 %v715_v9, %v713_v7  ;;  %v762_v4 = vld [vmem:[#allocation10 + $0x7b0] sm:$0xff]  ;;  %v757_v7 = vld [vmem:[#allocation10 + $0x788] sm:$0xff]  ;;  %v759_v9 = vld [vmem:[#allocation10 + $0x798] sm:$0xff] }
  0xda   :  { %1563 = vmatpush1.bf16.msra.mxu0 %v1222_v16  ;;  %v714_v16 = vld [vmem:[#allocation10 + $0x630] sm:$0xff] }
  0xdb   :  { %1528 = vmatpush1.bf16.msra.mxu1 %v1184_v34  ;;  %1564 = vmatprep.subr.bf16.mxu0 %v1221_v21  ;;  %v712_v34 = vld [vmem:[#allocation10 + $0x620] sm:$0xff]  ;;  %v1206_v21 = vpack.c.bf16 %v702_v13, %v700_v12  ;;  %v682_v13 = vld [vmem:[#allocation10 + $0x530] sm:$0xff] }
  0xdc   :  { %1529 = vmatprep.subr.bf16.mxu1 %v1183_v20  ;;  %v711_v20 = vld [vmem:[#allocation10 + $0x618] sm:$0xff]  ;;  %v1212_v22 = vpack.c.bf16 %v714_v16, %v712_v34  ;;  %v680_v12 = vld [vmem:[#allocation10 + $0x520] sm:$0xff]  ;;  %v758_v16 = vld [vmem:[#allocation10 + $0x790] sm:$0xff] }
  0xdd   :  { %v1211_v27 = vpack.c.bf16 %v711_v20, %v709_v19  ;;  %v756_v34 = vld [vmem:[#allocation10 + $0x780] sm:$0xff]  ;;  %v753_v19 = vld [vmem:[#allocation10 + $0x768] sm:$0xff]  ;;  %v755_v20 = vld [vmem:[#allocation10 + $0x778] sm:$0xff] }
  0xde   :  { %1565 = vmatpush1.bf16.msra.mxu0 %v1220_v29  ;;  %v710_v29 = vld [vmem:[#allocation10 + $0x610] sm:$0xff] }
  0xdf   :  { %1530 = vmatpush1.bf16.msra.mxu1 %v1182_v28  ;;  %1566 = vmatprep.subr.bf16.mxu0 %v1219_v35  ;;  %v708_v28 = vld [vmem:[#allocation10 + $0x600] sm:$0xff]  ;;  %v1204_v35 = vpack.c.bf16 %v698_v25, %v696_v24  ;;  %v678_v25 = vld [vmem:[#allocation10 + $0x510] sm:$0xff] }
  0xe0   :  { %1531 = vmatprep.subr.bf16.mxu1 %v1181_v30  ;;  %v693_v30 = vld [vmem:[#allocation10 + $0x588] sm:$0xff]  ;;  %v1210_v36 = vpack.c.bf16 %v710_v29, %v708_v28  ;;  %v676_v24 = vld [vmem:[#allocation10 + $0x500] sm:$0xff]  ;;  %v754_v29 = vld [vmem:[#allocation10 + $0x770] sm:$0xff] }
  0xe1   :  { %v1203_v40 = vpack.c.bf16 %v695_v31, %v693_v30  ;;  %v752_v28 = vld [vmem:[#allocation10 + $0x760] sm:$0xff]  ;;  %v749_v30 = vld [vmem:[#allocation10 + $0x748] sm:$0xff]  ;;  %v751_v31 = vld [vmem:[#allocation10 + $0x758] sm:$0xff] }
  0xe2   :  { %1567 = vmatpush1.bf16.msra.mxu0 %v1218_v45  ;;  %v765_v45 = vld [vmem:[#allocation10 + $0x7c8] sm:$0xff] }
  0xe3   :  { %1532 = vmatpush1.bf16.msra.mxu1 %v1180_v44  ;;  %1568 = vmatprep.subr.bf16.mxu0 %v1217_v50  ;;  %v691_v44 = vld [vmem:[#allocation10 + $0x578] sm:$0xff]  ;;  %v688_v50 = vld [vmem:[#allocation10 + $0x560] sm:$0xff]  ;;  %v1239_v53 = vpack.c.bf16 %v767_v46, %v765_v45  ;;  %v797_v45 = vld [vmem:[#allocation10 + $0x8c8] sm:$0xff] }
  0xe4   :  { %1533 = vmatprep.subr.bf16.mxu1 %v1179_v49  ;;  %v1240_v49 = vpack.c.bf16 %v770_v42, %v768_v23  ;;  %v1201_v52 = vpack.c.bf16 %v691_v44, %v689_v43  ;;  %v800_v23 = vld [vmem:[#allocation10 + $0x8e0] sm:$0xff]  ;;  %v802_v42 = vld [vmem:[#allocation10 + $0x8f0] sm:$0xff]  ;;  %v745_v43 = vld [vmem:[#allocation10 + $0x728] sm:$0xff] }
  0xe5   :  { %v747_v44 = vld [vmem:[#allocation10 + $0x738] sm:$0xff] }
  0xe6   :  { %1569 = vmatpush1.bf16.msra.mxu0 %v1216_v61  ;;  %v1200_v61 = vpack.c.bf16 %v690_v51, %v688_v50  ;;  %v799_v46 = vld [vmem:[#allocation10 + $0x8d8] sm:$0xff]  ;;  %v1230_v50 = vpack.c.bf16 %v750_v38, %v748_v37  ;;  %v1256_v51 = vpack.c.bf16 %v802_v42, %v800_v23  ;;  %v1229_v55 = vpack.c.bf16 %v747_v44, %v745_v43  ;;  %v860_v37 = vld [vmem:[#allocation10 + $0xac0] sm:$0xff]  ;;  %v862_v38 = vld [vmem:[#allocation10 + $0xad0] sm:$0xff] }
  0xe7   :  { %1534 = vmatpush1.bf16.msra.mxu1 %v1178_v60  ;;  %1570 = vmatprep.subr.bf16.mxu0 %v1215_v2  ;;  %v763_v60 = vld [vmem:[#allocation10 + $0x7b8] sm:$0xff]  ;;  %v857_v23 = vld [vmem:[#allocation10 + $0xaa8] sm:$0xff]  ;;  %v1286_v44 = vpack.c.bf16 %v862_v38, %v860_v37  ;;  %v840_v38 = vld [vmem:[#allocation10 + $0xa20] sm:$0xff] }
  0xe8   :  { %1535 = vmatprep.subr.bf16.mxu1 %v1209_v1  ;;  %v1199_v1 = vpack.c.bf16 %v687_v57, %v685_v56  ;;  %v1237_v2 = vpack.c.bf16 %v763_v60, %v761_v58  ;;  %v1255_v56 = vpack.c.bf16 %v799_v46, %v797_v45  ;;  %v796_v57 = vld [vmem:[#allocation10 + $0x8c0] sm:$0xff]  ;;  %v798_v58 = vld [vmem:[#allocation10 + $0x8d0] sm:$0xff]  ;;  %v741_v60 = vld [vmem:[#allocation10 + $0x708] sm:$0xff] }
  0xe9   :  { %v859_v42 = vld [vmem:[#allocation10 + $0xab8] sm:$0xff]  ;;  %v780_v45 = vld [vmem:[#allocation10 + $0x840] sm:$0xff]  ;;  %v782_v46 = vld [vmem:[#allocation10 + $0x850] sm:$0xff] }
  0xea   :  { %1571 = vmatpush1.bf16.msra.mxu0 %v1214_v11  ;;  %v1236_v11 = vpack.c.bf16 %v762_v4, %v760_v3  ;;  %v740_v3 = vld [vmem:[#allocation10 + $0x700] sm:$0xff]  ;;  %v742_v4 = vld [vmem:[#allocation10 + $0x710] sm:$0xff] }
  0xeb   :  { %1536 = vmatpush2.bf16.msra.mxu1 %v1208_v10  ;;  %1572 = vmatprep.subr.bf16.mxu0 %v1213_v15  ;;  %v1198_v10 = vpack.c.bf16 %v686_v0, %v684_v63  ;;  %v1235_v15 = vpack.c.bf16 %v759_v9, %v757_v7  ;;  %v792_v9 = vld [vmem:[#allocation10 + $0x8a0] sm:$0xff] }
  0xec   :  { %1537 = vmatprep.subr.bf16.mxu1 %v1207_v14  ;;  %v1197_v14 = vpack.c.bf16 %v683_v6, %v681_v5 }
  0xee   :  { %1573 = vmatpush1.bf16.msra.mxu0 %v1212_v22  ;;  %v1234_v22 = vpack.c.bf16 %v758_v16, %v756_v34  ;;  %v1226_v34 = vpack.c.bf16 %v742_v4, %v740_v3  ;;  %v849_v3 = vld [vmem:[#allocation10 + $0xa68] sm:$0xff]  ;;  %v851_v4 = vld [vmem:[#allocation10 + $0xa78] sm:$0xff] }
  0xef   :  { %1538 = vmatpush2.bf16.msra.mxu1 %v1206_v21  ;;  %1574 = vmatprep.subr.bf16.mxu0 %v1211_v27  ;;  %v1196_v21 = vpack.c.bf16 %v682_v13, %v680_v12  ;;  %v1233_v27 = vpack.c.bf16 %v755_v20, %v753_v19  ;;  %v791_v12 = vld [vmem:[#allocation10 + $0x898] sm:$0xff]  ;;  %v865_v13 = vld [vmem:[#allocation10 + $0xae8] sm:$0xff] }
  0xf0   :  { %1539 = vmatprep.subr.bf16.mxu1 %v1205_v26  ;;  %v1195_v26 = vpack.c.bf16 %v679_v18, %v677_v17  ;;  %v788_v17 = vld [vmem:[#allocation10 + $0x880] sm:$0xff]  ;;  %v790_v18 = vld [vmem:[#allocation10 + $0x890] sm:$0xff] }
  0xf2   :  { %1575 = vmatpush1.bf16.msra.mxu0 %v1210_v36  ;;  %v1232_v36 = vpack.c.bf16 %v754_v29, %v752_v28  ;;  %v503_v29 = vpack.c.bf16 %v2851_v48, %v2851_v48 }
  0xf3   :  { %1540 = vmatpush2.bf16.msra.mxu1 %v1204_v35  ;;  %1576 = vmatprep.subr.bf16.mxu0 %v1241_v41  ;;  %v1194_v35 = vpack.c.bf16 %v678_v25, %v676_v24  ;;  %v1257_v41 = vpack.c.bf16 %v803_v33, %v801_v32  ;;  %v785_v24 = vld [vmem:[#allocation10 + $0x868] sm:$0xff]  ;;  %v787_v25 = vld [vmem:[#allocation10 + $0x878] sm:$0xff]  ;;  %v784_v32 = vld [vmem:[#allocation10 + $0x860] sm:$0xff] }
  0xf4   :  { %1541 = vmatprep.subr.bf16.mxu1 %v1203_v40  ;;  %v1231_v40 = vpack.c.bf16 %v751_v31, %v749_v30  ;;  %v1250_v30 = vpack.c.bf16 %v790_v18, %v788_v17  ;;  %v786_v33 = vld [vmem:[#allocation10 + $0x870] sm:$0xff]  ;;  %v847_v17 = vld [vmem:[#allocation10 + $0xa58] sm:$0xff] }
  0xf5   :  { %v1248_v48 = vpack.c.bf16 %v786_v33, %v784_v32  ;;  %v828_v33 = vld [vmem:[#allocation10 + $0x9c0] sm:$0xff] }
  0xf6   :  { %1577 = vmatpush2.bf16.msra.mxu0 %v1240_v49  ;;  %v386_v49 = vld [vmem:[#allocation8 + $0x10] sm:$0xff] }
  0xf7   :  { %1542 = vmatpush2.bf16.msra.mxu1 %v1202_v47  ;;  %1578 = vmatprep.subr.bf16.mxu0 %v1239_v53  ;;  %v501_v47 = vpack.c.bf16 %v2846_v39, %v2846_v39  ;;  %v746_v53 = vld [vmem:[#allocation10 + $0x730] sm:$0xff]  ;;  %v2858_v54 = vrot.slane %v386_v49, %v2829_v8  ;;  %v795_v39 = vld [vmem:[#allocation10 + $0x8b8] sm:$0xff]  ;;  %v428_v0 = vcombine.high %v386_v49, %v386_v49 }
  0xf8   :  { %1543 = vmatprep.subr.bf16.mxu1 %v1201_v52  ;;  %v744_v52 = vld [vmem:[#allocation10 + $0x720] sm:$0xff]  ;;  %v1285_v49 = vpack.c.bf16 %v859_v42, %v857_v23  ;;  %v827_v23 = vld [vmem:[#allocation10 + $0x9b8] sm:$0xff]  ;;  %v837_v42 = vld [vmem:[#allocation10 + $0xa08] sm:$0xff] }
  0xf9   :  { %v443_v63 = vcombine.high %v2858_v54, %v2858_v54 }
  0xfa   :  { %1579 = vmatpush2.bf16.msra.mxu0 %v1238_v62  ;;  %v793_v62 = vld [vmem:[#allocation10 + $0x8a8] sm:$0xff] }
  0xfb   :  { %1544 = vmatpush2.bf16.msra.mxu1 %v1200_v61  ;;  %1580 = vmatprep.subr.bf16.mxu0 %v1237_v2  ;;  %v743_v61 = vld [vmem:[#allocation10 + $0x718] sm:$0xff]  ;;  %v1254_v2 = vpack.c.bf16 %v798_v58, %v796_v57  ;;  %v506_v5 = vpack.c.bf16 %v443_v63, %v443_v63  ;;  %v1253_v7 = vpack.c.bf16 %v795_v39, %v793_v62  ;;  %v852_v63 = vld [vmem:[#allocation10 + $0xa80] sm:$0xff] }
  0xfc   :  { %1545 = vmatprep.subr.bf16.mxu1 %v1199_v1  ;;  %v1228_v1 = vpack.c.bf16 %v746_v53, %v744_v52  ;;  %v1227_v6 = vpack.c.bf16 %v743_v61, %v741_v60  ;;  %v777_v52 = vld [vmem:[#allocation10 + $0x828] sm:$0xff]  ;;  %v779_v53 = vld [vmem:[#allocation10 + $0x838] sm:$0xff]  ;;  %v1246_v57 = vpack.c.bf16 %v782_v46, %v780_v45  ;;  %v776_v60 = vld [vmem:[#allocation10 + $0x820] sm:$0xff] }
  0xfd   :  { %v778_v61 = vld [vmem:[#allocation10 + $0x830] sm:$0xff]  ;;  %v1245_v62 = vpack.c.bf16 %v779_v53, %v777_v52  ;;  %v824_v45 = vld [vmem:[#allocation10 + $0x9a0] sm:$0xff]  ;;  %v821_v52 = vld [vmem:[#allocation10 + $0x988] sm:$0xff] }
  0xfe   :  { %1581 = vmatpush2.bf16.msra.mxu0 %v1236_v11  ;;  %v789_v11 = vld [vmem:[#allocation10 + $0x888] sm:$0xff]  ;;  %v826_v46 = vld [vmem:[#allocation10 + $0x9b0] sm:$0xff]  ;;  %v823_v53 = vld [vmem:[#allocation10 + $0x998] sm:$0xff] }
  0xff   :  { %1546 = vmatpush2.bf16.msra.mxu1 %v1198_v10  ;;  %1582 = vmatprep.subr.bf16.mxu0 %v1235_v15  ;;  %v794_v10 = vld [vmem:[#allocation10 + $0x8b0] sm:$0xff]  ;;  %v2863_v15 = vrot.slane %v428_v0, %v2829_v8  ;;  %v1251_v19 = vpack.c.bf16 %v791_v12, %v789_v11  ;;  %v1281_v11 = vpack.c.bf16 %v851_v4, %v849_v3  ;;  %v848_v12 = vld [vmem:[#allocation10 + $0xa60] sm:$0xff]  ;;  %v893_v3 = vld [vmem:[#allocation10 + $0xbc8] sm:$0xff] }
 0x100   :  { %1547 = vmatprep.subr.bf16.mxu1 %v1197_v14  ;;  %v867_v14 = vld [vmem:[#allocation10 + $0xaf8] sm:$0xff]  ;;  %v1252_v16 = vpack.c.bf16 %v794_v10, %v792_v9  ;;  %v854_v0 = vld [vmem:[#allocation10 + $0xa90] sm:$0xff] }
 0x101   :  { %v1289_v20 = vpack.c.bf16 %v867_v14, %v865_v13  ;;  %v444_v28 = vcombine.high %v2863_v15, %v2863_v15  ;;  %v774_v9 = vld [vmem:[#allocation10 + $0x810] sm:$0xff]  ;;  %v833_v14 = vld [vmem:[#allocation10 + $0x9e8] sm:$0xff]  ;;  %v895_v4 = vld [vmem:[#allocation10 + $0xbd8] sm:$0xff] }
 0x102   :  { %1583 = vmatpush2.bf16.msra.mxu0 %v1234_v22  ;;  %v866_v22 = vld [vmem:[#allocation10 + $0xaf0] sm:$0xff] }
 0x103   :  { %1548 = vmatpush2.bf16.msra.mxu1 %v1196_v21  ;;  %1584 = vmatprep.subr.bf16.mxu0 %v1233_v27  ;;  %v864_v21 = vld [vmem:[#allocation10 + $0xae0] sm:$0xff]  ;;  %v863_v27 = vld [vmem:[#allocation10 + $0xad8] sm:$0xff]  ;;  %v508_v43 = vpack.c.bf16 %v444_v28, %v444_v28  ;;  %v850_v13 = vld [vmem:[#allocation10 + $0xa70] sm:$0xff] }
 0x104   :  { %1549 = vmatprep.subr.bf16.mxu1 %v1195_v26  ;;  %v861_v26 = vld [vmem:[#allocation10 + $0xac8] sm:$0xff]  ;;  %v1288_v31 = vpack.c.bf16 %v866_v22, %v864_v21  ;;  %v834_v21 = vld [vmem:[#allocation10 + $0x9f0] sm:$0xff]  ;;  %v831_v28 = vld [vmem:[#allocation10 + $0x9d8] sm:$0xff] }
 0x106   :  { %1585 = vmatpush2.bf16.msra.mxu0 %v1232_v36  ;;  %v1287_v36 = vpack.c.bf16 %v863_v27, %v861_v26  ;;  %v846_v26 = vld [vmem:[#allocation10 + $0xa50] sm:$0xff]  ;;  %v829_v27 = vld [vmem:[#allocation10 + $0x9c8] sm:$0xff] }
 0x107   :  { %1550 = vmatpush2.bf16.msra.mxu1 %v1194_v35  ;;  %1586 = vmatprep.subr.bf16.mxu0 %v1231_v40  ;;  %v1249_v35 = vpack.c.bf16 %v787_v25, %v785_v24  ;;  %v781_v40 = vld [vmem:[#allocation10 + $0x848] sm:$0xff]  ;;  %v844_v25 = vld [vmem:[#allocation10 + $0xa40] sm:$0xff] }
 0x108   :  { %1601 = vmatprep.subr.bf16.mxu1 %v1257_v41  ;;  %v783_v41 = vld [vmem:[#allocation10 + $0x858] sm:$0xff]  ;;  %v1278_v32 = vpack.c.bf16 %v846_v26, %v844_v25  ;;  %v888_v25 = vld [vmem:[#allocation10 + $0xba0] sm:$0xff]  ;;  %v890_v26 = vld [vmem:[#allocation10 + $0xbb0] sm:$0xff] }
 0x10a   :  { %1552 = vmatmul.mubr.bf16.vlgmr.msra.gmra.mxu1 %v501_v47  ;;  %1587 = vmatpush2.bf16.msra.mxu0 %v1230_v50  ;;  %v1247_v47 = vpack.c.bf16 %v783_v41, %v781_v40  ;;  %v856_v50 = vld [vmem:[#allocation10 + $0xaa0] sm:$0xff]  ;;  %v842_v40 = vld [vmem:[#allocation10 + $0xa30] sm:$0xff]  ;;  %v825_v41 = vld [vmem:[#allocation10 + $0x9a8] sm:$0xff] }
 0x10b   :  { %1602 = vmatpush1.bf16.msra.mxu1 %v1256_v51  ;;  %1588 = vmatprep.subr.bf16.mxu0 %v1229_v55  ;;  %v858_v51 = vld [vmem:[#allocation10 + $0xab0] sm:$0xff]  ;;  %v853_v55 = vld [vmem:[#allocation10 + $0xa88] sm:$0xff] }
 0x10c   :  { %1603 = vmatprep.subr.bf16.mxu1 %v1255_v56  ;;  %1633 = vmatprep.mubr.bf16.mxu1 %v506_v5  ;;  %v855_v56 = vld [vmem:[#allocation10 + $0xa98] sm:$0xff]  ;;  %v1284_v58 = vpack.c.bf16 %v858_v51, %v856_v50  ;;  %v1244_v5 = vpack.c.bf16 %v778_v61, %v776_v60  ;;  %v836_v50 = vld [vmem:[#allocation10 + $0xa00] sm:$0xff]  ;;  %v838_v51 = vld [vmem:[#allocation10 + $0xa10] sm:$0xff] }
 0x10d   :  { %v1283_v39 = vpack.c.bf16 %v855_v56, %v853_v55  ;;  %v897_v55 = vld [vmem:[#allocation10 + $0xbe8] sm:$0xff]  ;;  %v899_v56 = vld [vmem:[#allocation10 + $0xbf8] sm:$0xff]  ;;  %v820_v60 = vld [vmem:[#allocation10 + $0x980] sm:$0xff] }
 0x10e   :  { %1589 = vmatpush2.bf16.msra.mxu0 %v1228_v1  ;;  %v773_v1 = vld [vmem:[#allocation10 + $0x808] sm:$0xff]  ;;  %v822_v61 = vld [vmem:[#allocation10 + $0x990] sm:$0xff] }
 0x10f   :  { %1604 = vmatpush1.bf16.msra.mxu1 %v1254_v2  ;;  %1590 = vmatprep.subr.bf16.mxu0 %v1227_v6  ;;  %v775_v2 = vld [vmem:[#allocation10 + $0x818] sm:$0xff]  ;;  %v1282_v6 = vpack.c.bf16 %v854_v0, %v852_v63  ;;  %v896_v63 = vld [vmem:[#allocation10 + $0xbe0] sm:$0xff]  ;;  %v898_v0 = vld [vmem:[#allocation10 + $0xbf0] sm:$0xff] }
 0x110   :  { %1605 = vmatprep.subr.bf16.mxu1 %v1253_v7  ;;  %v772_v7 = vld [vmem:[#allocation10 + $0x800] sm:$0xff]  ;;  %v1243_v10 = vpack.c.bf16 %v775_v2, %v773_v1  ;;  %v817_v1 = vld [vmem:[#allocation10 + $0x968] sm:$0xff]  ;;  %v819_v2 = vld [vmem:[#allocation10 + $0x978] sm:$0xff] }
 0x111   :  { %v1242_v18 = vpack.c.bf16 %v774_v9, %v772_v7  ;;  %v816_v7 = vld [vmem:[#allocation10 + $0x960] sm:$0xff]  ;;  %v818_v9 = vld [vmem:[#allocation10 + $0x970] sm:$0xff] }
 0x112   :  { %1591 = vmatpush2.bf16.msra.mxu0 %v1226_v34  ;;  %v835_v34 = vld [vmem:[#allocation10 + $0x9f8] sm:$0xff] }
 0x113   :  { %1606 = vmatpush1.bf16.msra.mxu1 %v1252_v16  ;;  %1642 = vmatprep.subr.bf16.mxu0 %v1289_v20  ;;  %v845_v16 = vld [vmem:[#allocation10 + $0xa48] sm:$0xff]  ;;  %v832_v20 = vld [vmem:[#allocation10 + $0x9e0] sm:$0xff]  ;;  %v1273_v22 = vpack.c.bf16 %v835_v34, %v833_v14  ;;  %v815_v34 = vld [vmem:[#allocation10 + $0x958] sm:$0xff] }
 0x114   :  { %1607 = vmatprep.subr.bf16.mxu1 %v1251_v19  ;;  %v1280_v19 = vpack.c.bf16 %v850_v13, %v848_v12  ;;  %v1279_v24 = vpack.c.bf16 %v847_v17, %v845_v16  ;;  %v892_v12 = vld [vmem:[#allocation10 + $0xbc0] sm:$0xff]  ;;  %v894_v13 = vld [vmem:[#allocation10 + $0xbd0] sm:$0xff]  ;;  %v813_v14 = vld [vmem:[#allocation10 + $0x948] sm:$0xff] }
 0x115   :  { %1593 = vmatmul.mubr.bf16.vlgmr.msra.gmra.mxu0 %v503_v29  ;;  %v841_v29 = vld [vmem:[#allocation10 + $0xa28] sm:$0xff]  ;;  %v891_v17 = vld [vmem:[#allocation10 + $0xbb8] sm:$0xff] }
 0x116   :  { %1643 = vmatpush1.bf16.msra.mxu0 %v1288_v31  ;;  %1674 = vmatprep.mubr.bf16.mxu0 %v508_v43  ;;  %v1272_v31 = vpack.c.bf16 %v834_v21, %v832_v20  ;;  %v839_v43 = vld [vmem:[#allocation10 + $0xa18] sm:$0xff]  ;;  %v889_v16 = vld [vmem:[#allocation10 + $0xba8] sm:$0xff]  ;;  %v812_v20 = vld [vmem:[#allocation10 + $0x940] sm:$0xff] }
 0x117   :  { %1608 = vmatpush1.bf16.msra.mxu1 %v1250_v30  ;;  %1644 = vmatprep.subr.bf16.mxu0 %v1287_v36  ;;  %v843_v30 = vld [vmem:[#allocation10 + $0xa38] sm:$0xff]  ;;  %v1271_v36 = vpack.c.bf16 %v831_v28, %v829_v27  ;;  %v814_v21 = vld [vmem:[#allocation10 + $0x950] sm:$0xff]  ;;  %v809_v27 = vld [vmem:[#allocation10 + $0x928] sm:$0xff] }
 0x118   :  { %1609 = vmatprep.subr.bf16.mxu1 %v1249_v35  ;;  %v830_v35 = vld [vmem:[#allocation10 + $0x9d0] sm:$0xff]  ;;  %v1277_v37 = vpack.c.bf16 %v843_v30, %v841_v29  ;;  %v811_v28 = vld [vmem:[#allocation10 + $0x938] sm:$0xff]  ;;  %v885_v29 = vld [vmem:[#allocation10 + $0xb88] sm:$0xff] }
 0x119   :  { %v887_v30 = vld [vmem:[#allocation10 + $0xb98] sm:$0xff] }
 0x11a   :  { %1645 = vmatpush1.bf16.msra.mxu0 %v1286_v44  ;;  %v1276_v44 = vpack.c.bf16 %v842_v40, %v840_v38  ;;  %v884_v38 = vld [vmem:[#allocation10 + $0xb80] sm:$0xff]  ;;  %v886_v40 = vld [vmem:[#allocation10 + $0xb90] sm:$0xff] }
 0x11b   :  { %1610 = vmatpush1.bf16.msra.mxu1 %v1248_v48  ;;  %1646 = vmatprep.subr.bf16.mxu0 %v1285_v49  ;;  %v1270_v48 = vpack.c.bf16 %v830_v35, %v828_v33  ;;  %v1275_v49 = vpack.c.bf16 %v839_v43, %v837_v42  ;;  %v808_v33 = vld [vmem:[#allocation10 + $0x920] sm:$0xff]  ;;  %v810_v35 = vld [vmem:[#allocation10 + $0x930] sm:$0xff]  ;;  %v881_v42 = vld [vmem:[#allocation10 + $0xb68] sm:$0xff] }
 0x11c   :  { %1611 = vmatprep.subr.bf16.mxu1 %v1247_v47  ;;  %v1269_v47 = vpack.c.bf16 %v827_v23, %v825_v41  ;;  %v805_v41 = vld [vmem:[#allocation10 + $0x908] sm:$0xff]  ;;  %v807_v23 = vld [vmem:[#allocation10 + $0x918] sm:$0xff] }
 0x11d   :  { %v883_v43 = vld [vmem:[#allocation10 + $0xb78] sm:$0xff] }
 0x11e   :  { %1647 = vmatpush1.bf16.msra.mxu0 %v1284_v58  ;;  %v1274_v58 = vpack.c.bf16 %v838_v51, %v836_v50  ;;  %v1297_v50 = vpack.c.bf16 %v883_v43, %v881_v42  ;;  %v880_v51 = vld [vmem:[#allocation10 + $0xb60] sm:$0xff] }
 0x11f   :  { %1612 = vmatpush1.bf16.msra.mxu1 %v1246_v57  ;;  %1648 = vmatprep.subr.bf16.mxu0 %v1283_v39  ;;  %v1268_v57 = vpack.c.bf16 %v826_v46, %v824_v45  ;;  %v1305_v39 = vpack.c.bf16 %v899_v56, %v897_v55  ;;  %v1298_v45 = vpack.c.bf16 %v886_v40, %v884_v38  ;;  %v804_v46 = vld [vmem:[#allocation10 + $0x900] sm:$0xff]  ;;  %v879_v55 = vld [vmem:[#allocation10 + $0xb58] sm:$0xff]  ;;  %v929_v56 = vld [vmem:[#allocation10 + $0xce8] sm:$0xff] }
 0x120   :  { %1613 = vmatprep.subr.bf16.mxu1 %v1245_v62  ;;  %v1267_v62 = vpack.c.bf16 %v823_v53, %v821_v52  ;;  %v882_v52 = vld [vmem:[#allocation10 + $0xb70] sm:$0xff]  ;;  %v877_v53 = vld [vmem:[#allocation10 + $0xb48] sm:$0xff] }
 0x122   :  { %1649 = vmatpush1.bf16.msra.mxu0 %v1282_v6  ;;  %v1304_v6 = vpack.c.bf16 %v898_v0, %v896_v63  ;;  %v1295_v63 = vpack.c.bf16 %v879_v55, %v877_v53  ;;  %v912_v55 = vld [vmem:[#allocation10 + $0xc60] sm:$0xff] }
 0x123   :  { %1614 = vmatpush1.bf16.msra.mxu1 %v1244_v5  ;;  %1650 = vmatprep.subr.bf16.mxu0 %v1281_v11  ;;  %v1266_v5 = vpack.c.bf16 %v822_v61, %v820_v60  ;;  %v1303_v11 = vpack.c.bf16 %v895_v4, %v893_v3  ;;  %v1296_v61 = vpack.c.bf16 %v882_v52, %v880_v51  ;;  %v873_v3 = vld [vmem:[#allocation10 + $0xb28] sm:$0xff]  ;;  %v875_v4 = vld [vmem:[#allocation10 + $0xb38] sm:$0xff] }
 0x124   :  { %1615 = vmatprep.subr.bf16.mxu1 %v1243_v10  ;;  %v1265_v10 = vpack.c.bf16 %v819_v2, %v817_v1  ;;  %v928_v1 = vld [vmem:[#allocation10 + $0xce0] sm:$0xff]  ;;  %v930_v2 = vld [vmem:[#allocation10 + $0xcf0] sm:$0xff]  ;;  %v507_v51 = vpack.c.bf16 %v2863_v15, %v2863_v15 }
 0x126   :  { %1651 = vmatpush1.bf16.msra.mxu0 %v1280_v19  ;;  %v1302_v19 = vpack.c.bf16 %v894_v13, %v892_v12  ;;  %v872_v12 = vld [vmem:[#allocation10 + $0xb20] sm:$0xff]  ;;  %v874_v13 = vld [vmem:[#allocation10 + $0xb30] sm:$0xff] }
 0x127   :  { %1616 = vmatpush1.bf16.msra.mxu1 %v1242_v18  ;;  %1652 = vmatprep.subr.bf16.mxu0 %v1279_v24  ;;  %v1264_v18 = vpack.c.bf16 %v818_v9, %v816_v7  ;;  %v1301_v24 = vpack.c.bf16 %v891_v17, %v889_v16  ;;  %v505_v9 = vpack.c.bf16 %v2858_v54, %v2858_v54  ;;  %v924_v16 = vld [vmem:[#allocation10 + $0xcc0] sm:$0xff]  ;;  %v926_v17 = vld [vmem:[#allocation10 + $0xcd0] sm:$0xff] }
 0x128   :  { %1617 = vmatprep.subr.bf16.mxu1 %v1273_v22  ;;  %v1263_v22 = vpack.c.bf16 %v815_v34, %v813_v14  ;;  %v1293_v14 = vpack.c.bf16 %v875_v4, %v873_v3 }
 0x12a   :  { %1653 = vmatpush1.bf16.msra.mxu0 %v1278_v32  ;;  %v1300_v32 = vpack.c.bf16 %v890_v26, %v888_v25  ;;  %v1318_v25 = vpack.c.bf16 %v926_v17, %v924_v16  ;;  %v868_v26 = vld [vmem:[#allocation10 + $0xb00] sm:$0xff]  ;;  %v983_v16 = vld [vmem:[#allocation10 + $0xe98] sm:$0xff] }
 0x12b   :  { %1618 = vmatpush2.bf16.msra.mxu1 %v1272_v31  ;;  %1654 = vmatprep.subr.bf16.mxu0 %v1277_v37  ;;  %v1262_v31 = vpack.c.bf16 %v814_v21, %v812_v20  ;;  %v1299_v37 = vpack.c.bf16 %v887_v30, %v885_v29  ;;  %v921_v20 = vld [vmem:[#allocation10 + $0xca8] sm:$0xff]  ;;  %v923_v21 = vld [vmem:[#allocation10 + $0xcb8] sm:$0xff]  ;;  %v920_v30 = vld [vmem:[#allocation10 + $0xca0] sm:$0xff] }
 0x12c   :  { %1619 = vmatprep.subr.bf16.mxu1 %v1271_v36  ;;  %v1261_v36 = vpack.c.bf16 %v811_v28, %v809_v27  ;;  %v870_v27 = vld [vmem:[#allocation10 + $0xb10] sm:$0xff]  ;;  %v1317_v29 = vpack.c.bf16 %v923_v21, %v921_v20 }
 0x12d   :  { %v1290_v38 = vpack.c.bf16 %v870_v27, %v868_v26  ;;  %v980_v27 = vld [vmem:[#allocation10 + $0xe80] sm:$0xff] }
 0x12e   :  { %1655 = vmatpush1.bf16.msra.mxu0 %v1276_v44  ;;  %v1260_v44 = vpack.c.bf16 %v810_v35, %v808_v33  ;;  %v919_v33 = vld [vmem:[#allocation10 + $0xc98] sm:$0xff]  ;;  %v993_v35 = vld [vmem:[#allocation10 + $0xee8] sm:$0xff] }
 0x12f   :  { %1620 = vmatpush2.bf16.msra.mxu1 %v1270_v48  ;;  %1656 = vmatprep.subr.bf16.mxu0 %v1275_v49  ;;  %v2869_v48 = vld [vmem:[#allocation8 + $0x18] sm:$0xff]  ;;  %v1259_v49 = vpack.c.bf16 %v807_v23, %v805_v41  ;;  %v916_v41 = vld [vmem:[#allocation10 + $0xc80] sm:$0xff] }
 0x130   :  { %1621 = vmatprep.subr.bf16.mxu1 %v1269_v47  ;;  %v806_v47 = vld [vmem:[#allocation10 + $0x910] sm:$0xff]  ;;  %v445_v54 = vcombine.high %v2869_v48, %v2869_v48 }
 0x131   :  { %v1258_v60 = vpack.c.bf16 %v806_v47, %v804_v46  ;;  %v918_v23 = vld [vmem:[#allocation10 + $0xc90] sm:$0xff]  ;;  %v915_v46 = vld [vmem:[#allocation10 + $0xc78] sm:$0xff]  ;;  %v989_v47 = vld [vmem:[#allocation10 + $0xec8] sm:$0xff] }
 0x132   :  { %1657 = vmatpush1.bf16.msra.mxu0 %v1274_v58  ;;  %v2873_v58 = vrot.slane %v2869_v48, %v2829_v8  ;;  %v992_v48 = vld [vmem:[#allocation10 + $0xee0] sm:$0xff]  ;;  %v1314_v52 = vpack.c.bf16 %v918_v23, %v916_v41 }
 0x133   :  { %1622 = vmatpush2.bf16.msra.mxu1 %v1268_v57  ;;  %1658 = vmatprep.subr.bf16.mxu0 %v1305_v39  ;;  %v931_v57 = vld [vmem:[#allocation10 + $0xcf8] sm:$0xff]  ;;  %v878_v39 = vld [vmem:[#allocation10 + $0xb50] sm:$0xff]  ;;  %v900_v23 = vld [vmem:[#allocation10 + $0xc00] sm:$0xff] }
 0x134   :  { %1623 = vmatprep.subr.bf16.mxu1 %v1267_v62  ;;  %v876_v62 = vld [vmem:[#allocation10 + $0xb40] sm:$0xff]  ;;  %v1321_v0 = vpack.c.bf16 %v931_v57, %v929_v56  ;;  %v460_v7 = vcombine.high %v2873_v58, %v2873_v58  ;;  %v914_v56 = vld [vmem:[#allocation10 + $0xc70] sm:$0xff] }
 0x135   :  { %v1312_v15 = vpack.c.bf16 %v914_v56, %v912_v55 }
 0x136   :  { %1659 = vmatpush2.bf16.msra.mxu0 %v1304_v6  ;;  %v927_v6 = vld [vmem:[#allocation10 + $0xcd8] sm:$0xff] }
 0x137   :  { %1624 = vmatpush2.bf16.msra.mxu1 %v1266_v5  ;;  %1660 = vmatprep.subr.bf16.mxu0 %v1303_v11  ;;  %v925_v5 = vld [vmem:[#allocation10 + $0xcc8] sm:$0xff]  ;;  %v1320_v11 = vpack.c.bf16 %v930_v2, %v928_v1  ;;  %v987_v1 = vld [vmem:[#allocation10 + $0xeb8] sm:$0xff] }
 0x138   :  { %1625 = vmatprep.subr.bf16.mxu1 %v1265_v10  ;;  %v1294_v10 = vpack.c.bf16 %v878_v39, %v876_v62  ;;  %v1319_v34 = vpack.c.bf16 %v927_v6, %v925_v5  ;;  %v990_v62 = vld [vmem:[#allocation10 + $0xed0] sm:$0xff]  ;;  %v909_v39 = vld [vmem:[#allocation10 + $0xc48] sm:$0xff]  ;;  %v908_v5 = vld [vmem:[#allocation10 + $0xc40] sm:$0xff] }
 0x139   :  { %v910_v6 = vld [vmem:[#allocation10 + $0xc50] sm:$0xff] }
 0x13a   :  { %1661 = vmatpush2.bf16.msra.mxu0 %v1302_v19  ;;  %v871_v19 = vld [vmem:[#allocation10 + $0xb18] sm:$0xff]  ;;  %v1310_v21 = vpack.c.bf16 %v910_v6, %v908_v5 }
 0x13b   :  { %1626 = vmatpush2.bf16.msra.mxu1 %v1264_v18  ;;  %1662 = vmatprep.subr.bf16.mxu0 %v1301_v24  ;;  %v869_v18 = vld [vmem:[#allocation10 + $0xb08] sm:$0xff]  ;;  %v1292_v24 = vpack.c.bf16 %v874_v13, %v872_v12  ;;  %v986_v12 = vld [vmem:[#allocation10 + $0xeb0] sm:$0xff] }
 0x13c   :  { %1627 = vmatprep.subr.bf16.mxu1 %v1263_v22  ;;  %v510_v22 = vpack.c.bf16 %v460_v7, %v460_v7  ;;  %v1291_v28 = vpack.c.bf16 %v871_v19, %v869_v18  ;;  %v905_v13 = vld [vmem:[#allocation10 + $0xc28] sm:$0xff] }
 0x13e   :  { %1663 = vmatpush2.bf16.msra.mxu0 %v1300_v32  ;;  %v917_v32 = vld [vmem:[#allocation10 + $0xc88] sm:$0xff] }
 0x13f   :  { %1628 = vmatpush2.bf16.msra.mxu1 %v1262_v31  ;;  %1664 = vmatprep.subr.bf16.mxu0 %v1299_v37  ;;  %v922_v31 = vld [vmem:[#allocation10 + $0xcb0] sm:$0xff]  ;;  %v2882_v37 = vrot.slane %v445_v54, %v2829_v8  ;;  %v1315_v42 = vpack.c.bf16 %v919_v33, %v917_v32  ;;  %v904_v54 = vld [vmem:[#allocation10 + $0xc20] sm:$0xff]  ;;  %v977_v32 = vld [vmem:[#allocation10 + $0xe68] sm:$0xff] }
 0x140   :  { %1629 = vmatprep.subr.bf16.mxu1 %v1261_v36  ;;  %v995_v36 = vld [vmem:[#allocation10 + $0xef8] sm:$0xff]  ;;  %v1316_v40 = vpack.c.bf16 %v922_v31, %v920_v30 }
 0x141   :  { %v1353_v43 = vpack.c.bf16 %v995_v36, %v993_v35  ;;  %v903_v31 = vld [vmem:[#allocation10 + $0xc18] sm:$0xff] }
 0x142   :  { %1665 = vmatpush2.bf16.msra.mxu0 %v1298_v45  ;;  %v913_v45 = vld [vmem:[#allocation10 + $0xc68] sm:$0xff]  ;;  %v979_v33 = vld [vmem:[#allocation10 + $0xe78] sm:$0xff] }
 0x143   :  { %1630 = vmatpush2.bf16.msra.mxu1 %v1260_v44  ;;  %1666 = vmatprep.subr.bf16.mxu0 %v1297_v50  ;;  %v994_v44 = vld [vmem:[#allocation10 + $0xef0] sm:$0xff]  ;;  %v461_v50 = vcombine.high %v2882_v37, %v2882_v37  ;;  %v1313_v57 = vpack.c.bf16 %v915_v46, %v913_v45  ;;  %v961_v46 = vld [vmem:[#allocation10 + $0xde8] sm:$0xff] }
 0x144   :  { %1631 = vmatprep.subr.bf16.mxu1 %v1259_v49  ;;  %v991_v49 = vld [vmem:[#allocation10 + $0xed8] sm:$0xff]  ;;  %v1352_v53 = vpack.c.bf16 %v994_v44, %v992_v48  ;;  %v1345_v48 = vpack.c.bf16 %v979_v33, %v977_v32  ;;  %v976_v44 = vld [vmem:[#allocation10 + $0xe60] sm:$0xff]  ;;  %v978_v45 = vld [vmem:[#allocation10 + $0xe70] sm:$0xff] }
 0x145   :  { %v512_v2 = vpack.c.bf16 %v461_v50, %v461_v50  ;;  %v973_v50 = vld [vmem:[#allocation10 + $0xe48] sm:$0xff]  ;;  %v1344_v56 = vpack.c.bf16 %v978_v45, %v976_v44  ;;  %v964_v33 = vld [vmem:[#allocation10 + $0xe00] sm:$0xff] }
 0x146   :  { %1667 = vmatpush2.bf16.msra.mxu0 %v1296_v61  ;;  %v988_v61 = vld [vmem:[#allocation10 + $0xec0] sm:$0xff] }
 0x147   :  { %1632 = vmatpush2.bf16.msra.mxu1 %v1258_v60  ;;  %1668 = vmatprep.subr.bf16.mxu0 %v1295_v63  ;;  %v1351_v60 = vpack.c.bf16 %v991_v49, %v989_v47  ;;  %v911_v63 = vld [vmem:[#allocation10 + $0xc58] sm:$0xff]  ;;  %v1350_v4 = vpack.c.bf16 %v990_v62, %v988_v61 }
 0x148   :  { %1683 = vmatprep.subr.bf16.mxu1 %v1321_v0  ;;  %v985_v0 = vld [vmem:[#allocation10 + $0xea8] sm:$0xff]  ;;  %v963_v49 = vld [vmem:[#allocation10 + $0xdf8] sm:$0xff] }
 0x149   :  { %v1337_v61 = vpack.c.bf16 %v963_v49, %v961_v46  ;;  %v948_v46 = vld [vmem:[#allocation10 + $0xd80] sm:$0xff]  ;;  %v950_v49 = vld [vmem:[#allocation10 + $0xd90] sm:$0xff] }
 0x14a   :  { %1634 = vmatmul.mubr.bf16.vlgmr.msra.gmra.mxu1 %v505_v9  ;;  %1669 = vmatpush2.bf16.msra.mxu0 %v1294_v10  ;;  %v1311_v9 = vpack.c.bf16 %v911_v63, %v909_v39  ;;  %v1349_v10 = vpack.c.bf16 %v987_v1, %v985_v0  ;;  %v972_v39 = vld [vmem:[#allocation10 + $0xe40] sm:$0xff]  ;;  %v974_v63 = vld [vmem:[#allocation10 + $0xe50] sm:$0xff]  ;;  %v957_v0 = vld [vmem:[#allocation10 + $0xdc8] sm:$0xff] }
 0x14b   :  { %1684 = vmatpush1.bf16.msra.mxu1 %v1320_v11  ;;  %1670 = vmatprep.subr.bf16.mxu0 %v1293_v14  ;;  %v984_v11 = vld [vmem:[#allocation10 + $0xea0] sm:$0xff]  ;;  %v907_v14 = vld [vmem:[#allocation10 + $0xc38] sm:$0xff] }
 0x14c   :  { %1685 = vmatprep.subr.bf16.mxu1 %v1319_v34  ;;  %1715 = vmatprep.mubr.bf16.mxu1 %v510_v22  ;;  %v981_v34 = vld [vmem:[#allocation10 + $0xe88] sm:$0xff]  ;;  %v1348_v22 = vpack.c.bf16 %v986_v12, %v984_v11  ;;  %v1342_v11 = vpack.c.bf16 %v974_v63, %v972_v39  ;;  %v956_v12 = vld [vmem:[#allocation10 + $0xdc0] sm:$0xff]  ;;  %v1330_v39 = vpack.c.bf16 %v950_v49, %v948_v46  ;;  %v1010_v49 = vld [vmem:[#allocation10 + $0xf70] sm:$0xff] }
 0x14d   :  { %v1347_v26 = vpack.c.bf16 %v983_v16, %v981_v34  ;;  %v968_v16 = vld [vmem:[#allocation10 + $0xe20] sm:$0xff] }
 0x14e   :  { %1671 = vmatpush2.bf16.msra.mxu0 %v1292_v24  ;;  %v906_v24 = vld [vmem:[#allocation10 + $0xc30] sm:$0xff] }
 0x14f   :  { %1686 = vmatpush1.bf16.msra.mxu1 %v1318_v25  ;;  %1672 = vmatprep.subr.bf16.mxu0 %v1291_v28  ;;  %v1309_v25 = vpack.c.bf16 %v907_v14, %v905_v13  ;;  %v982_v28 = vld [vmem:[#allocation10 + $0xe90] sm:$0xff] }
 0x150   :  { %1687 = vmatprep.subr.bf16.mxu1 %v1317_v29  ;;  %v901_v29 = vld [vmem:[#allocation10 + $0xc08] sm:$0xff]  ;;  %v1346_v41 = vpack.c.bf16 %v982_v28, %v980_v27  ;;  %v958_v13 = vld [vmem:[#allocation10 + $0xdd0] sm:$0xff] }
 0x151   :  { %v1334_v27 = vpack.c.bf16 %v958_v13, %v956_v12  ;;  %v1019_v12 = vld [vmem:[#allocation10 + $0xfb8] sm:$0xff] }
 0x152   :  { %1673 = vmatpush2.bf16.msra.mxu0 %v1290_v38 }
 0x153   :  { %1688 = vmatpush1.bf16.msra.mxu1 %v1316_v40  ;;  %1724 = vmatprep.subr.bf16.mxu0 %v1353_v43  ;;  %v1308_v40 = vpack.c.bf16 %v906_v24, %v904_v54  ;;  %v1307_v43 = vpack.c.bf16 %v903_v31, %v901_v29  ;;  %v967_v54 = vld [vmem:[#allocation10 + $0xe18] sm:$0xff]  ;;  %v952_v29 = vld [vmem:[#allocation10 + $0xda0] sm:$0xff] }
 0x154   :  { %1689 = vmatprep.subr.bf16.mxu1 %v1315_v42  ;;  %v902_v42 = vld [vmem:[#allocation10 + $0xc10] sm:$0xff] }
 0x155   :  { %v2888_v3 = vpop.f32.mrf.mxu0  ;;  %1675 = vmatmul.mubr.bf16.vlgmr.msra.gmra.mxu0 %v507_v51  ;;  %v975_v51 = vld [vmem:[#allocation10 + $0xe58] sm:$0xff]  ;;  %v1306_v55 = vpack.c.bf16 %v902_v42, %v900_v23 }
 0x156   :  { %1725 = vmatpush1.bf16.msra.mxu0 %v1352_v53  ;;  %1756 = vmatprep.mubr.bf16.mxu0 %v512_v2  ;;  %v265_v18 = vrot.slane %v2888_v3, 1  ;;  %v288_v38 = vrot.slane %v2888_v3, 2  ;;  %v311_v53 = vrot.slane %v2888_v3, 3  ;;  %v1343_v62 = vpack.c.bf16 %v975_v51, %v973_v50  ;;  %v959_v2 = vld [vmem:[#allocation10 + $0xdd8] sm:$0xff] }
 0x157   :  { %1690 = vmatpush1.bf16.msra.mxu1 %v1314_v52  ;;  %v2890_v7 = vpop.f32.mrf.mxu0  ;;  %1726 = vmatprep.subr.bf16.mxu0 %v1351_v60  ;;  %v962_v60 = vld [vmem:[#allocation10 + $0xdf0] sm:$0xff]  ;;  %v334_v6 = vrot.slane %v2888_v3, 4  ;;  %v1335_v14 = vpack.c.bf16 %v959_v2, %v957_v0  ;;  %v1027_v23 = vld [vmem:[#allocation10 + $0xff8] sm:$0xff]  ;;  %v944_v0 = vld [vmem:[#allocation10 + $0xd60] sm:$0xff] }
 0x158   :  { %1691 = vmatprep.subr.bf16.mxu1 %v1313_v57  ;;  %v960_v57 = vld [vmem:[#allocation10 + $0xde0] sm:$0xff] }
 0x159   :  { %v2892_v17 = vpop.f32.mrf.mxu0 }
 0x15a   :  { %1727 = vmatpush1.bf16.msra.mxu0 %v1350_v4  ;;  %v289_v19 = vrot.slane %v2892_v17, 2  ;;  %v266_v20 = vrot.slane %v2892_v17, 1  ;;  %v312_v30 = vrot.slane %v2892_v17, 3  ;;  %v971_v4 = vld [vmem:[#allocation10 + $0xe38] sm:$0xff] }
 0x15b   :  { %1692 = vmatpush1.bf16.msra.mxu1 %v1312_v15  ;;  %1728 = vmatprep.subr.bf16.mxu0 %v1349_v10  ;;  %v2901_v36 = vpop.f32.mrf.mxu0  ;;  %v969_v15 = vld [vmem:[#allocation10 + $0xe28] sm:$0xff]  ;;  %v1336_v10 = vpack.c.bf16 %v962_v60, %v960_v57  ;;  %v1023_v57 = vld [vmem:[#allocation10 + $0xfd8] sm:$0xff] }
 0x15c   :  { %1693 = vmatprep.subr.bf16.mxu1 %v1311_v9  ;;  %297 = vrot.lane.b32.xlu1 %v289_v19, %s2701_s9  ;;  %v267_v35 = vsel %vm261_vm2, %v265_v18, %v266_v20  ;;  %v263_v47 = vrot.slane %v2901_v36, 1  ;;  %v290_v52 = vsel %vm284_vm3, %v288_v38, %v289_v19  ;;  %v286_v1 = vrot.slane %v2901_v36, 2  ;;  %v970_v18 = vld [vmem:[#allocation10 + $0xe30] sm:$0xff]  ;;  %v953_v19 = vld [vmem:[#allocation10 + $0xda8] sm:$0xff] }
 0x15d   :  { %274 = vrot.lane.b32.xlu0 %v266_v20, %s2702_s12  ;;  %v313_v5 = vsel %vm307_vm4, %v311_v53, %v312_v30  ;;  %v335_v9 = vrot.slane %v2892_v17, 4  ;;  %v1341_v34 = vpack.c.bf16 %v971_v4, %v969_v15  ;;  %v309_v20 = vrot.slane %v2901_v36, 3  ;;  %v949_v38 = vld [vmem:[#allocation10 + $0xd88] sm:$0xff]  ;;  %v1026_v53 = vld [vmem:[#allocation10 + $0xff0] sm:$0xff]  ;;  %v1020_v4 = vld [vmem:[#allocation10 + $0xfc0] sm:$0xff] }
 0x15e   :  { %1729 = vmatpush1.bf16.msra.mxu0 %v1348_v22  ;;  %v965_v22 = vld [vmem:[#allocation10 + $0xe08] sm:$0xff]  ;;  %v1340_v28 = vpack.c.bf16 %v970_v18, %v968_v16  ;;  %v940_v16 = vld [vmem:[#allocation10 + $0xd40] sm:$0xff]  ;;  %v942_v18 = vld [vmem:[#allocation10 + $0xd50] sm:$0xff] }
 0x15f   :  { %1694 = vmatpush1.bf16.msra.mxu1 %v1310_v21  ;;  %1730 = vmatprep.subr.bf16.mxu0 %v1347_v26  ;;  %v955_v21 = vld [vmem:[#allocation10 + $0xdb8] sm:$0xff]  ;;  %v336_v24 = vsel %vm330_vm5, %v334_v6, %v335_v9  ;;  %v262_v26 = vrot.slane %v2890_v7, 1  ;;  %v1339_v32 = vpack.c.bf16 %v967_v54, %v965_v22  ;;  %v941_v6 = vld [vmem:[#allocation10 + $0xd48] sm:$0xff]  ;;  %v1018_v22 = vld [vmem:[#allocation10 + $0xfb0] sm:$0xff] }
 0x160   :  { %1695 = vmatprep.subr.bf16.mxu1 %v1309_v25  ;;  %320 = vrot.lane.b32.xlu1 %v312_v30, %s2703_s30  ;;  %v285_v25 = vrot.slane %v2890_v7, 2  ;;  %v954_v30 = vld [vmem:[#allocation10 + $0xdb0] sm:$0xff]  ;;  %v1333_v31 = vpack.c.bf16 %v955_v21, %v953_v19  ;;  %v1016_v21 = vld [vmem:[#allocation10 + $0xfa0] sm:$0xff]  ;;  %v937_v54 = vld [vmem:[#allocation10 + $0xd28] sm:$0xff] }
 0x161   :  { %272 = vrot.lane.b32.xlu0 %v267_v35, %s2702_s12  ;;  %v966_v35 = vld [vmem:[#allocation10 + $0xe10] sm:$0xff]  ;;  %v1332_v44 = vpack.c.bf16 %v954_v30, %v952_v29 }
 0x162   :  { %1731 = vmatpush1.bf16.msra.mxu0 %v1346_v41  ;;  %v1025_v41 = vld [vmem:[#allocation10 + $0xfe8] sm:$0xff]  ;;  %v287_v42 = vsel %vm284_vm3, %v285_v25, %v286_v1  ;;  %v1338_v45 = vpack.c.bf16 %v966_v35, %v964_v33  ;;  %v1015_v25 = vld [vmem:[#allocation10 + $0xf98] sm:$0xff]  ;;  %v938_v29 = vld [vmem:[#allocation10 + $0xd30] sm:$0xff] }
 0x163   :  { %1696 = vmatpush1.bf16.msra.mxu1 %v1308_v40  ;;  %1732 = vmatprep.subr.bf16.mxu0 %v1345_v48  ;;  %v951_v40 = vld [vmem:[#allocation10 + $0xd98] sm:$0xff]  ;;  %v308_v48 = vrot.slane %v2890_v7, 3  ;;  %v1369_v51 = vpack.c.bf16 %v1027_v23, %v1025_v41  ;;  %v1014_v33 = vld [vmem:[#allocation10 + $0xf90] sm:$0xff]  ;;  %v933_v35 = vld [vmem:[#allocation10 + $0xd08] sm:$0xff] }
 0x164   :  { %1697 = vmatprep.subr.bf16.mxu1 %v1307_v43  ;;  %270 = vrot.lane.b32.xlu1 %v263_v47, %s2702_s12  ;;  %v264_v43 = vsel %vm261_vm2, %v262_v26, %v263_v47  ;;  %v1331_v50 = vpack.c.bf16 %v951_v40, %v949_v38  ;;  %v947_v47 = vld [vmem:[#allocation10 + $0xd78] sm:$0xff]  ;;  %v1326_v26 = vpack.c.bf16 %v942_v18, %v940_v16  ;;  %v1009_v40 = vld [vmem:[#allocation10 + $0xf68] sm:$0xff]  ;;  %v1052_v16 = vld [vmem:[#allocation10 + $0x10c0] sm:$0xff] }
 0x165   :  { %295 = vrot.lane.b32.xlu0 %v290_v52, %s2701_s9  ;;  %v1024_v52 = vld [vmem:[#allocation10 + $0xfe0] sm:$0xff]  ;;  %v310_v60 = vsel %vm307_vm4, %v308_v48, %v309_v20  ;;  %v935_v38 = vld [vmem:[#allocation10 + $0xd18] sm:$0xff]  ;;  %v934_v48 = vld [vmem:[#allocation10 + $0xd10] sm:$0xff] }
 0x166   :  { %1733 = vmatpush1.bf16.msra.mxu0 %v1344_v56  ;;  %v1021_v56 = vld [vmem:[#allocation10 + $0xfc8] sm:$0xff]  ;;  %v1368_v63 = vpack.c.bf16 %v1026_v53, %v1024_v52  ;;  %v1011_v41 = vld [vmem:[#allocation10 + $0xf78] sm:$0xff]  ;;  %v1054_v18 = vld [vmem:[#allocation10 + $0x10d0] sm:$0xff] }
 0x167   :  { %1698 = vmatpush1.bf16.msra.mxu1 %v1306_v55  ;;  %1734 = vmatprep.subr.bf16.mxu0 %v1343_v62  ;;  %v945_v55 = vld [vmem:[#allocation10 + $0xd68] sm:$0xff]  ;;  %v332_v62 = vrot.slane %v2901_v36, 4  ;;  %v1367_v15 = vpack.c.bf16 %v1023_v57, %v1021_v56  ;;  %v1361_v46 = vpack.c.bf16 %v1011_v41, %v1009_v40  ;;  %v1007_v52 = vld [vmem:[#allocation10 + $0xf58] sm:$0xff]  ;;  %v1112_v40 = vld [vmem:[#allocation10 + $0x12a0] sm:$0x3f] }
 0x168   :  { %1699 = vmatprep.subr.bf16.mxu1 %v1337_v61  ;;  %293 = vrot.lane.b32.xlu1 %v286_v1, %s2701_s9  ;;  %v331_v61 = vrot.slane %v2890_v7, 4  ;;  %v946_v1 = vld [vmem:[#allocation10 + $0xd70] sm:$0xff]  ;;  %v1329_v2 = vpack.c.bf16 %v947_v47, %v945_v55  ;;  %v1057_v53 = vld [vmem:[#allocation10 + $0x10e8] sm:$0xff]  ;;  %v1059_v55 = vld [vmem:[#allocation10 + $0x10f8] sm:$0xff] }
 0x169   :  { %318 = vrot.lane.b32.xlu0 %v313_v5, %s2703_s30  ;;  %v1022_v5 = vld [vmem:[#allocation10 + $0xfd0] sm:$0xff] }
 0x16a   :  { %1735 = vmatpush1.bf16.msra.mxu0 %v1342_v11  ;;  %v1017_v11 = vld [vmem:[#allocation10 + $0xfa8] sm:$0xff]  ;;  %v333_v13 = vsel %vm330_vm5, %v331_v61, %v332_v62  ;;  %v1006_v61 = vld [vmem:[#allocation10 + $0xf50] sm:$0xff] }
 0x16b   :  { %1700 = vmatpush2.bf16.msra.mxu1 %v1336_v10  ;;  %1736 = vmatprep.subr.bf16.mxu0 %v1341_v34  ;;  %v943_v10 = vld [vmem:[#allocation10 + $0xd58] sm:$0xff]  ;;  %v1366_v34 = vpack.c.bf16 %v1022_v5, %v1020_v4  ;;  %v1414_v41 = vld [vmem:[#allocation11] sm:$0x3] }
 0x16c   :  { %1701 = vmatprep.subr.bf16.mxu1 %v1335_v14  ;;  %316 = vrot.lane.b32.xlu1 %v309_v20, %s2703_s30  ;;  %v1328_v14 = vpack.c.bf16 %v946_v1, %v944_v0  ;;  %v1327_v19 = vpack.c.bf16 %v943_v10, %v941_v6  ;;  %v1365_v20 = vpack.c.bf16 %v1019_v12, %v1017_v11  ;;  %v1058_v0 = vld [vmem:[#allocation10 + $0x10f0] sm:$0xff]  ;;  %v1001_v1 = vld [vmem:[#allocation10 + $0xf28] sm:$0xff]  ;;  %v1055_v4 = vld [vmem:[#allocation10 + $0x10d8] sm:$0xff] }
 0x16d   :  { %341 = vrot.lane.b32.xlu0 %v336_v24, %s2704_s14  ;;  %v1013_v24 = vld [vmem:[#allocation10 + $0xf88] sm:$0xff]  ;;  %v509_v6 = vpack.c.bf16 %v2873_v58, %v2873_v58  ;;  %v1000_v12 = vld [vmem:[#allocation10 + $0xf20] sm:$0xff] }
 0x16e   :  { %1737 = vmatpush1.bf16.msra.mxu0 %v1340_v28  ;;  %v936_v28 = vld [vmem:[#allocation10 + $0xd20] sm:$0xff] }
 0x16f   :  { %1702 = vmatpush2.bf16.msra.mxu1 %v1334_v27  ;;  %1738 = vmatprep.subr.bf16.mxu0 %v1339_v32  ;;  %v1364_v27 = vpack.c.bf16 %v1018_v22, %v1016_v21  ;;  %v1012_v32 = vld [vmem:[#allocation10 + $0xf80] sm:$0xff]  ;;  %v1324_v23 = vpack.c.bf16 %v938_v29, %v936_v28  ;;  %v1049_v21 = vld [vmem:[#allocation10 + $0x10a8] sm:$0xff]  ;;  %v1051_v22 = vld [vmem:[#allocation10 + $0x10b8] sm:$0xff] }
 0x170   :  { %1703 = vmatprep.subr.bf16.mxu1 %v1333_v31  ;;  %268 = vrot.lane.b32.xlu1 %v264_v43, %s2702_s12  ;;  %v1363_v31 = vpack.c.bf16 %v1015_v25, %v1013_v24  ;;  %v932_v43 = vld [vmem:[#allocation10 + $0xd00] sm:$0xff]  ;;  %v1382_v24 = vpack.c.bf16 %v1054_v18, %v1052_v16  ;;  %v1381_v29 = vpack.c.bf16 %v1051_v22, %v1049_v21  ;;  %v1038_v18 = vld [vmem:[#allocation10 + $0x1050] sm:$0xff]  ;;  %v1033_v22 = vld [vmem:[#allocation10 + $0x1028] sm:$0xff] }
 0x171   :  { %291 = vrot.lane.b32.xlu0 %v287_v42, %s2701_s9  ;;  %v1362_v42 = vpack.c.bf16 %v1014_v33, %v1012_v32  ;;  %v1322_v56 = vpack.c.bf16 %v934_v48, %v932_v43  ;;  %v996_v25 = vld [vmem:[#allocation10 + $0xf00] sm:$0xff]  ;;  %v1045_v32 = vld [vmem:[#allocation10 + $0x1088] sm:$0xff]  ;;  %v1418_v33 = vsub.s32 0, %v2826_v59 }
 0x172   :  { %1739 = vmatpush1.bf16.msra.mxu0 %v1338_v45  ;;  %v1323_v45 = vpack.c.bf16 %v935_v38, %v933_v35  ;;  %v1047_v35 = vld [vmem:[#allocation10 + $0x1098] sm:$0xff]  ;;  %v1113_v38 = vld [vmem:[#allocation10 + $0x12a8] sm:$0x3f]  ;;  %v1036_v16 = vld [vmem:[#allocation10 + $0x1040] sm:$0xff] }
 0x173   :  { %1704 = vmatpush2.bf16.msra.mxu1 %v1332_v44  ;;  %1740 = vmatprep.subr.bf16.mxu0 %v1369_v51  ;;  %v1008_v44 = vld [vmem:[#allocation10 + $0xf60] sm:$0xff]  ;;  %v2944_v51 = vld [vmem:[#allocation8 + $0x20] sm:$0x3f] }
 0x174   :  { %1705 = vmatprep.subr.bf16.mxu1 %v1331_v50  ;;  %343 = vrot.lane.b32.xlu1 %v335_v9, %s2704_s14  ;;  %v939_v9 = vld [vmem:[#allocation10 + $0xd38] sm:$0xff]  ;;  %v1005_v50 = vld [vmem:[#allocation10 + $0xf48] sm:$0xff]  ;;  %v2948_v47 = vrot.slane %v2944_v51, %v2829_v8  ;;  %v1360_v57 = vpack.c.bf16 %v1010_v49, %v1008_v44  ;;  %v1046_v49 = vld [vmem:[#allocation10 + $0x1090] sm:$0xff] }
 0x175   :  { %314 = vrot.lane.b32.xlu0 %v310_v60, %s2703_s30  ;;  %v1325_v30 = vpack.c.bf16 %v939_v9, %v937_v54  ;;  %v1004_v60 = vld [vmem:[#allocation10 + $0xf40] sm:$0xff] }
 0x176   :  { %1741 = vmatpush2.bf16.msra.mxu0 %v1368_v63  ;;  %v1056_v63 = vld [vmem:[#allocation10 + $0x10e0] sm:$0xff]  ;;  %v477_v5 = vcombine.high %v2948_v47, %v2948_v47  ;;  %v1358_v10 = vpack.c.bf16 %v1006_v61, %v1004_v60  ;;  %v1111_v60 = vld [vmem:[#allocation10 + $0x1298] sm:$0xff] }
 0x177   :  { %1706 = vmatpush2.bf16.msra.mxu1 %v1330_v39  ;;  %1742 = vmatprep.subr.bf16.mxu0 %v1367_v15  ;;  %v1385_v39 = vpack.c.bf16 %v1059_v55, %v1057_v53  ;;  %v1053_v15 = vld [vmem:[#allocation10 + $0x10c8] sm:$0xff]  ;;  %v1384_v11 = vpack.c.bf16 %v1058_v0, %v1056_v63  ;;  %v1412_v53 = vpack.c.bf16 %v1112_v40, %v1112_v40  ;;  %v1042_v63 = vld [vmem:[#allocation10 + $0x1070] sm:$0xff] }
 0x178   :  { %1707 = vmatprep.subr.bf16.mxu1 %v1329_v2  ;;  %339 = vrot.lane.b32.xlu1 %v332_v62, %s2704_s14  ;;  %v1359_v62 = vpack.c.bf16 %v1007_v52, %v1005_v50  ;;  %v1003_v2 = vld [vmem:[#allocation10 + $0xf38] sm:$0xff]  ;;  %v514_v54 = vpack.c.bf16 %v477_v5, %v477_v5  ;;  %v1041_v50 = vld [vmem:[#allocation10 + $0x1068] sm:$0xff]  ;;  %v1413_v52 = vpack.c.bf16 %v1113_v38, %v1113_v38  ;;  %v1110_v5 = vld [vmem:[#allocation10 + $0x1290] sm:$0xff] }
 0x179   :  { %337 = vrot.lane.b32.xlu0 %v333_v13, %s2704_s14  ;;  %v1002_v13 = vld [vmem:[#allocation10 + $0xf30] sm:$0xff]  ;;  %v1419_v55 = vrot.slane %v1414_v41, %v1418_v33  ;;  %v1029_v38 = vld [vmem:[#allocation10 + $0x1008] sm:$0xff] }
 0x17a   :  { %1743 = vmatpush2.bf16.msra.mxu0 %v1366_v34  ;;  %v1383_v34 = vpack.c.bf16 %v1055_v4, %v1053_v15  ;;  %v1356_v58 = vpack.c.bf16 %v1002_v13, %v1000_v12  ;;  %v1108_v4 = vld [vmem:[#allocation10 + $0x1280] sm:$0xff]  ;;  %v1107_v12 = vld [vmem:[#allocation10 + $0x1278] sm:$0xff] }
 0x17b   :  { %1708 = vmatpush2.bf16.msra.mxu1 %v1328_v14  ;;  %1744 = vmatprep.subr.bf16.mxu0 %v1365_v20  ;;  %v1357_v14 = vpack.c.bf16 %v1003_v2, %v1001_v1  ;;  %v999_v20 = vld [vmem:[#allocation10 + $0xf18] sm:$0xff]  ;;  %v1037_v1 = vld [vmem:[#allocation10 + $0x1048] sm:$0xff]  ;;  %v1432_v2 = vsel %vm1430_vm6, %v1412_v53, 0 }
 0x17c   :  { %1709 = vmatprep.subr.bf16.mxu1 %v1327_v19  ;;  %v997_v19 = vld [vmem:[#allocation10 + $0xf08] sm:$0xff] }
 0x17d   :  { %v1355_v28 = vpack.c.bf16 %v999_v20, %v997_v19  ;;  %v1410_v19 = vpack.c.bf16 %v1110_v5, %v1108_v4  ;;  %v1089_v53 = vld [vmem:[#allocation10 + $0x11e8] sm:$0xff]  ;;  %v1092_v4 = vld [vmem:[#allocation10 + $0x1200] sm:$0xff]  ;;  %v1094_v5 = vld [vmem:[#allocation10 + $0x1210] sm:$0xff] }
 0x17e   :  { %1745 = vmatpush2.bf16.msra.mxu0 %v1364_v27 }
 0x17f   :  { %1710 = vmatpush2.bf16.msra.mxu1 %v1326_v26  ;;  %1746 = vmatprep.subr.bf16.mxu0 %v1363_v31  ;;  %v998_v26 = vld [vmem:[#allocation10 + $0xf10] sm:$0xff] }
 0x180   :  { %1711 = vmatprep.subr.bf16.mxu1 %v1325_v30  ;;  %v1048_v30 = vld [vmem:[#allocation10 + $0x10a0] sm:$0xff]  ;;  %v1050_v31 = vld [vmem:[#allocation10 + $0x10b0] sm:$0xff]  ;;  %v1354_v43 = vpack.c.bf16 %v998_v26, %v996_v25  ;;  %v1035_v25 = vld [vmem:[#allocation10 + $0x1038] sm:$0xff] }
 0x181   :  { %v1380_v48 = vpack.c.bf16 %v1050_v31, %v1048_v30  ;;  %v1101_v26 = vld [vmem:[#allocation10 + $0x1248] sm:$0xff]  ;;  %v1374_v30 = vpack.c.bf16 %v1038_v18, %v1036_v16  ;;  %v1032_v31 = vld [vmem:[#allocation10 + $0x1020] sm:$0xff]  ;;  %v1083_v18 = vld [vmem:[#allocation10 + $0x11b8] sm:$0xff] }
 0x182   :  { %1747 = vmatpush2.bf16.msra.mxu0 %v1362_v42  ;;  %v1422_v42 = vsub.s32 1, %v2826_v59  ;;  %v511_v59 = vpack.c.bf16 %v2882_v37, %v2882_v37  ;;  %v1081_v16 = vld [vmem:[#allocation10 + $0x11a8] sm:$0xff] }
 0x183   :  { %1712 = vmatpush2.bf16.msra.mxu1 %v1324_v23  ;;  %1748 = vmatprep.subr.bf16.mxu0 %v1361_v46  ;;  %v1044_v46 = vld [vmem:[#allocation10 + $0x1080] sm:$0xff] }
 0x184   :  { %1713 = vmatprep.subr.bf16.mxu1 %v1323_v45  ;;  %v1379_v45 = vpack.c.bf16 %v1047_v35, %v1045_v32  ;;  %v1423_v61 = vrot.slane %v1414_v41, %v1422_v42  ;;  %v1034_v32 = vld [vmem:[#allocation10 + $0x1030] sm:$0xff]  ;;  %v1373_v35 = vpack.c.bf16 %v1035_v25, %v1033_v22  ;;  %v1080_v22 = vld [vmem:[#allocation10 + $0x11a0] sm:$0xff] }
 0x185   :  { %v1102_v42 = vld [vmem:[#allocation10 + $0x1250] sm:$0xff] }
 0x186   :  { %1749 = vmatpush2.bf16.msra.mxu0 %v1360_v57  ;;  %v1109_v57 = vld [vmem:[#allocation10 + $0x1288] sm:$0xff] }
 0x187   :  { %1714 = vmatpush2.bf16.msra.mxu1 %v1322_v56  ;;  %1750 = vmatprep.subr.bf16.mxu0 %v1359_v62  ;;  %v1043_v56 = vld [vmem:[#allocation10 + $0x1078] sm:$0xff]  ;;  %v1378_v62 = vpack.c.bf16 %v1046_v49, %v1044_v46  ;;  %v1411_v15 = vpack.c.bf16 %v1111_v60, %v1109_v57  ;;  %v1028_v46 = vld [vmem:[#allocation10 + $0x1000] sm:$0xff]  ;;  %v1030_v49 = vld [vmem:[#allocation10 + $0x1010] sm:$0xff] }
 0x188   :  { %1765 = vmatprep.subr.bf16.mxu1 %v1385_v39  ;;  %v1040_v39 = vld [vmem:[#allocation10 + $0x1060] sm:$0xff]  ;;  %v1377_v0 = vpack.c.bf16 %v1043_v56, %v1041_v50  ;;  %v1098_v57 = vld [vmem:[#allocation10 + $0x1230] sm:$0xff]  ;;  %v1091_v60 = vld [vmem:[#allocation10 + $0x11f8] sm:$0xff] }
 0x189   :  { %v1376_v37 = vpack.c.bf16 %v1042_v63, %v1040_v39  ;;  %v1096_v56 = vld [vmem:[#allocation10 + $0x1220] sm:$0xff]  ;;  %v1370_v39 = vpack.c.bf16 %v1030_v49, %v1028_v46  ;;  %v1066_v49 = vld [vmem:[#allocation10 + $0x1130] sm:$0xff] }
 0x18a   :  { %v1471_v9 = vpop.f32.mrf.mxu1  ;;  %1716 = vmatmul.mubr.bf16.vlgmr.msra.gmra.mxu1 %v509_v6  ;;  %1751 = vmatpush2.bf16.msra.mxu0 %v1358_v10  ;;  %v1039_v10 = vld [vmem:[#allocation10 + $0x1058] sm:$0xff]  ;;  %v1088_v63 = vld [vmem:[#allocation10 + $0x11e0] sm:$0xff] }
 0x18b   :  { %1766 = vmatpush1.bf16.msra.mxu1 %v1384_v11  ;;  %1752 = vmatprep.subr.bf16.mxu0 %v1357_v14  ;;  %v1472_v6 = vadd.f32 %v1471_v9, %v1419_v55  ;;  %v1105_v11 = vld [vmem:[#allocation10 + $0x1268] sm:$0xff]  ;;  %v1375_v21 = vpack.c.bf16 %v1039_v10, %v1037_v1  ;;  %v1104_v9 = vld [vmem:[#allocation10 + $0x1260] sm:$0xff]  ;;  %v1401_v1 = vpack.c.bf16 %v1091_v60, %v1089_v53  ;;  %v1087_v10 = vld [vmem:[#allocation10 + $0x11d8] sm:$0xff] }
 0x18c   :  { %v1473_v27 = vpop.f32.mrf.mxu1  ;;  %1767 = vmatprep.subr.bf16.mxu1 %v1383_v34  ;;  %1797 = vmatprep.mubr.bf16.mxu1 %v514_v54  ;;  %v1409_v54 = vpack.c.bf16 %v1107_v12, %v1105_v11  ;;  %v1064_v46 = vld [vmem:[#allocation10 + $0x1120] sm:$0xff] }
 0x18d   :  { %v1474_v14 = vadd.f32 %v1473_v27, %v1423_v61  ;;  %v1103_v27 = vld [vmem:[#allocation10 + $0x1258] sm:$0xff]  ;;  %v1388_v53 = vpack.c.bf16 %v1066_v49, %v1064_v46  ;;  %v2706_v46 = vmov 0.0  }
 0x18e   :  { %v1475_v23 = vpop.f32.mrf.mxu1  ;;  %1753 = vmatpush2.bf16.msra.mxu0 %v1356_v58  ;;  %v1106_v58 = vld [vmem:[#allocation10 + $0x1270] sm:$0xff]  ;;  %v1407_v41 = vpack.c.bf16 %v1103_v27, %v1101_v26  ;;  %v1095_v61 = vld [vmem:[#allocation10 + $0x1218] sm:$0xff]  ;;  %v1076_v26 = vld [vmem:[#allocation10 + $0x1180] sm:$0xff] }
 0x18f   :  { %1768 = vmatpush1.bf16.msra.mxu1 %v1382_v24  ;;  %1754 = vmatprep.subr.bf16.mxu0 %v1355_v28  ;;  %v2705_v28 = vmov 0   ;;  %v1408_v33 = vpack.c.bf16 %v1106_v58, %v1104_v9  ;;  %v1100_v23 = vld [vmem:[#allocation10 + $0x1240] sm:$0xff]  ;;  %v1079_v9 = vld [vmem:[#allocation10 + $0x1198] sm:$0xff]  ;;  %v1078_v27 = vld [vmem:[#allocation10 + $0x1190] sm:$0xff] }
 0x190   :  { %v1476_v44 = vpop.f32.mrf.mxu1  ;;  %1769 = vmatprep.subr.bf16.mxu1 %v1381_v29  ;;  %v1406_v50 = vpack.c.bf16 %v1102_v42, %v1100_v23  ;;  %v1068_v23 = vld [vmem:[#allocation10 + $0x1140] sm:$0xff]  ;;  %v1070_v42 = vld [vmem:[#allocation10 + $0x1150] sm:$0xff] }
 0x191   :  { %v1099_v44 = vld [vmem:[#allocation10 + $0x1238] sm:$0xff] }
 0x192   :  { %1755 = vmatpush2.bf16.msra.mxu0 %v1354_v43  ;;  %v1031_v43 = vld [vmem:[#allocation10 + $0x1018] sm:$0xff] }
 0x193   :  { %1770 = vmatpush1.bf16.msra.mxu1 %v1380_v48  ;;  %2258 = vmatprep.subr.msk.bf16.mxu0 %vm1430_vm6, %v1413_v52  ;;  %v1097_v48 = vld [vmem:[#allocation10 + $0x1228] sm:$0xff]  ;;  %v1371_v52 = vpack.c.bf16 %v1031_v43, %v1029_v38  ;;  %v1071_v38 = vld [vmem:[#allocation10 + $0x1158] sm:$0xff] }
 0x194   :  { %1771 = vmatprep.subr.bf16.mxu1 %v1379_v45  ;;  %v1372_v45 = vpack.c.bf16 %v1034_v32, %v1032_v31  ;;  %v1405_v55 = vpack.c.bf16 %v1099_v44, %v1097_v48  ;;  %v1072_v32 = vld [vmem:[#allocation10 + $0x1160] sm:$0xff]  ;;  %v1065_v43 = vld [vmem:[#allocation10 + $0x1128] sm:$0xff]  ;;  %v1067_v48 = vld [vmem:[#allocation10 + $0x1138] sm:$0xff]  ;;  %v1390_v44 = vpack.c.bf16 %v1070_v42, %v1068_v23 }
 0x195   :  { %v1512_v13 = vpop.f32.mrf.mxu0  ;;  %1757 = vmatmul.mubr.bf16.vlgmr.msra.gmra.mxu0 %v511_v59  ;;  %v1093_v59 = vld [vmem:[#allocation10 + $0x1208] sm:$0xff]  ;;  %v1851_v23 = vld [vmem:[%s3162_s6 + $0x10] sm:$0xff]  ;;  %v1866_v42 = vld [vmem:[%s3162_s6 + $0x88] sm:$0xff] }
 0x196   :  { %v2958_v34 = vadd.f32 %v1512_v13, %v1472_v6  ;;  %1811 = vmatpush1.bf16.msra.mxu0 %v1432_v2  ;;  %1838 = vmatprep.mubr.bf16.mxu0 %v2705_v28  ;;  %v1090_v2 = vld [vmem:[#allocation10 + $0x11f0] sm:$0xff]  ;;  %v1085_v6 = vld [vmem:[#allocation10 + $0x11c8] sm:$0xff] }
 0x197   :  { %1772 = vmatpush1.bf16.msra.mxu1 %v1378_v62  ;;  %v1514_v20 = vpop.f32.mrf.mxu0  ;;  %1812 = vmatprep.subr.bf16.mxu0 %v1411_v15  ;;  %v462_v62 = vcombine.high %v2944_v51, %v2944_v51  ;;  %v1403_v15 = vpack.c.bf16 %v1095_v61, %v1093_v59  ;;  %v1400_v12 = vpack.c.bf16 %v1090_v2, %v1088_v63  ;;  %v1073_v28 = vld [vmem:[#allocation10 + $0x1168] sm:$0xff] }
 0x198   :  { %1773 = vmatprep.subr.bf16.mxu1 %v1377_v0  ;;  %v2960_v24 = vadd.f32 %v1514_v20, %v1474_v14  ;;  %v1404_v0 = vpack.c.bf16 %v1098_v57, %v1096_v56  ;;  %v1402_v51 = vpack.c.bf16 %v1094_v5, %v1092_v4  ;;  %v1399_v13 = vpack.c.bf16 %v1087_v10, %v1085_v6  ;;  %v1086_v14 = vld [vmem:[#allocation10 + $0x11d0] sm:$0xff]  ;;  %v1060_v56 = vld [vmem:[#allocation10 + $0x1100] sm:$0xff]  ;;  %v1880_v10 = vld [vmem:[%s3162_s6 + $0xf8] sm:$0xff] }
 0x199   :  { %v1516_v29 = vpop.f32.mrf.mxu0  ;;  %v476_v11 = vrot.slane %v462_v62, %v2829_v8  ;;  %v1082_v8 = vld [vmem:[#allocation10 + $0x11b0] sm:$0xff]  ;;  %v513_v59 = vpack.c.bf16 %v2948_v47, %v2948_v47 }
 0x19a   :  { %1813 = vmatpush1.bf16.msra.mxu0 %v1410_v19  ;;  %v1396_v58 = vpack.c.bf16 %v1082_v8, %v1080_v22  ;;  %v1075_v29 = vld [vmem:[#allocation10 + $0x1178] sm:$0xff]  ;;  %v1062_v57 = vld [vmem:[#allocation10 + $0x1110] sm:$0xff] }
 0x19b   :  { %1774 = vmatpush1.bf16.msra.mxu1 %v1376_v37  ;;  %v1517_v40 = vpop.f32.mrf.mxu0  ;;  %1814 = vmatprep.subr.bf16.mxu0 %v1409_v54  ;;  %v1084_v37 = vld [vmem:[#allocation10 + $0x11c0] sm:$0xff]  ;;  %v515_v19 = vpack.c.bf16 %v476_v11, %v476_v11  ;;  %v1077_v54 = vld [vmem:[#allocation10 + $0x1188] sm:$0xff]  ;;  %v1393_v31 = vpack.c.bf16 %v1075_v29, %v1073_v28  ;;  %v1386_v60 = vpack.c.bf16 %v1062_v57, %v1060_v56  ;;  %v1873_v22 = vld [vmem:[%s3162_s6 + $0xc0] sm:$0xff] }
 0x19c   :  { %1775 = vmatprep.subr.bf16.mxu1 %v1375_v21  ;;  %v1398_v20 = vpack.c.bf16 %v1086_v14, %v1084_v37  ;;  %v1397_v21 = vpack.c.bf16 %v1083_v18, %v1081_v16  ;;  %v1395_v25 = vpack.c.bf16 %v1079_v9, %v1077_v54  ;;  %v1863_v11 = vld [vmem:[%s3162_s6 + $0x70] sm:$0xff]  ;;  %v1861_v37 = vld [vmem:[%s3162_s6 + $0x60] sm:$0xff]  ;;  %v1876_v14 = vld [vmem:[%s3162_s6 + $0xd8] sm:$0xff] }
 0x19d   :  { %v1860_v16 = vld [vmem:[%s3162_s6 + $0x58] sm:$0xff]  ;;  %v1875_v18 = vld [vmem:[%s3162_s6 + $0xd0] sm:$0xff]  ;;  %v1857_v8 = vld [vmem:[%s3162_s6 + $0x40] sm:$0xff] }
 0x19e   :  { %1815 = vmatpush1.bf16.msra.mxu0 %v1408_v33  ;;  %v1074_v33 = vld [vmem:[#allocation10 + $0x1170] sm:$0xff]  ;;  %v1872_v54 = vld [vmem:[%s3162_s6 + $0xb8] sm:$0xff] }
 0x19f   :  { %1776 = vmatpush1.bf16.msra.mxu1 %v1374_v30  ;;  %1816 = vmatprep.subr.bf16.mxu0 %v1407_v41  ;;  %v1394_v30 = vpack.c.bf16 %v1078_v27, %v1076_v26  ;;  %v1392_v40 = vpack.c.bf16 %v1074_v33, %v1072_v32  ;;  %v1856_v9 = vld [vmem:[%s3162_s6 + $0x38] sm:$0xff]  ;;  %v1870_v26 = vld [vmem:[%s3162_s6 + $0xa8] sm:$0xff]  ;;  %v1869_v28 = vld [vmem:[%s3162_s6 + $0xa0] sm:$0xff] }
 0x1a0   :  { %1777 = vmatprep.subr.bf16.mxu1 %v1373_v35  ;;  %v1069_v35 = vld [vmem:[#allocation10 + $0x1148] sm:$0xff]  ;;  %v1854_v27 = vld [vmem:[%s3162_s6 + $0x28] sm:$0xff] }
 0x1a1   :  { %v1391_v41 = vpack.c.bf16 %v1071_v38, %v1069_v35  ;;  %v1868_v32 = vld [vmem:[%s3162_s6 + $0x98] sm:$0xff] }
 0x1a2   :  { %1817 = vmatpush1.bf16.msra.mxu0 %v1406_v50  ;;  %v1061_v50 = vld [vmem:[#allocation10 + $0x1108] sm:$0xff] }
 0x1a3   :  { %1778 = vmatpush1.bf16.msra.mxu1 %v1372_v45  ;;  %1818 = vmatprep.subr.bf16.mxu0 %v1405_v55  ;;  %v1389_v45 = vpack.c.bf16 %v1067_v48, %v1065_v43  ;;  %v1852_v35 = vld [vmem:[%s3162_s6 + $0x18] sm:$0xff]  ;;  %v1850_v48 = vld [vmem:[%s3162_s6 + $0x8] sm:$0xff] }
 0x1a4   :  { %1779 = vmatprep.subr.bf16.mxu1 %v1371_v52  ;;  %v1063_v52 = vld [vmem:[#allocation10 + $0x1118] sm:$0xff] }
 0x1a5   :  { %v1387_v55 = vpack.c.bf16 %v1063_v52, %v1061_v50 }
 0x1a6   :  { %1819 = vmatpush1.bf16.msra.mxu0 %v1404_v0 }
 0x1a7   :  { %1780 = vmatpush1.bf16.msra.mxu1 %v1370_v39  ;;  %1820 = vmatprep.subr.bf16.mxu0 %v1403_v15 }
 0x1a8   :  { %1781 = vmatprep.subr.bf16.mxu1 %v1401_v1 }
 0x1aa   :  { %1821 = vmatpush1.bf16.msra.mxu0 %v1402_v51  ;;  %v1862_v51 = vld [vmem:[%s3162_s6 + $0x68] sm:$0xff] }
 0x1ab   :  { %1782 = vmatpush2.bf16.msra.mxu1 %v1400_v12  ;;  %2271 = vmatprep.subr.mxu0 %v1880_v10  ;;  %v1878_v12 = vld [vmem:[%s3162_s6 + $0xe8] sm:$0xff] }
 0x1ac   :  { %1783 = vmatprep.subr.bf16.mxu1 %v1399_v13  ;;  %v1877_v13 = vld [vmem:[%s3162_s6 + $0xe0] sm:$0xff] }
 0x1ad   :  { %2259 = vmatmul.mubr.msk.bf16.vlgmr.msra.gmra.mxu0 %vm1426_vm7, %v515_v19  ;;  %v1859_v19 = vld [vmem:[%s3162_s6 + $0x50] sm:$0xff] }
 0x1af   :  { %1784 = vmatpush2.bf16.msra.mxu1 %v1398_v20  ;;  %v1874_v20 = vld [vmem:[%s3162_s6 + $0xc8] sm:$0xff] }
 0x1b0   :  { %1785 = vmatprep.subr.bf16.mxu1 %v1397_v21  ;;  %v1858_v21 = vld [vmem:[%s3162_s6 + $0x48] sm:$0xff] }
 0x1b3   :  { %1786 = vmatpush2.bf16.msra.mxu1 %v1396_v58  ;;  %v1871_v58 = vld [vmem:[%s3162_s6 + $0xb0] sm:$0xff] }
 0x1b4   :  { %1787 = vmatprep.subr.bf16.mxu1 %v1395_v25  ;;  %v1855_v25 = vld [vmem:[%s3162_s6 + $0x30] sm:$0xff] }
 0x1b7   :  { %1788 = vmatpush2.bf16.msra.mxu1 %v1394_v30  ;;  %v1853_v30 = vld [vmem:[%s3162_s6 + $0x20] sm:$0xff] }
 0x1b8   :  { %1789 = vmatprep.subr.bf16.mxu1 %v1393_v31 }
 0x1bb   :  { %1790 = vmatpush2.bf16.msra.mxu1 %v1392_v40  ;;  %v1867_v40 = vld [vmem:[%s3162_s6 + $0x90] sm:$0xff] }
 0x1bc   :  { %1791 = vmatprep.subr.bf16.mxu1 %v1391_v41 }
 0x1bf   :  { %1792 = vmatpush2.bf16.msra.mxu1 %v1390_v44  ;;  %v1865_v44 = vld [vmem:[%s3162_s6 + $0x80] sm:$0xff] }
 0x1c0   :  { %1793 = vmatprep.subr.bf16.mxu1 %v1389_v45  ;;  %v1849_v45 = vld [vmem:[%s3162_s6] sm:$0xff] }
 0x1c3   :  { %1794 = vmatpush2.bf16.msra.mxu1 %v1388_v53 }
 0x1c4   :  { %1795 = vmatprep.subr.bf16.mxu1 %v1387_v55 }
 0x1c7   :  { %1796 = vmatpush2.bf16.msra.mxu1 %v1386_v60 }
 0x1c8   :  { %2362 = vmatprep.subr.mxu1 %v2706_v46 }
 0x1ca   :  { %v1553_v61 = vpop.f32.mrf.mxu1  ;;  %1798 = vmatmul.mubr.bf16.vlgmr.msra.gmra.mxu1 %v513_v59 }
 0x1cb   :  { %v1554_v62 = vadd.f32 %v1553_v61, %v2958_v34  ;;  %v1864_v34 = vld [vmem:[%s3162_s6 + $0x78] sm:$0xff]  ;;  %2394 = vmatprep.mubr.msk.f32.mxu1 %vm2707_vm8, %v2706_v46 }
 0x1cc   :  { %v1555_v39 = vpop.f32.mrf.mxu1  ;;  %2272 = vmatpush3.msra.mxu0 %v1864_v34 }
 0x1cd   :  { %v1556_v63 = vadd.f32 %v1555_v39, %v2960_v24  ;;  %v1879_v24 = vld [vmem:[%s3162_s6 + $0xf0] sm:$0xff] }
 0x1ce   :  { %v1557_v0 = vpop.f32.mrf.mxu1  ;;  %2273 = vmatprep.subr.mxu0 %v1879_v24 }
 0x1cf   :  { %2274 = vmatpush3.msra.mxu0 %v1863_v11 }
 0x1d0   :  { %v1558_v1 = vpop.f32.mrf.mxu1  ;;  %2275 = vmatprep.subr.mxu0 %v1878_v12 }
 0x1d1   :  { %2276 = vmatpush3.msra.mxu0 %v1862_v51 }
 0x1d2   :  { %2277 = vmatprep.subr.mxu0 %v1877_v13 }
 0x1d3   :  { %2278 = vmatpush3.msra.mxu0 %v1861_v37 }
 0x1d4   :  { %2279 = vmatprep.subr.mxu0 %v1876_v14 }
 0x1d5   :  { %v1594_v2 = vpop.f32.mrf.mxu0  ;;  %2280 = vmatpush3.msra.mxu0 %v1860_v16 }
 0x1d6   :  { %v1595_v15 = vadd.f32 %v1594_v2, %v1554_v62  ;;  %2281 = vmatprep.subr.mxu0 %v1875_v18 }
 0x1d7   :  { %v1596_v4 = vpop.f32.mrf.mxu0  ;;  %2282 = vmatpush3.msra.mxu0 %v1859_v19  ;;  %v1964_v19 = vld [vmem:[#allocation16 + $0x18] sm:$0xff] }
 0x1d8   :  { %v1597_v5 = vadd.f32 %v1596_v4, %v1556_v63  ;;  %2283 = vmatprep.subr.mxu0 %v1874_v20  ;;  %v1963_v20 = vld [vmem:[#allocation16 + $0x10] sm:$0xff] }
 0x1d9   :  { %v1598_v6 = vpop.f32.mrf.mxu0  ;;  %2284 = vmatpush3.msra.mxu0 %v1858_v21  ;;  %v1962_v21 = vld [vmem:[#allocation16 + $0x8] sm:$0xff] }
 0x1da   :  { %2285 = vmatprep.subr.mxu0 %v1873_v22  ;;  %v1961_v22 = vld [vmem:[#allocation16] sm:$0xff] }
 0x1db   :  { %v1599_v47 = vpop.f32.mrf.mxu0  ;;  %2286 = vmatpush3.msra.mxu0 %v1857_v8  ;;  %v2143_v8 = vld [vmem:[%s3167_s11 + $0x78] sm:$0xff] }
 0x1dc   :  { %2287 = vmatprep.subr.mxu0 %v1872_v54  ;;  %v2142_v54 = vld [vmem:[%s3167_s11 + $0x70] sm:$0xff]  ;;  %2363 = vmatpush3.msra.mxu1 %v2143_v8 }
 0x1dd   :  { %2288 = vmatpush3.msra.mxu0 %v1856_v9  ;;  %2364 = vmatprep.subr.mxu1 %v2706_v46  ;;  %v2141_v9 = vld [vmem:[%s3167_s11 + $0x68] sm:$0xff] }
 0x1de   :  { %2289 = vmatprep.subr.mxu0 %v1871_v58  ;;  %2365 = vmatpush3.msra.mxu1 %v2142_v54  ;;  %v2140_v58 = vld [vmem:[%s3167_s11 + $0x60] sm:$0xff] }
 0x1df   :  { %2290 = vmatpush3.msra.mxu0 %v1855_v25  ;;  %2366 = vmatprep.subr.mxu1 %v2706_v46  ;;  %v2139_v25 = vld [vmem:[%s3167_s11 + $0x58] sm:$0xff] }
 0x1e0   :  { %2291 = vmatprep.subr.mxu0 %v1870_v26  ;;  %2367 = vmatpush3.msra.mxu1 %v2141_v9  ;;  %v2138_v26 = vld [vmem:[%s3167_s11 + $0x50] sm:$0xff] }
 0x1e1   :  { %2292 = vmatpush3.msra.mxu0 %v1854_v27  ;;  %2368 = vmatprep.subr.mxu1 %v2706_v46  ;;  %v2137_v27 = vld [vmem:[%s3167_s11 + $0x48] sm:$0xff] }
 0x1e2   :  { %2293 = vmatprep.subr.mxu0 %v1869_v28  ;;  %2369 = vmatpush3.msra.mxu1 %v2140_v58  ;;  %v2136_v28 = vld [vmem:[%s3167_s11 + $0x40] sm:$0xff] }
 0x1e3   :  { %2294 = vmatpush3.msra.mxu0 %v1853_v30  ;;  %2370 = vmatprep.subr.mxu1 %v2706_v46  ;;  %v2134_v30 = vld [vmem:[%s3167_s11 + $0x30] sm:$0xff] }
 0x1e4   :  { %2295 = vmatprep.subr.mxu0 %v1868_v32  ;;  %2371 = vmatpush3.msra.mxu1 %v2139_v25  ;;  %v275_v32 = vpop.permute.xlu0 %274 }
 0x1e5   :  { %2296 = vmatpush3.msra.mxu0 %v1852_v35  ;;  %2372 = vmatprep.subr.mxu1 %v2706_v46 }
 0x1e6   :  { %2297 = vmatprep.subr.mxu0 %v1867_v40  ;;  %2373 = vmatpush3.msra.mxu1 %v2138_v26  ;;  %v1960_v26 = vld [vmem:[#allocation14 + $0x10] sm:$0xf] }
 0x1e7   :  { %2298 = vmatpush3.msra.mxu0 %v1851_v23  ;;  %2374 = vmatprep.subr.mxu1 %v2706_v46 }
 0x1e8   :  { %2299 = vmatprep.subr.mxu0 %v1866_v42  ;;  %2375 = vmatpush3.msra.mxu1 %v2137_v27  ;;  %v273_v35 = vpop.permute.xlu0 %272 }
 0x1e9   :  { %2300 = vmatpush3.msra.mxu0 %v1850_v48  ;;  %2376 = vmatprep.subr.mxu1 %v2706_v46 }
 0x1ea   :  { %2301 = vmatprep.subr.mxu0 %v1865_v44  ;;  %2377 = vmatpush3.msra.mxu1 %v2136_v28  ;;  %v1959_v28 = vld [vmem:[#allocation14 + $0x8] sm:$0xff] }
 0x1eb   :  { %2302 = vmatpush3.msra.mxu0 %v1849_v45  ;;  %2378 = vmatprep.subr.mxu1 %v2706_v46  ;;  %v283_v45 = vadd.f32 %v2892_v17, %v275_v32 }
 0x1ec   :  { %2342 = vmatprep.subr.mxu0 %v2706_v46 }
 0x20a   :  { %v1635_v29 = vpop.f32.mrf.mxu1 }
 0x20b   :  { %v1636_v31 = vadd.f32 %v1635_v29, %v1595_v15  ;;  %v2135_v29 = vld [vmem:[%s3167_s11 + $0x38] sm:$0xff] }
 0x20c   :  { %v1637_v33 = vpop.f32.mrf.mxu1  ;;  %2379 = vmatpush3.msra.mxu1 %v2135_v29 }
 0x20d   :  { %v1638_v38 = vadd.f32 %v1637_v33, %v1597_v5  ;;  %2380 = vmatprep.subr.mxu1 %v2706_v46 }
 0x20e   :  { %v1639_v41 = vpop.f32.mrf.mxu1  ;;  %2381 = vmatpush3.msra.mxu1 %v2134_v30  ;;  %v1958_v30 = vld [vmem:[#allocation14] sm:$0xff] }
 0x20f   :  { %2382 = vmatprep.subr.mxu1 %v2706_v46 }
 0x210   :  { %v1640_v43 = vpop.f32.mrf.mxu1 }
 0x215   :  { %v1676_v49 = vpop.f32.mrf.mxu0 }
 0x216   :  { %v1677_v50 = vadd.f32 %v1676_v49, %v1636_v31  ;;  %v298_v31 = vpop.permute.xlu1 %297 }
 0x217   :  { %v1678_v52 = vpop.f32.mrf.mxu0 }
 0x218   :  { %v1679_v53 = vadd.f32 %v1678_v52, %v1638_v38  ;;  %v296_v38 = vpop.permute.xlu0 %295 }
 0x219   :  { %v1680_v55 = vpop.f32.mrf.mxu0 }
 0x21a   :  { %v321_v33 = vpop.permute.xlu1 %320  ;;  %v282_v55 = vadd.f32 %v2888_v3, %v273_v35  ;;  %v2132_v35 = vld [vmem:[%s3167_s11 + $0x20] sm:$0xff] }
 0x21b   :  { %v1681_v56 = vpop.f32.mrf.mxu0 }
 0x21c   :  { %v319_v41 = vpop.permute.xlu0 %318 }
 0x21e   :  { %v271_v40 = vpop.permute.xlu1 %270 }
 0x21f   :  { %v281_v56 = vadd.f32 %v271_v40, %v2901_v36  ;;  %v2130_v40 = vld [vmem:[%s3167_s11 + $0x10] sm:$0xff] }
 0x220   :  { %v342_v42 = vpop.permute.xlu0 %341 }
 0x222   :  { %v294_v23 = vpop.permute.xlu1 %293 }
 0x224   :  { %v292_v48 = vpop.permute.xlu0 %291 }
 0x226   :  { %v317_v43 = vpop.permute.xlu1 %316 }
 0x22a   :  { %v269_v44 = vpop.permute.xlu1 %268 }
 0x22b   :  { %v280_v49 = vadd.f32 %v269_v44, %v2890_v7  ;;  %v2264_v44 = vld [vmem:[#allocation17] ss:$0 sm:$0xff] }
 0x22e   :  { %v344_v52 = vpop.permute.xlu1 %343 }
 0x24a   :  { %v1717_v57 = vpop.f32.mrf.mxu1 }
 0x24b   :  { %v1718_v5 = vadd.f32 %v1717_v57, %v1677_v50  ;;  %v315_v50 = vpop.permute.xlu0 %314  ;;  %v303_v57 = vadd.f32 %v292_v48, %v280_v49 }
 0x24c   :  { %v1719_v60 = vpop.f32.mrf.mxu1 }
 0x24d   :  { %v1720_v6 = vadd.f32 %v1719_v60, %v1679_v53  ;;  %v306_v53 = vadd.f32 %v298_v31, %v283_v45 }
 0x24e   :  { %v1721_v59 = vpop.f32.mrf.mxu1 }
 0x24f   :  { %v329_v60 = vadd.f32 %v321_v33, %v306_v53  ;;  %v305_v59 = vadd.f32 %v296_v38, %v282_v55  ;;  %v2133_v33 = vld [vmem:[%s3167_s11 + $0x28] sm:$0xff]  ;;  %v2131_v38 = vld [vmem:[%s3167_s11 + $0x18] sm:$0xff] }
 0x250   :  { %v1722_v61 = vpop.f32.mrf.mxu1  ;;  %2383 = vmatpush3.msra.mxu1 %v2133_v33  ;;  %v2265_v53 = vld [vmem:[#allocation19] ss:$0 sm:$0xff] }
 0x251   :  { %v304_v61 = vadd.f32 %v294_v23, %v281_v56  ;;  %2384 = vmatprep.subr.mxu1 %v2706_v46  ;;  %v2128_v23 = vld [vmem:[%s3167_s11] sm:$0xff] }
 0x252   :  { %2385 = vmatpush3.msra.mxu1 %v2132_v35 }
 0x253   :  { %2386 = vmatprep.subr.mxu1 %v2706_v46 }
 0x254   :  { %2387 = vmatpush3.msra.mxu1 %v2131_v38 }
 0x255   :  { %v1758_v62 = vpop.f32.mrf.mxu0  ;;  %2388 = vmatprep.subr.mxu1 %v2706_v46 }
 0x256   :  { %v1759_v10 = vadd.f32 %v1758_v62, %v1718_v5  ;;  %v338_v62 = vpop.permute.xlu0 %337  ;;  %2389 = vmatpush3.msra.mxu1 %v2130_v40 }
 0x257   :  { %v1760_v39 = vpop.f32.mrf.mxu0  ;;  %2390 = vmatprep.subr.mxu1 %v2706_v46 }
 0x258   :  { %v1761_v34 = vadd.f32 %v1760_v39, %v1720_v6  ;;  %v340_v39 = vpop.permute.xlu1 %339 }
 0x259   :  { %v1762_v63 = vpop.f32.mrf.mxu0 }
 0x25a   :  { %v328_v63 = vadd.f32 %v319_v41, %v305_v59  ;;  %v2129_v41 = vld [vmem:[%s3167_s11 + $0x8] sm:$0xff]  ;;  %s2708_s11 = smov [#allocation20]  }
 0x25b   :  { %v1763_v0 = vpop.f32.mrf.mxu0  ;;  %2391 = vmatpush3.msra.mxu1 %v2129_v41  ;;  %s2241_s18 = sshll.u32 %s2708_s11, 4  ;;  %s2242_s18 = int_to_ptr.vmem [resolvable:$true] %s2241_s18 }
 0x25c   :  { %v327_v0 = vadd.f32 %v317_v43, %v304_v61  ;;  %v351_v17 = vadd.f32 %v342_v42, %v328_v63  ;;  %2392 = vmatprep.subr.mxu1 %v2706_v46  ;;  %s2651_s2 = scalar_lea.vmem %s2242_s18, 32  ;;  %p2656_p0 = scmp.lt.s32.totalorder %s2242_s18, %s2242_s18 }
 0x25d   :  { %2393 = vmatpush3.msra.mxu1 %v2128_v23  ;;  %p2652_p13 = scmp.ne.s32.totalorder %s2242_s18, %s2651_s2  ;;  %p2657_p1 = scmp.lt.s32.totalorder %s2651_s2, %s2651_s2 }
 0x25e   :  { %v364_v3 = vsel %vm353_vm10, %v351_v17, -inf }
 0x25f   :  { %p2658_p2 = por %p2657_p1, %p2656_p0 }
 0x261   :  { %p2659_p3 = pnand %p2658_p2, %p2652_p13 }
 0x26d   :  { %v1840_v1 = vpop.f32.mrf.mxu0 }
 0x26f   :  { %v1842_v2 = vpop.f32.mrf.mxu0 }
 0x271   :  { %v1844_v15 = vpop.f32.mrf.mxu0 }
 0x272   :  { %v350_v15 = vadd.f32 %v340_v39, %v327_v0 }
 0x273   :  { %v1845_v4 = vpop.f32.mrf.mxu0 }
 0x274   :  { %v356_v5 = vsel %vm355_vm9, %v350_v15, -inf }
 0x28a   :  { %v1799_v47 = vpop.f32.mrf.mxu1 }
 0x28b   :  { %v1800_v24 = vadd.f32 %v1799_v47, %v1759_v10 }
 0x28c   :  { %v1801_v11 = vpop.f32.mrf.mxu1 }
 0x28d   :  { %v1802_v12 = vadd.f32 %v1801_v11, %v1761_v34  ;;  %v1841_v51 = vadd.f32 %v1840_v1, %v1800_v24  ;;  %v326_v1 = vadd.f32 %v315_v50, %v303_v57 }
 0x28e   :  { %v1803_v13 = vpop.f32.mrf.mxu1 }
 0x28f   :  { %v1843_v37 = vadd.f32 %v1842_v2, %v1802_v12  ;;  %v1847_v18 = vmax.f32 %v1841_v51, 0.0  ;;  %v352_v2 = vadd.f32 %v344_v52, %v329_v60  ;;  %v349_v7 = vadd.f32 %v338_v62, %v326_v1 }
 0x290   :  { %v1804_v14 = vpop.f32.mrf.mxu1 }
 0x291   :  { %v1848_v16 = vmax.f32 %v1843_v37, 0.0  ;;  %v365_v4 = vsel %vm355_vm9, %v352_v2, -inf  ;;  %v354_v36 = vsel %vm353_vm10, %v349_v7, -inf }
 0x292   :  { %v366_v6 = vmax.f32 %v364_v3, %v365_v4  ;;  %v357_v10 = vmax.f32 %v354_v36, %v356_v5 }
 0x293   :  { %1952 = vmatprep.mubr.f32.mxu0 %v1848_v16 }
 0x294   :  { %1953 = vmatmul.mubr.f32.vlgmr.msra.gmra.mxu0 %v1847_v18  ;;  %v367_v47 = vrot.slane %v366_v6, 4  ;;  %v358_v34 = vrot.slane %v357_v10, 4 }
 0x295   :  { %2343 = vmatpush3.msra.mxu0 %v1964_v19  ;;  %2350 = vmatprep.mubr.msk.f32.mxu0 %vm2707_vm8, %v2706_v46  ;;  %v2257_v19 = vld [vmem:[#allocation7] ss:$0 sm:$0xff] }
 0x296   :  { %2344 = vmatprep.subr.mxu0 %v2706_v46  ;;  %v368_v24 = vmax.f32 %v366_v6, %v367_v47  ;;  %v359_v11 = vmax.f32 %v357_v10, %v358_v34 }
 0x297   :  { %2345 = vmatpush3.msra.mxu0 %v1963_v20 }
 0x298   :  { %2346 = vmatprep.subr.mxu0 %v2706_v46  ;;  %v369_v12 = vrot.slane %v368_v24, 2  ;;  %v360_v51 = vrot.slane %v359_v11, 2 }
 0x299   :  { %2347 = vmatpush3.msra.mxu0 %v1962_v21 }
 0x29a   :  { %2348 = vmatprep.subr.mxu0 %v2706_v46  ;;  %v370_v13 = vmax.f32 %v368_v24, %v369_v12  ;;  %v361_v37 = vmax.f32 %v359_v11, %v360_v51 }
 0x29b   :  { %2349 = vmatpush3.msra.mxu0 %v1961_v22  ;;  %v2260_v22 = vld [vmem:[#allocation13] ss:$0 sm:$0xff] }
 0x29c   :  { %2353 = vmatprep.subr.mxu0 %v2706_v46  ;;  %v371_v14 = vrot.slane %v370_v13, 1  ;;  %v362_v16 = vrot.slane %v361_v37, 1 }
 0x29e   :  { %v372_v18 = vmax.f32 %v370_v13, %v371_v14  ;;  %v363_v20 = vmax.f32 %v361_v37, %v362_v16 }
 0x2a0   :  { %v381_v54 = vadd.f32 %v2257_v19, %v372_v18  ;;  %v380_v58 = vadd.f32 %v2257_v19, %v363_v20 }
 0x2a2   :  { %v383_v27 = vmax.f32 %v381_v54, 0.0  ;;  %v382_v29 = vmax.f32 %v380_v58, 0.0 }
 0x2a4   :  { %v2041_v31 = vrot.slane %v383_v27, 7 }
 0x2a6   :  { %v2043_v32 = vsel %vm2042_vm12, %v2041_v31, %v382_v29 }
 0x354   :  { %v2303_v21 = vpop.f32.mrf.mxu0 }
 0x356   :  { %v2304_v8 = vpop.f32.mrf.mxu0 }
 0x357   :  { %v2305_v9 = vadd.f32 %v2304_v8, %v2303_v21 }
 0x359   :  { %v1955_v25 = vadd.f32 %v2305_v9, %v2260_v22 }
 0x35b   :  { %2351 = vmatmul.mubr.msk.f32.vlgmr.msra.gmra.mxu0 %vm1965_vm11, %v1955_v25 }
 0x35c   :  { %2354 = vmatpush3.msk.msra.mxu0 %vm330_vm5, %v1960_v26  ;;  %2359 = vmatprep.mubr.msk.f32.mxu0 %vm2707_vm8, %v2706_v46 }
 0x35d   :  { %2355 = vmatprep.subr.mxu0 %v2706_v46 }
 0x35e   :  { %2356 = vmatpush3.msra.mxu0 %v1959_v28 }
 0x35f   :  { %2357 = vmatprep.subr.mxu0 %v2706_v46 }
 0x360   :  { %2358 = vmatpush3.msra.mxu0 %v1958_v30 }
 0x361   :  { %2360 = vmatmul.mubr.msk.f32.vlgmr.msra.gmra.mxu0 %vm353_vm10, %v2043_v32 }
 0x41b   :  { %v2035_v42 = vpop.f32.mrf.mxu0 }
 0x41d   :  { %v2352_v43 = vpop.f32.mrf.mxu0 }
 0x421   :  { %v2115_v48 = vpop.f32.mrf.mxu0 }
 0x422   :  { %v2116_v45 = vadd.f32 %v2115_v48, %v2035_v42 }
 0x423   :  { %v2361_v49 = vpop.f32.mrf.mxu0 }
 0x424   :  { %v2126_v50 = vadd.f32 %v2264_v44, %v2116_v45 }
 0x426   :  { %v2127_v52 = vmax.f32 %v2126_v50, 0.0 }
 0x428   :  { %2395 = vmatmul.mubr.f32.vlgmr.msra.gmra.mxu1 %v2127_v52 }
 0x4e8   :  { %v2217_v55 = vpop.f32.mrf.mxu1 }
 0x4e9   :  { %v2218_v56 = vadd.f32 %v2265_v53, %v2217_v55 }
 0x4ea   :  { %v2396_v57 = vpop.f32.mrf.mxu1 }
 0x4eb   :  { %v2222_v46 = vsel %vm2221_vm13, %v2218_v56, -inf }
 0x4ec   :  { %2223 = vmax.xlane.f32.xlu0 %v2222_v46 }
 0x575   :  { %v2224_v60 = vpop.xlane.xlu0 %2223 }
 0x576   :  { %v2225_v59 = vsub.f32 %v2218_v56, %v2224_v60 }
 0x578   :  { %v2226_v61 = vmul.f32 1.442695, %v2225_v59 }
 0x57a   :  { %2427 = vpow2.f32 %v2226_v61 }
 0x587   :  { %v2428_v62 = vpop.eup %2427 }
 0x588   :  { %v2228_v39 = vsel %vm2221_vm13, %v2428_v62, 0.0 }
 0x589   :  { %2229 = vadd.xlane.f32.xlu1 %v2228_v39 }
 0x612   :  { %v2230_v63 = vpop.xlane.xlu1 %2229 }
 0x613   :  { %2429 = vlog2.f32 %v2230_v63 }
 0x620   :  { %v2430_v0 = vpop.eup %2429 }
 0x621   :  { %v2232_v1 = vmul.f32 0.6931472, %v2430_v0 }
 0x623   :  { %v2233_v2 = vsub.f32 %v2225_v59, %v2232_v1 }
 0x625   :  { %2234 = vst.msk [vmem:[#allocation20] sm:$0x3] %vm2221_vm13, %v2233_v2 }
 0x626   :  { %2662 = shalt.err (!%p2659_p3)
}
 0x627   :  { %2244 = dma.vmem_to_hbm [thread:$0]  %s2242_s18, 32, %s3169_s13, [#allocation4]  }
 0x628   :  { %2683 = dma.done.wait [#allocation4], 32  }
 0x629   :  { %2684 = vsyncadd [#allocation4], 4294967264 }
 0x62a   :  { %2248 = vsyncpa [#allocation3], 1 }
 0x62b   :  { %2249 = vsyncpa [#allocation6], 1 }
 0x62c   :  { %2250 = vsyncpa [#allocation9], 1 }
 0x62d   :  { %2251 = vsyncpa [#allocation12], 1 }
 0x62e   :  { %2252 = vsyncpa [#allocation15], 1 }
 0x62f   :  { %2253 = vsyncpa [#allocation18], 1 }
 0x630   :  { %2254 = vsyncpa [#allocation4], 1 }

// kernel: tpu_custom_call.1
= control target key start
LH: loop header
LB: loop body
LE: loop exit
PB: predicated region body
PF: predicated region fallthrough
CT: control target
= control target key end

     0   :  { %18 = vsyncpa [#allocation3], 0  ;;  %s3156_s0 = inlined_call_operand.hbm [shape: f32[2,16,34], index: 0, kind: input, shape index: {}]   ;;  %s3157_s1 = inlined_call_operand.hbm [shape: f32[34,100], index: 1, kind: input, shape index: {}]   ;;  %s3158_s2 = inlined_call_operand.hbm [shape: f32[1,20], index: 2, kind: input, shape index: {}]   ;;  %s3159_s3 = inlined_call_operand.hbm [shape: f32[2,2390], index: 3, kind: input, shape index: {}]   ;;  %s3160_s4 = inlined_call_operand.hbm [shape: f32[2390,256], index: 4, kind: input, shape index: {}]   ;;  %s3161_s5 = inlined_call_operand.hbm [shape: f32[1,256], index: 5, kind: input, shape index: {}]   ;;  %s3162_s6 = inlined_call_operand.vmem [shape: f32[256,32], index: 6, kind: input, shape index: {}]   ;;  %s3163_s7 = inlined_call_operand.hbm [shape: f32[1,32], index: 7, kind: input, shape index: {}]   ;;  %s3164_s8 = inlined_call_operand.hbm [shape: f32[20,128], index: 8, kind: input, shape index: {}]   ;;  %s3165_s9 = inlined_call_operand.hbm [shape: f32[32,128], index: 9, kind: input, shape index: {}]   ;;  %s3166_s10 = inlined_call_operand.hbm [shape: f32[1,128], index: 10, kind: input, shape index: {}]   ;;  %s3167_s11 = inlined_call_operand.vmem [shape: f32[128,2], index: 11, kind: input, shape index: {}]   ;;  %s3168_s12 = inlined_call_operand.hbm [shape: f32[1,2], index: 12, kind: input, shape index: {}]   ;;  %s3169_s13 = inlined_call_operand.hbm [shape: f32[2,2], index: 13, kind: output, shape index: {}]  }
   0x1   :  { %19 = vsyncpa [#allocation6], 0 }
   0x2   :  { %20 = vsyncpa [#allocation9], 0 }
   0x3   :  { %21 = vsyncpa [#allocation12], 0 }
   0x4   :  { %22 = vsyncpa [#allocation15], 0 }
   0x5   :  { %23 = vsyncpa [#allocation18], 0 }
   0x6   :  { %24 = vsyncpa [#allocation4], 0  ;;  %s2685_s25 = smov [#allocation5]   ;;  %s2686_s27 = smov [#allocation8]  }
   0x7   :  { %s42_s26 = sshll.u32 %s2685_s25, 4  ;;  %s65_s28 = sshll.u32 %s2686_s27, 4  ;;  %s43_s26 = int_to_ptr.vmem [resolvable:$true] %s42_s26  ;;  %s66_s28 = int_to_ptr.vmem [resolvable:$true] %s65_s28 }
   0x8   :  { %s2439_s29 = scalar_lea.vmem %s43_s26, 640  ;;  %p2444_p1 = scmp.lt.s32.totalorder %s43_s26, %s43_s26 }
   0x9   :  { %p2440_p0 = scmp.ne.s32.totalorder %s43_s26, %s2439_s29  ;;  %p2445_p2 = scmp.lt.s32.totalorder %s2439_s29, %s2439_s29 }
   0xb   :  { %p2446_p3 = por %p2445_p2, %p2444_p1 }
   0xd   :  { %p2447_p4 = pnand %p2446_p3, %p2440_p0 }
   0xf   :  { %2450 = shalt.err (!%p2447_p4)
}
  0x10   :  { %s2687_s30 = smov 128   ;;  %s2688_s14 = smov 8  }
  0x11   :  { %48 = dma.hbm_to_vmem [thread:$0]  %s3157_s1, 640, %s43_s26, [#allocation6], %s2687_s30, %s2687_s30, %s2688_s14  }
  0x12   :  { %s2459_s17 = scalar_lea.vmem %s66_s28, 608  ;;  %p2464_p6 = scmp.lt.s32.totalorder %s66_s28, %s66_s28 }
  0x13   :  { %p2460_p5 = scmp.ne.s32.totalorder %s66_s28, %s2459_s17  ;;  %p2465_p7 = scmp.lt.s32.totalorder %s2459_s17, %s2459_s17 }
  0x15   :  { %p2466_p8 = por %p2465_p7, %p2464_p6 }
  0x17   :  { %p2467_p9 = pnand %p2466_p8, %p2460_p5 }
  0x19   :  { %2470 = shalt.err (!%p2467_p9)
}
  0x1a   :  { %68 = dma.hbm_to_vmem [thread:$0]  %s3159_s3, 608, %s66_s28, [#allocation9]  }
  0x1b   :  { %s2689_s20 = smov [#allocation11]   ;;  %s2690_s22 = smov [#allocation14]  }
  0x1c   :  { %s87_s21 = sshll.u32 %s2689_s20, 4  ;;  %s108_s23 = sshll.u32 %s2690_s22, 4  ;;  %s88_s21 = int_to_ptr.vmem [resolvable:$true] %s87_s21  ;;  %s109_s23 = int_to_ptr.vmem [resolvable:$true] %s108_s23 }
  0x1d   :  { %s2479_s24 = scalar_lea.vmem %s88_s21, 32  ;;  %p2484_p11 = scmp.lt.s32.totalorder %s88_s21, %s88_s21 }
  0x1e   :  { %p2480_p10 = scmp.ne.s32.totalorder %s88_s21, %s2479_s24  ;;  %p2485_p12 = scmp.lt.s32.totalorder %s2479_s24, %s2479_s24 }
  0x20   :  { %p2486_p13 = por %p2485_p12, %p2484_p11 }
  0x22   :  { %p2487_p0 = pnand %p2486_p13, %p2480_p10 }
  0x24   :  { %2490 = shalt.err (!%p2487_p0)
}
  0x25   :  { %90 = dma.hbm_to_vmem [thread:$0]  %s3161_s5, 32, %s88_s21, [#allocation12]  }
  0x26   :  { %s2499_s26 = scalar_lea.vmem %s109_s23, 384  ;;  %p2504_p2 = scmp.lt.s32.totalorder %s109_s23, %s109_s23 }
  0x27   :  { %p2500_p1 = scmp.ne.s32.totalorder %s109_s23, %s2499_s26  ;;  %p2505_p3 = scmp.lt.s32.totalorder %s2499_s26, %s2499_s26 }
  0x29   :  { %p2506_p4 = por %p2505_p3, %p2504_p2 }
  0x2b   :  { %p2507_p5 = pnand %p2506_p4, %p2500_p1 }
  0x2d   :  { %2510 = shalt.err (!%p2507_p5)
}
  0x2e   :  { %114 = dma.hbm_to_vmem [thread:$0]  %s3164_s8, 384, %s109_s23, [#allocation15], %s2687_s30, %s2687_s30, %s2688_s14  }
  0x2f   :  { %s2691_s28 = smov [#allocation17]   ;;  %s2692_s15 = smov [#allocation2]  }
  0x30   :  { %s133_s29 = sshll.u32 %s2691_s28, 4  ;;  %s30_s16 = sshll.u32 %s2692_s15, 4  ;;  %s134_s29 = int_to_ptr.vmem [resolvable:$true] %s133_s29  ;;  %s31_s16 = int_to_ptr.vmem [resolvable:$true] %s30_s16 }
  0x31   :  { %s2519_s5 = scalar_lea.vmem %s134_s29, 16  ;;  %s2523_s17 = scalar_lea.vmem %s134_s29, 32 }
  0x32   :  { %p2520_p6 = scmp.ne.s32.totalorder %s134_s29, %s2519_s5  ;;  %p2524_p7 = scmp.lt.s32.totalorder %s134_s29, %s134_s29 }
  0x33   :  { %p2525_p8 = scmp.lt.s32.totalorder %s2523_s17, %s2519_s5 }
  0x35   :  { %p2526_p9 = por %p2525_p8, %p2524_p7 }
  0x37   :  { %p2527_p10 = pnand %p2526_p9, %p2520_p6 }
  0x39   :  { %2530 = shalt.err (!%p2527_p10)
}
  0x3a   :  { %136 = dma.hbm_to_vmem [thread:$0]  %s3166_s10, 16, %s134_s29, [#allocation18]  }
  0x3b   :  { %s2539_s20 = scalar_lea.vmem %s31_s16, 512  ;;  %p2544_p12 = scmp.lt.s32.totalorder %s31_s16, %s31_s16 }
  0x3c   :  { %p2540_p11 = scmp.ne.s32.totalorder %s31_s16, %s2539_s20  ;;  %p2545_p13 = scmp.lt.s32.totalorder %s2539_s20, %s2539_s20 }
  0x3e   :  { %p2546_p0 = por %p2545_p13, %p2544_p12 }
  0x40   :  { %p2547_p1 = pnand %p2546_p0, %p2540_p11 }
  0x42   :  { %2550 = shalt.err (!%p2547_p1)
}
  0x43   :  { %36 = dma.hbm_to_vmem [thread:$0]  %s3156_s0, 512, %s31_s16, [#allocation3], %s2687_s30, %s2687_s30, %s2688_s14  }
  0x44   :  { %s2693_s22 = smov [#allocation7]   ;;  %s2694_s24 = smov [#allocation10]  }
  0x45   :  { %s55_s23 = sshll.u32 %s2693_s22, 4  ;;  %s74_s1 = sshll.u32 %s2694_s24, 4  ;;  %s56_s23 = int_to_ptr.vmem [resolvable:$true] %s55_s23  ;;  %s75_s1 = int_to_ptr.vmem [resolvable:$true] %s74_s1 }
  0x46   :  { %s2559_s10 = scalar_lea.vmem %s56_s23, 16  ;;  %s2563_s25 = scalar_lea.vmem %s56_s23, 32 }
  0x47   :  { %p2560_p2 = scmp.ne.s32.totalorder %s56_s23, %s2559_s10  ;;  %p2564_p3 = scmp.lt.s32.totalorder %s56_s23, %s56_s23 }
  0x48   :  { %p2565_p4 = scmp.lt.s32.totalorder %s2563_s25, %s2559_s10 }
  0x4a   :  { %p2566_p5 = por %p2565_p4, %p2564_p3 }
  0x4c   :  { %p2567_p6 = pnand %p2566_p5, %p2560_p2 }
  0x4e   :  { %2570 = shalt.err (!%p2567_p6)
}
  0x4f   :  { %58 = dma.hbm_to_vmem [thread:$0]  %s3158_s2, 16, %s56_s23, [#allocation6]  }
  0x50   :  { %s2579_s27 = scalar_lea.vmem %s75_s1, 76544  ;;  %p2584_p8 = scmp.lt.s32.totalorder %s75_s1, %s75_s1 }
  0x51   :  { %p2580_p7 = scmp.ne.s32.totalorder %s75_s1, %s2579_s27  ;;  %p2585_p9 = scmp.lt.s32.totalorder %s2579_s27, %s2579_s27 }
  0x53   :  { %p2586_p10 = por %p2585_p9, %p2584_p8 }
  0x55   :  { %p2587_p11 = pnand %p2586_p10, %p2580_p7 }
  0x57   :  { %2590 = shalt.err (!%p2587_p11)
}
  0x58   :  { %s2695_s0 = smov 256   ;;  %s2696_s28 = smov 16  }
  0x59   :  { %80 = dma.hbm_to_vmem [thread:$0]  %s3160_s4, 76544, %s75_s1, [#allocation9], %s2695_s0, %s2695_s0, %s2696_s28  }
  0x5a   :  { %s2697_s16 = smov [#allocation13]   ;;  %s2698_s17 = smov [#allocation16]  }
  0x5b   :  { %s99_s5 = sshll.u32 %s2697_s16, 4  ;;  %s120_s18 = sshll.u32 %s2698_s17, 4  ;;  %s100_s5 = int_to_ptr.vmem [resolvable:$true] %s99_s5  ;;  %s121_s18 = int_to_ptr.vmem [resolvable:$true] %s120_s18 }
  0x5c   :  { %s2599_s2 = scalar_lea.vmem %s100_s5, 16  ;;  %s2603_s19 = scalar_lea.vmem %s100_s5, 32 }
  0x5d   :  { %p2600_p12 = scmp.ne.s32.totalorder %s100_s5, %s2599_s2  ;;  %p2604_p13 = scmp.lt.s32.totalorder %s100_s5, %s100_s5 }
  0x5e   :  { %p2605_p0 = scmp.lt.s32.totalorder %s2603_s19, %s2599_s2 }
  0x60   :  { %p2606_p1 = por %p2605_p0, %p2604_p13 }
  0x62   :  { %p2607_p2 = pnand %p2606_p1, %p2600_p12 }
  0x64   :  { %2610 = shalt.err (!%p2607_p2)
}
  0x65   :  { %102 = dma.hbm_to_vmem [thread:$0]  %s3163_s7, 16, %s100_s5, [#allocation12]  }
  0x66   :  { %s2619_s21 = scalar_lea.vmem %s121_s18, 512  ;;  %p2624_p4 = scmp.lt.s32.totalorder %s121_s18, %s121_s18 }
  0x67   :  { %p2620_p3 = scmp.ne.s32.totalorder %s121_s18, %s2619_s21  ;;  %p2625_p5 = scmp.lt.s32.totalorder %s2619_s21, %s2619_s21 }
  0x69   :  { %p2626_p6 = por %p2625_p5, %p2624_p4 }
  0x6b   :  { %p2627_p7 = pnand %p2626_p6, %p2620_p3 }
  0x6d   :  { %2630 = shalt.err (!%p2627_p7)
}
  0x6e   :  { %126 = dma.hbm_to_vmem [thread:$0]  %s3165_s9, 512, %s121_s18, [#allocation15], %s2687_s30, %s2687_s30, %s2688_s14  }
  0x6f   :  { %s2699_s23 = smov [#allocation19]  }
  0x70   :  { %s145_s24 = sshll.u32 %s2699_s23, 4  ;;  %s146_s24 = int_to_ptr.vmem [resolvable:$true] %s145_s24 }
  0x71   :  { %s2639_s1 = scalar_lea.vmem %s146_s24, 16  ;;  %s2643_s7 = scalar_lea.vmem %s146_s24, 32 }
  0x72   :  { %p2640_p8 = scmp.ne.s32.totalorder %s146_s24, %s2639_s1  ;;  %p2644_p9 = scmp.lt.s32.totalorder %s146_s24, %s146_s24 }
  0x73   :  { %p2645_p10 = scmp.lt.s32.totalorder %s2643_s7, %s2639_s1 }
  0x75   :  { %p2646_p11 = por %p2645_p10, %p2644_p9 }
  0x77   :  { %p2647_p12 = pnand %p2646_p11, %p2640_p8 }
  0x79   :  { %2650 = shalt.err (!%p2647_p12)
}
  0x7a   :  { %148 = dma.hbm_to_vmem [thread:$0]  %s3168_s12, 16, %s146_s24, [#allocation18]  }
  0x7b   :  { %2671 = dma.done.wait [#allocation3], 512  }
  0x7c   :  { %2672 = vsyncadd [#allocation3], 4294966784 }
  0x7d   :  { %2673 = dma.done.wait [#allocation6], 656  }
  0x7e   :  { %2674 = vsyncadd [#allocation6], 4294966640 }
  0x7f   :  { %2675 = dma.done.wait [#allocation9], 77152  }
  0x80   :  { %2676 = vsyncadd [#allocation9], 4294890144 }
  0x81   :  { %2677 = dma.done.wait [#allocation12], 48  }
  0x82   :  { %2678 = vsyncadd [#allocation12], 4294967248 }
  0x83   :  { %2679 = dma.done.wait [#allocation15], 896  }
  0x84   :  { %2680 = vsyncadd [#allocation15], 4294966400 }
  0x85   :  { %2681 = dma.done.wait [#allocation18], 32  }
  0x86   :  { %2682 = vsyncadd [#allocation18], 4294967264  ;;  %v193_v0 = vld [vmem:[#allocation5 + $0x20] sm:$0x3]  ;;  %vm204_vm0 = vcmask 1040384   ;;  %v545_v1 = vld [vmem:[#allocation10 + $0xe8] sm:$0xff] }
  0x87   :  { %v547_v2 = vld [vmem:[#allocation10 + $0xf8] sm:$0xff]  ;;  %v196_v3 = vpack.c.bf16 %v193_v0, %v193_v0  ;;  %v544_v5 = vld [vmem:[#allocation10 + $0xe0] sm:$0xff]  ;;  %v546_v6 = vld [vmem:[#allocation10 + $0xf0] sm:$0xff]  ;;  %vm197_vm1 = vcmask 277504   ;;  %vm261_vm2 = vcmask 1046528   ;;  %s2701_s9 = smov 88  }
  0x88   :  { %v1129_v4 = vpack.c.bf16 %v547_v2, %v545_v1  ;;  %v191_v7 = vld [vmem:[#allocation5 + $0x10] sm:$0xff]  ;;  %v1128_v8 = vpack.c.bf16 %v546_v6, %v544_v5  ;;  %v192_v9 = vld [vmem:[#allocation5 + $0x18] sm:$0xff]  ;;  %v543_v11 = vld [vmem:[#allocation10 + $0xd8] sm:$0xff]  ;;  %s2702_s12 = smov 108   ;;  %vm284_vm3 = vcmask 1045504   ;;  %s2703_s30 = smov 68  }
  0x89   :  { %v541_v10 = vld [vmem:[#allocation10 + $0xc8] sm:$0xff]  ;;  %2397 = vmatprep.subr.msk.bf16.mxu0 %vm204_vm0, %v196_v3  ;;  %v206_v12 = vsel %vm204_vm0, %v196_v3, 0  ;;  %v195_v13 = vpack.c.bf16 %v192_v9, %v191_v7  ;;  %v540_v15 = vld [vmem:[#allocation10 + $0xc0] sm:$0xff]  ;;  %v542_v16 = vld [vmem:[#allocation10 + $0xd0] sm:$0xff]  ;;  %vm307_vm4 = vcmask 1044480   ;;  %vm330_vm5 = vcmask 1043456  }
  0x8a   :  { %1437 = vmatprep.subr.bf16.mxu1 %v1129_v4  ;;  %v1127_v14 = vpack.c.bf16 %v543_v11, %v541_v10  ;;  %v189_v17 = vld [vmem:[#allocation5] sm:$0xff]  ;;  %2333 = vmatpush3.bf16.msra.mxu0 %v206_v12  ;;  %v1126_v18 = vpack.c.bf16 %v542_v16, %v540_v15  ;;  %v190_v19 = vld [vmem:[#allocation5 + $0x8] sm:$0xff]  ;;  %v537_v20 = vld [vmem:[#allocation10 + $0xa8] sm:$0xff]  ;;  %s2704_s14 = smov 48   ;;  %vm1430_vm6 = vcmask 1042432   ;;  %vm1426_vm7 = vcmask 703488  }
  0x8b   :  { %1438 = vmatpush1.bf16.msra.mxu1 %v1128_v8  ;;  %v539_v21 = vld [vmem:[#allocation10 + $0xb8] sm:$0xff]  ;;  %2334 = vmatprep.subr.bf16.mxu0 %v195_v13  ;;  %v194_v22 = vpack.c.bf16 %v190_v19, %v189_v17  ;;  %v536_v24 = vld [vmem:[#allocation10 + $0xa0] sm:$0xff]  ;;  %v538_v25 = vld [vmem:[#allocation10 + $0xb0] sm:$0xff]  ;;  %vm2707_vm8 = vmmov 0   ;;  %vm355_vm9 = vcmask 158720   ;;  %vm353_vm10 = vcmask 162816  }
  0x8c   :  { %1439 = vmatprep.subr.bf16.mxu1 %v1127_v14  ;;  %v1125_v23 = vpack.c.bf16 %v539_v21, %v537_v20  ;;  %v183_v26 = vld [vmem:[#allocation2] sm:$0xff]  ;;  %v184_v27 = vld [vmem:[#allocation2 + $0x8] sm:$0xff]  ;;  %v185_v28 = vld [vmem:[#allocation2 + $0x10] sm:$0xff]  ;;  %v1124_v34 = vpack.c.bf16 %v538_v25, %v536_v24  ;;  %vm1965_vm11 = vcmask 261120   ;;  %vm2042_vm12 = vcmask 1041409  }
  0x8d   :  { %v186_v29 = vld [vmem:[#allocation2 + $0x18] sm:$0xff]  ;;  %v187_v30 = vpack.c.bf16 %v184_v27, %v183_v26  ;;  %v535_v32 = vld [vmem:[#allocation10 + $0x98] sm:$0xff]  ;;  %v532_v36 = vld [vmem:[#allocation10 + $0x80] sm:$0xff]  ;;  %vm2221_vm13 = vcmask 9216  }
  0x8e   :  { %v533_v31 = vld [vmem:[#allocation10 + $0x88] sm:$0xff]  ;;  %2335 = vmatpush3.bf16.msra.mxu0 %v195_v13  ;;  %v611_v35 = vld [vmem:[#allocation10 + $0x2f8] sm:$0xff]  ;;  %v534_v37 = vld [vmem:[#allocation10 + $0x90] sm:$0xff]  ;;  %v188_v46 = vpack.c.bf16 %v186_v29, %v185_v28 }
  0x8f   :  { %v609_v33 = vld [vmem:[#allocation10 + $0x2e8] sm:$0xff]  ;;  %1440 = vmatpush1.bf16.msra.mxu1 %v1126_v18  ;;  %2336 = vmatprep.subr.bf16.mxu0 %v194_v22  ;;  %v1123_v38 = vpack.c.bf16 %v535_v32, %v533_v31  ;;  %v608_v40 = vld [vmem:[#allocation10 + $0x2e0] sm:$0xff]  ;;  %v610_v41 = vld [vmem:[#allocation10 + $0x2f0] sm:$0xff]  ;;  %v1122_v47 = vpack.c.bf16 %v534_v37, %v532_v36 }
  0x90   :  { %1441 = vmatprep.subr.bf16.mxu1 %v1125_v23  ;;  %v1161_v39 = vpack.c.bf16 %v611_v35, %v609_v33  ;;  %v529_v42 = vld [vmem:[#allocation10 + $0x68] sm:$0xff]  ;;  %2338 = vmatprep.mubr.msk.bf16.mxu0 %vm197_vm1, %v187_v30  ;;  %v531_v43 = vld [vmem:[#allocation10 + $0x78] sm:$0xff]  ;;  %v1160_v48 = vpack.c.bf16 %v610_v41, %v608_v40  ;;  %v528_v49 = vld [vmem:[#allocation10 + $0x60] sm:$0xff] }
  0x91   :  { %v605_v44 = vld [vmem:[#allocation10 + $0x2c8] sm:$0xff]  ;;  %v607_v45 = vld [vmem:[#allocation10 + $0x2d8] sm:$0xff]  ;;  %v530_v50 = vld [vmem:[#allocation10 + $0x70] sm:$0xff]  ;;  %v1121_v51 = vpack.c.bf16 %v531_v43, %v529_v42  ;;  %v2700_v43 = vmov 1983009808  }
  0x92   :  { %2337 = vmatpush3.bf16.msra.mxu0 %v194_v22  ;;  %v1159_v52 = vpack.c.bf16 %v607_v45, %v605_v44  ;;  %v604_v53 = vld [vmem:[#allocation10 + $0x2c0] sm:$0xff]  ;;  %v606_v54 = vld [vmem:[#allocation10 + $0x2d0] sm:$0xff]  ;;  %v525_v55 = vld [vmem:[#allocation10 + $0x48] sm:$0xff]  ;;  %v1120_v59 = vpack.c.bf16 %v530_v50, %v528_v49  ;;  %v396_v44 = vunpack.c.l.s4 %v2700_v43  ;;  %v398_v45 = vlaneseq }
  0x93   :  { %1442 = vmatpush1.bf16.msra.mxu1 %v1124_v34  ;;  %1478 = vmatprep.subr.bf16.mxu0 %v1161_v39  ;;  %v527_v56 = vld [vmem:[#allocation10 + $0x58] sm:$0xff]  ;;  %v601_v57 = vld [vmem:[#allocation10 + $0x2a8] sm:$0xff]  ;;  %v1158_v60 = vpack.c.bf16 %v606_v54, %v604_v53  ;;  %v524_v61 = vld [vmem:[#allocation10 + $0x40] sm:$0xff] }
  0x94   :  { %1443 = vmatprep.subr.bf16.mxu1 %v1123_v38  ;;  %v603_v58 = vld [vmem:[#allocation10 + $0x2b8] sm:$0xff]  ;;  %v526_v62 = vld [vmem:[#allocation10 + $0x50] sm:$0xff]  ;;  %v1119_v63 = vpack.c.bf16 %v527_v56, %v525_v55  ;;  %v600_v1 = vld [vmem:[#allocation10 + $0x2a0] sm:$0xff] }
  0x95   :  { %2339 = vmatmul.mubr.msk.bf16.vlgmr.msra.gmra.mxu0 %vm197_vm1, %v188_v46  ;;  %v1157_v0 = vpack.c.bf16 %v603_v58, %v601_v57  ;;  %v602_v2 = vld [vmem:[#allocation10 + $0x2b0] sm:$0xff]  ;;  %v521_v3 = vld [vmem:[#allocation10 + $0x28] sm:$0xff]  ;;  %v523_v4 = vld [vmem:[#allocation10 + $0x38] sm:$0xff]  ;;  %v1118_v7 = vpack.c.bf16 %v526_v62, %v524_v61  ;;  %v397_v58 = vunpack.c.0.s8 %v396_v44 }
  0x96   :  { %1479 = vmatpush1.bf16.msra.mxu0 %v1160_v48  ;;  %v597_v5 = vld [vmem:[#allocation10 + $0x288] sm:$0xff]  ;;  %v599_v6 = vld [vmem:[#allocation10 + $0x298] sm:$0xff]  ;;  %v1156_v8 = vpack.c.bf16 %v602_v2, %v600_v1  ;;  %v520_v9 = vld [vmem:[#allocation10 + $0x20] sm:$0xff]  ;;  %v1117_v11 = vpack.c.bf16 %v523_v4, %v521_v3 }
  0x97   :  { %1444 = vmatpush1.bf16.msra.mxu1 %v1122_v47  ;;  %1480 = vmatprep.subr.bf16.mxu0 %v1159_v52  ;;  %v522_v10 = vld [vmem:[#allocation10 + $0x30] sm:$0xff]  ;;  %v1155_v12 = vpack.c.bf16 %v599_v6, %v597_v5  ;;  %v596_v13 = vld [vmem:[#allocation10 + $0x280] sm:$0xff]  ;;  %v517_v15 = vld [vmem:[#allocation10 + $0x8] sm:$0xff] }
  0x98   :  { %1445 = vmatprep.subr.bf16.mxu1 %v1121_v51  ;;  %v598_v14 = vld [vmem:[#allocation10 + $0x290] sm:$0xff]  ;;  %v519_v16 = vld [vmem:[#allocation10 + $0x18] sm:$0xff]  ;;  %v593_v17 = vld [vmem:[#allocation10 + $0x268] sm:$0xff]  ;;  %v1116_v19 = vpack.c.bf16 %v522_v10, %v520_v9 }
  0x99   :  { %v595_v18 = vld [vmem:[#allocation10 + $0x278] sm:$0xff]  ;;  %v1154_v20 = vpack.c.bf16 %v598_v14, %v596_v13  ;;  %v516_v21 = vld [vmem:[#allocation10] sm:$0xff]  ;;  %v518_v22 = vld [vmem:[#allocation10 + $0x10] sm:$0xff]  ;;  %v1115_v23 = vpack.c.bf16 %v519_v16, %v517_v15 }
  0x9a   :  { %1481 = vmatpush1.bf16.msra.mxu0 %v1158_v60  ;;  %v1153_v24 = vpack.c.bf16 %v595_v18, %v593_v17  ;;  %v592_v25 = vld [vmem:[#allocation10 + $0x260] sm:$0xff]  ;;  %v594_v26 = vld [vmem:[#allocation10 + $0x270] sm:$0xff]  ;;  %v577_v27 = vld [vmem:[#allocation10 + $0x1e8] sm:$0xff]  ;;  %v1114_v31 = vpack.c.bf16 %v518_v22, %v516_v21 }
  0x9b   :  { %1446 = vmatpush1.bf16.msra.mxu1 %v1120_v59  ;;  %1482 = vmatprep.subr.bf16.mxu0 %v1157_v0  ;;  %v579_v28 = vld [vmem:[#allocation10 + $0x1f8] sm:$0xff]  ;;  %v589_v29 = vld [vmem:[#allocation10 + $0x248] sm:$0xff]  ;;  %v1152_v32 = vpack.c.bf16 %v594_v26, %v592_v25  ;;  %v576_v33 = vld [vmem:[#allocation10 + $0x1e0] sm:$0xff]  ;;  %v2826_v59 = vshrl.u32 %v398_v45, 7 }
  0x9c   :  { %1447 = vmatprep.subr.bf16.mxu1 %v1119_v63  ;;  %v591_v30 = vld [vmem:[#allocation10 + $0x258] sm:$0xff]  ;;  %v578_v34 = vld [vmem:[#allocation10 + $0x1f0] sm:$0xff]  ;;  %v1145_v35 = vpack.c.bf16 %v579_v28, %v577_v27  ;;  %v588_v37 = vld [vmem:[#allocation10 + $0x240] sm:$0xff] }
  0x9d   :  { %v1151_v36 = vpack.c.bf16 %v591_v30, %v589_v29  ;;  %v590_v38 = vld [vmem:[#allocation10 + $0x250] sm:$0xff]  ;;  %v573_v39 = vld [vmem:[#allocation10 + $0x1c8] sm:$0xff]  ;;  %v575_v40 = vld [vmem:[#allocation10 + $0x1d8] sm:$0xff]  ;;  %v1144_v46 = vpack.c.bf16 %v578_v34, %v576_v33 }
  0x9e   :  { %1483 = vmatpush1.bf16.msra.mxu0 %v1156_v8  ;;  %v585_v41 = vld [vmem:[#allocation10 + $0x228] sm:$0xff]  ;;  %v587_v42 = vld [vmem:[#allocation10 + $0x238] sm:$0xff]  ;;  %v1150_v47 = vpack.c.bf16 %v590_v38, %v588_v37  ;;  %v572_v48 = vld [vmem:[#allocation10 + $0x1c0] sm:$0xff]  ;;  %v1143_v50 = vpack.c.bf16 %v575_v40, %v573_v39  ;;  %v2829_v8 = vsub.s32 %v397_v58, %v2826_v59 }
  0x9f   :  { %1448 = vmatpush1.bf16.msra.mxu1 %v1118_v7  ;;  %1484 = vmatprep.subr.bf16.mxu0 %v1155_v12  ;;  %v574_v49 = vld [vmem:[#allocation10 + $0x1d0] sm:$0xff]  ;;  %v1149_v51 = vpack.c.bf16 %v587_v42, %v585_v41  ;;  %v584_v52 = vld [vmem:[#allocation10 + $0x220] sm:$0xff]  ;;  %v569_v54 = vld [vmem:[#allocation10 + $0x1a8] sm:$0xff] }
  0xa0   :  { %1449 = vmatprep.subr.bf16.mxu1 %v1117_v11  ;;  %v586_v53 = vld [vmem:[#allocation10 + $0x230] sm:$0xff]  ;;  %v571_v55 = vld [vmem:[#allocation10 + $0x1b8] sm:$0xff]  ;;  %v581_v56 = vld [vmem:[#allocation10 + $0x208] sm:$0xff]  ;;  %v1142_v60 = vpack.c.bf16 %v574_v49, %v572_v48 }
  0xa1   :  { %v583_v57 = vld [vmem:[#allocation10 + $0x218] sm:$0xff]  ;;  %v1148_v61 = vpack.c.bf16 %v586_v53, %v584_v52  ;;  %v568_v62 = vld [vmem:[#allocation10 + $0x1a0] sm:$0xff]  ;;  %v570_v63 = vld [vmem:[#allocation10 + $0x1b0] sm:$0xff]  ;;  %v1141_v0 = vpack.c.bf16 %v571_v55, %v569_v54 }
  0xa2   :  { %1485 = vmatpush1.bf16.msra.mxu0 %v1154_v20  ;;  %v1147_v1 = vpack.c.bf16 %v583_v57, %v581_v56  ;;  %v580_v2 = vld [vmem:[#allocation10 + $0x200] sm:$0xff]  ;;  %v582_v3 = vld [vmem:[#allocation10 + $0x210] sm:$0xff]  ;;  %v565_v4 = vld [vmem:[#allocation10 + $0x188] sm:$0xff]  ;;  %v1140_v9 = vpack.c.bf16 %v570_v63, %v568_v62 }
  0xa3   :  { %1450 = vmatpush1.bf16.msra.mxu1 %v1116_v19  ;;  %1486 = vmatprep.subr.bf16.mxu0 %v1153_v24  ;;  %v567_v5 = vld [vmem:[#allocation10 + $0x198] sm:$0xff]  ;;  %v641_v6 = vld [vmem:[#allocation10 + $0x3e8] sm:$0xff]  ;;  %v1146_v10 = vpack.c.bf16 %v582_v3, %v580_v2  ;;  %v564_v11 = vld [vmem:[#allocation10 + $0x180] sm:$0xff] }
  0xa4   :  { %1451 = vmatprep.subr.bf16.mxu1 %v1115_v23  ;;  %v643_v7 = vld [vmem:[#allocation10 + $0x3f8] sm:$0xff]  ;;  %v566_v12 = vld [vmem:[#allocation10 + $0x190] sm:$0xff]  ;;  %v640_v13 = vld [vmem:[#allocation10 + $0x3e0] sm:$0xff]  ;;  %v1139_v14 = vpack.c.bf16 %v567_v5, %v565_v4 }
  0xa5   :  { %v1177_v15 = vpack.c.bf16 %v643_v7, %v641_v6  ;;  %v642_v16 = vld [vmem:[#allocation10 + $0x3f0] sm:$0xff]  ;;  %v561_v17 = vld [vmem:[#allocation10 + $0x168] sm:$0xff]  ;;  %v384_v18 = vld [vmem:[#allocation8] sm:$0xff]  ;;  %v1138_v24 = vpack.c.bf16 %v566_v12, %v564_v11 }
  0xa6   :  { %1487 = vmatpush1.bf16.msra.mxu0 %v1152_v32  ;;  %v563_v19 = vld [vmem:[#allocation10 + $0x178] sm:$0xff]  ;;  %v637_v20 = vld [vmem:[#allocation10 + $0x3c8] sm:$0xff]  ;;  %v394_v22 = vcombine.high %v384_v18, %v384_v18  ;;  %v2832_v23 = vrot.slane %v384_v18, %v2829_v8  ;;  %v1176_v25 = vpack.c.bf16 %v642_v16, %v640_v13  ;;  %v560_v26 = vld [vmem:[#allocation10 + $0x160] sm:$0xff] }
  0xa7   :  { %1452 = vmatpush1.bf16.msra.mxu1 %v1114_v31  ;;  %1488 = vmatprep.subr.bf16.mxu0 %v1151_v36  ;;  %v639_v21 = vld [vmem:[#allocation10 + $0x3d8] sm:$0xff]  ;;  %v562_v27 = vld [vmem:[#allocation10 + $0x170] sm:$0xff]  ;;  %v1137_v29 = vpack.c.bf16 %v563_v19, %v561_v17  ;;  %v636_v31 = vld [vmem:[#allocation10 + $0x3c0] sm:$0xff] }
  0xa8   :  { %1453 = vmatprep.subr.bf16.mxu1 %v1145_v35  ;;  %v409_v28 = vcombine.high %v2832_v23, %v2832_v23  ;;  %v1175_v30 = vpack.c.bf16 %v639_v21, %v637_v20  ;;  %v638_v32 = vld [vmem:[#allocation10 + $0x3d0] sm:$0xff]  ;;  %v557_v33 = vld [vmem:[#allocation10 + $0x148] sm:$0xff]  ;;  %v2837_v34 = vrot.slane %v394_v22, %v2829_v8  ;;  %v559_v35 = vld [vmem:[#allocation10 + $0x158] sm:$0xff]  ;;  %v1136_v40 = vpack.c.bf16 %v562_v27, %v560_v26 }
  0xa9   :  { %v633_v36 = vld [vmem:[#allocation10 + $0x3a8] sm:$0xff]  ;;  %v635_v37 = vld [vmem:[#allocation10 + $0x3b8] sm:$0xff]  ;;  %v1174_v41 = vpack.c.bf16 %v638_v32, %v636_v31  ;;  %v556_v42 = vld [vmem:[#allocation10 + $0x140] sm:$0xff]  ;;  %v1135_v44 = vpack.c.bf16 %v559_v35, %v557_v33 }
  0xaa   :  { %1489 = vmatpush1.bf16.msra.mxu0 %v1150_v47  ;;  %v498_v38 = vpack.c.bf16 %v409_v28, %v409_v28  ;;  %v410_v39 = vcombine.high %v2837_v34, %v2837_v34  ;;  %v558_v43 = vld [vmem:[#allocation10 + $0x150] sm:$0xff]  ;;  %v1173_v45 = vpack.c.bf16 %v635_v37, %v633_v36  ;;  %v553_v48 = vld [vmem:[#allocation10 + $0x128] sm:$0xff]  ;;  %v631_v52 = vld [vmem:[#allocation10 + $0x398] sm:$0xff]  ;;  %v497_v28 = vpack.c.bf16 %v2832_v23, %v2832_v23 }
  0xab   :  { %1454 = vmatpush2.bf16.msra.mxu1 %v1144_v46  ;;  %1490 = vmatprep.subr.bf16.mxu0 %v1149_v51  ;;  %v632_v46 = vld [vmem:[#allocation10 + $0x3a0] sm:$0xff]  ;;  %v634_v47 = vld [vmem:[#allocation10 + $0x3b0] sm:$0xff]  ;;  %v629_v51 = vld [vmem:[#allocation10 + $0x388] sm:$0xff]  ;;  %v1134_v53 = vpack.c.bf16 %v558_v43, %v556_v42 }
  0xac   :  { %1455 = vmatprep.subr.bf16.mxu1 %v1143_v50  ;;  %v500_v49 = vpack.c.bf16 %v410_v39, %v410_v39  ;;  %v555_v50 = vld [vmem:[#allocation10 + $0x138] sm:$0xff]  ;;  %1469 = vmatprep.mubr.bf16.mxu1 %v498_v38  ;;  %v1172_v54 = vpack.c.bf16 %v634_v47, %v632_v46  ;;  %v552_v55 = vld [vmem:[#allocation10 + $0x120] sm:$0xff]  ;;  %v554_v56 = vld [vmem:[#allocation10 + $0x130] sm:$0xff]  ;;  %v1171_v58 = vpack.c.bf16 %v631_v52, %v629_v51 }
  0xad   :  { %v1133_v57 = vpack.c.bf16 %v555_v50, %v553_v48  ;;  %v549_v62 = vld [vmem:[#allocation10 + $0x108] sm:$0xff]  ;;  %v551_v63 = vld [vmem:[#allocation10 + $0x118] sm:$0xff]  ;;  %v1132_v2 = vpack.c.bf16 %v554_v56, %v552_v55  ;;  %v548_v4 = vld [vmem:[#allocation10 + $0x100] sm:$0xff] }
  0xae   :  { %1491 = vmatpush1.bf16.msra.mxu0 %v1148_v61  ;;  %1510 = vmatprep.mubr.bf16.mxu0 %v500_v49  ;;  %v630_v61 = vld [vmem:[#allocation10 + $0x390] sm:$0xff]  ;;  %v1131_v6 = vpack.c.bf16 %v551_v63, %v549_v62  ;;  %v621_v11 = vld [vmem:[#allocation10 + $0x348] sm:$0xff]  ;;  %v623_v12 = vld [vmem:[#allocation10 + $0x358] sm:$0xff] }
  0xaf   :  { %1456 = vmatpush2.bf16.msra.mxu1 %v1142_v60  ;;  %1492 = vmatprep.subr.bf16.mxu0 %v1147_v1  ;;  %v628_v60 = vld [vmem:[#allocation10 + $0x380] sm:$0xff]  ;;  %v627_v1 = vld [vmem:[#allocation10 + $0x378] sm:$0xff]  ;;  %v550_v5 = vld [vmem:[#allocation10 + $0x110] sm:$0xff]  ;;  %v1167_v19 = vpack.c.bf16 %v623_v12, %v621_v11 }
  0xb0   :  { %1457 = vmatprep.subr.bf16.mxu1 %v1141_v0  ;;  %v625_v0 = vld [vmem:[#allocation10 + $0x368] sm:$0xff]  ;;  %v1170_v3 = vpack.c.bf16 %v630_v61, %v628_v60  ;;  %v620_v17 = vld [vmem:[#allocation10 + $0x340] sm:$0xff]  ;;  %v622_v18 = vld [vmem:[#allocation10 + $0x350] sm:$0xff] }
  0xb1   :  { %v1169_v7 = vpack.c.bf16 %v627_v1, %v625_v0  ;;  %v673_v13 = vld [vmem:[#allocation10 + $0x4e8] sm:$0xff]  ;;  %v672_v21 = vld [vmem:[#allocation10 + $0x4e0] sm:$0xff]  ;;  %v674_v22 = vld [vmem:[#allocation10 + $0x4f0] sm:$0xff] }
  0xb2   :  { %1493 = vmatpush1.bf16.msra.mxu0 %v1146_v10  ;;  %v626_v10 = vld [vmem:[#allocation10 + $0x370] sm:$0xff]  ;;  %v669_v26 = vld [vmem:[#allocation10 + $0x4c8] sm:$0xff]  ;;  %v671_v27 = vld [vmem:[#allocation10 + $0x4d8] sm:$0xff] }
  0xb3   :  { %1458 = vmatpush2.bf16.msra.mxu1 %v1140_v9  ;;  %1494 = vmatprep.subr.bf16.mxu0 %v1177_v15  ;;  %v624_v9 = vld [vmem:[#allocation10 + $0x360] sm:$0xff]  ;;  %v1130_v15 = vpack.c.bf16 %v550_v5, %v548_v4  ;;  %v618_v32 = vld [vmem:[#allocation10 + $0x330] sm:$0xff]  ;;  %v1191_v35 = vpack.c.bf16 %v671_v27, %v669_v26  ;;  %v613_v38 = vld [vmem:[#allocation10 + $0x308] sm:$0xff] }
  0xb4   :  { %1459 = vmatprep.subr.bf16.mxu1 %v1139_v14  ;;  %v675_v14 = vld [vmem:[#allocation10 + $0x4f8] sm:$0xff]  ;;  %v1168_v16 = vpack.c.bf16 %v626_v10, %v624_v9  ;;  %v616_v31 = vld [vmem:[#allocation10 + $0x320] sm:$0xff]  ;;  %v670_v37 = vld [vmem:[#allocation10 + $0x4d0] sm:$0xff] }
  0xb5   :  { %v1193_v20 = vpack.c.bf16 %v675_v14, %v673_v13  ;;  %v668_v36 = vld [vmem:[#allocation10 + $0x4c0] sm:$0xff]  ;;  %v615_v39 = vld [vmem:[#allocation10 + $0x318] sm:$0xff]  ;;  %v1164_v23 = vpack.c.bf16 %v618_v32, %v616_v31  ;;  %v666_v48 = vld [vmem:[#allocation10 + $0x4b0] sm:$0xff] }
  0xb6   :  { %1495 = vmatpush2.bf16.msra.mxu0 %v1176_v25  ;;  %v619_v25 = vld [vmem:[#allocation10 + $0x338] sm:$0xff]  ;;  %v1190_v42 = vpack.c.bf16 %v670_v37, %v668_v36  ;;  %v612_v43 = vld [vmem:[#allocation10 + $0x300] sm:$0xff]  ;;  %v661_v49 = vld [vmem:[#allocation10 + $0x488] sm:$0xff] }
  0xb7   :  { %1460 = vmatpush2.bf16.msra.mxu1 %v1138_v24  ;;  %1496 = vmatprep.subr.bf16.mxu0 %v1175_v30  ;;  %v617_v24 = vld [vmem:[#allocation10 + $0x328] sm:$0xff]  ;;  %v1192_v30 = vpack.c.bf16 %v674_v22, %v672_v21  ;;  %v664_v47 = vld [vmem:[#allocation10 + $0x4a0] sm:$0xff]  ;;  %v663_v50 = vld [vmem:[#allocation10 + $0x498] sm:$0xff] }
  0xb8   :  { %1461 = vmatprep.subr.bf16.mxu1 %v1137_v29  ;;  %v1166_v29 = vpack.c.bf16 %v622_v18, %v620_v17  ;;  %v1165_v33 = vpack.c.bf16 %v619_v25, %v617_v24  ;;  %v737_v51 = vld [vmem:[#allocation10 + $0x6e8] sm:$0xff]  ;;  %v739_v52 = vld [vmem:[#allocation10 + $0x6f8] sm:$0xff]  ;;  %v660_v55 = vld [vmem:[#allocation10 + $0x480] sm:$0xff] }
  0xb9   :  { %v662_v56 = vld [vmem:[#allocation10 + $0x490] sm:$0xff]  ;;  %v736_v60 = vld [vmem:[#allocation10 + $0x6e0] sm:$0xff]  ;;  %v657_v62 = vld [vmem:[#allocation10 + $0x468] sm:$0xff] }
  0xba   :  { %1497 = vmatpush2.bf16.msra.mxu0 %v1174_v41  ;;  %v667_v41 = vld [vmem:[#allocation10 + $0x4b8] sm:$0xff]  ;;  %v738_v61 = vld [vmem:[#allocation10 + $0x6f0] sm:$0xff]  ;;  %v733_v0 = vld [vmem:[#allocation10 + $0x6c8] sm:$0xff] }
  0xbb   :  { %1462 = vmatpush2.bf16.msra.mxu1 %v1136_v40  ;;  %1498 = vmatprep.subr.bf16.mxu0 %v1173_v45  ;;  %v665_v40 = vld [vmem:[#allocation10 + $0x4a8] sm:$0xff]  ;;  %v1163_v45 = vpack.c.bf16 %v615_v39, %v613_v38  ;;  %v659_v63 = vld [vmem:[#allocation10 + $0x478] sm:$0xff]  ;;  %v1224_v4 = vpack.c.bf16 %v738_v61, %v736_v60  ;;  %v656_v5 = vld [vmem:[#allocation10 + $0x460] sm:$0xff] }
  0xbc   :  { %1463 = vmatprep.subr.bf16.mxu1 %v1135_v44  ;;  %v614_v44 = vld [vmem:[#allocation10 + $0x310] sm:$0xff]  ;;  %v1189_v46 = vpack.c.bf16 %v667_v41, %v665_v40  ;;  %v735_v1 = vld [vmem:[#allocation10 + $0x6d8] sm:$0xff]  ;;  %v732_v10 = vld [vmem:[#allocation10 + $0x6c0] sm:$0xff] }
  0xbd   :  { %v1223_v9 = vpack.c.bf16 %v735_v1, %v733_v0  ;;  %v734_v11 = vld [vmem:[#allocation10 + $0x6d0] sm:$0xff]  ;;  %v653_v12 = vld [vmem:[#allocation10 + $0x448] sm:$0xff]  ;;  %v655_v13 = vld [vmem:[#allocation10 + $0x458] sm:$0xff] }
  0xbe   :  { %1499 = vmatpush2.bf16.msra.mxu0 %v1172_v54  ;;  %v1188_v54 = vpack.c.bf16 %v666_v48, %v664_v47  ;;  %v729_v14 = vld [vmem:[#allocation10 + $0x6a8] sm:$0xff]  ;;  %v652_v17 = vld [vmem:[#allocation10 + $0x440] sm:$0xff]  ;;  %v654_v18 = vld [vmem:[#allocation10 + $0x450] sm:$0xff] }
  0xbf   :  { %1464 = vmatpush2.bf16.msra.mxu1 %v1134_v53  ;;  %1500 = vmatprep.subr.bf16.mxu0 %v1171_v58  ;;  %v1162_v53 = vpack.c.bf16 %v614_v44, %v612_v43  ;;  %v1225_v58 = vpack.c.bf16 %v739_v52, %v737_v51  ;;  %v730_v22 = vld [vmem:[#allocation10 + $0x6b0] sm:$0xff]  ;;  %v649_v24 = vld [vmem:[#allocation10 + $0x428] sm:$0xff]  ;;  %v651_v25 = vld [vmem:[#allocation10 + $0x438] sm:$0xff] }
  0xc0   :  { %1465 = vmatprep.subr.bf16.mxu1 %v1133_v57  ;;  %v1187_v57 = vpack.c.bf16 %v663_v50, %v661_v49  ;;  %v725_v26 = vld [vmem:[#allocation10 + $0x688] sm:$0xff]  ;;  %v727_v27 = vld [vmem:[#allocation10 + $0x698] sm:$0xff]  ;;  %v648_v31 = vld [vmem:[#allocation10 + $0x420] sm:$0xff] }
  0xc1   :  { %v650_v32 = vld [vmem:[#allocation10 + $0x430] sm:$0xff]  ;;  %v724_v36 = vld [vmem:[#allocation10 + $0x680] sm:$0xff]  ;;  %v645_v38 = vld [vmem:[#allocation10 + $0x408] sm:$0xff] }
  0xc2   :  { %1501 = vmatpush2.bf16.msra.mxu0 %v1170_v3  ;;  %v1186_v3 = vpack.c.bf16 %v662_v56, %v660_v55  ;;  %v726_v37 = vld [vmem:[#allocation10 + $0x690] sm:$0xff]  ;;  %v647_v41 = vld [vmem:[#allocation10 + $0x418] sm:$0xff]  ;;  %v1180_v44 = vpack.c.bf16 %v650_v32, %v648_v31  ;;  %v720_v51 = vld [vmem:[#allocation10 + $0x660] sm:$0xff] }
  0xc3   :  { %1466 = vmatpush2.bf16.msra.mxu1 %v1132_v2  ;;  %1502 = vmatprep.subr.bf16.mxu0 %v1169_v7  ;;  %v499_v2 = vpack.c.bf16 %v2837_v34, %v2837_v34  ;;  %v1185_v7 = vpack.c.bf16 %v659_v63, %v657_v62  ;;  %v646_v47 = vld [vmem:[#allocation10 + $0x410] sm:$0xff]  ;;  %v1179_v49 = vpack.c.bf16 %v647_v41, %v645_v38  ;;  %v707_v55 = vld [vmem:[#allocation10 + $0x5f8] sm:$0xff]  ;;  %v717_v56 = vld [vmem:[#allocation10 + $0x648] sm:$0xff] }
  0xc4   :  { %1467 = vmatprep.subr.bf16.mxu1 %v1131_v6  ;;  %v658_v6 = vld [vmem:[#allocation10 + $0x470] sm:$0xff]  ;;  %v704_v62 = vld [vmem:[#allocation10 + $0x5e0] sm:$0xff]  ;;  %v695_v31 = vld [vmem:[#allocation10 + $0x598] sm:$0xff] }
  0xc5   :  { %v1184_v34 = vpack.c.bf16 %v658_v6, %v656_v5  ;;  %v722_v52 = vld [vmem:[#allocation10 + $0x670] sm:$0xff]  ;;  %v701_v5 = vld [vmem:[#allocation10 + $0x5c8] sm:$0xff]  ;;  %v703_v6 = vld [vmem:[#allocation10 + $0x5d8] sm:$0xff] }
  0xc6   :  { %1503 = vmatpush2.bf16.msra.mxu0 %v1168_v16  ;;  %v1222_v16 = vpack.c.bf16 %v734_v11, %v732_v10  ;;  %v1216_v61 = vpack.c.bf16 %v722_v52, %v720_v51  ;;  %v706_v63 = vld [vmem:[#allocation10 + $0x5f0] sm:$0xff]  ;;  %v769_v32 = vld [vmem:[#allocation10 + $0x7e8] sm:$0xff] }
  0xc7   :  { %1468 = vmatpush2.bf16.msra.mxu1 %v1130_v15  ;;  %1504 = vmatprep.subr.bf16.mxu0 %v1167_v19  ;;  %v731_v15 = vld [vmem:[#allocation10 + $0x6b8] sm:$0xff]  ;;  %v728_v19 = vld [vmem:[#allocation10 + $0x6a0] sm:$0xff]  ;;  %v1208_v10 = vpack.c.bf16 %v706_v63, %v704_v62  ;;  %v694_v38 = vld [vmem:[#allocation10 + $0x590] sm:$0xff] }
  0xc8   :  { %1519 = vmatprep.subr.bf16.mxu1 %v1193_v20  ;;  %v1183_v20 = vpack.c.bf16 %v655_v13, %v653_v12  ;;  %v1221_v21 = vpack.c.bf16 %v731_v15, %v729_v14  ;;  %v700_v12 = vld [vmem:[#allocation10 + $0x5c0] sm:$0xff]  ;;  %v702_v13 = vld [vmem:[#allocation10 + $0x5d0] sm:$0xff]  ;;  %v1207_v14 = vpack.c.bf16 %v703_v6, %v701_v5  ;;  %v681_v5 = vld [vmem:[#allocation10 + $0x528] sm:$0xff] }
  0xc9   :  { %v690_v51 = vld [vmem:[#allocation10 + $0x570] sm:$0xff]  ;;  %v684_v63 = vld [vmem:[#allocation10 + $0x540] sm:$0xff]  ;;  %v683_v6 = vld [vmem:[#allocation10 + $0x538] sm:$0xff] }
  0xca   :  { %1470 = vmatmul.mubr.bf16.vlgmr.msra.gmra.mxu1 %v497_v28  ;;  %1505 = vmatpush2.bf16.msra.mxu0 %v1166_v29  ;;  %v1182_v28 = vpack.c.bf16 %v654_v18, %v652_v17  ;;  %v1220_v29 = vpack.c.bf16 %v730_v22, %v728_v19  ;;  %v697_v17 = vld [vmem:[#allocation10 + $0x5a8] sm:$0xff]  ;;  %v699_v18 = vld [vmem:[#allocation10 + $0x5b8] sm:$0xff] }
  0xcb   :  { %1520 = vmatpush1.bf16.msra.mxu1 %v1192_v30  ;;  %1506 = vmatprep.subr.bf16.mxu0 %v1165_v33  ;;  %v1181_v30 = vpack.c.bf16 %v651_v25, %v649_v24  ;;  %v385_v33 = vld [vmem:[#allocation8 + $0x8] sm:$0xff]  ;;  %v698_v25 = vld [vmem:[#allocation10 + $0x5b0] sm:$0xff] }
  0xcc   :  { %1521 = vmatprep.subr.bf16.mxu1 %v1191_v35  ;;  %v1219_v35 = vpack.c.bf16 %v727_v27, %v725_v26  ;;  %v2846_v39 = vrot.slane %v385_v33, %v2829_v8  ;;  %v411_v40 = vcombine.high %v385_v33, %v385_v33  ;;  %v709_v19 = vld [vmem:[#allocation10 + $0x608] sm:$0xff]  ;;  %v696_v24 = vld [vmem:[#allocation10 + $0x5a0] sm:$0xff]  ;;  %v1205_v26 = vpack.c.bf16 %v699_v18, %v697_v17  ;;  %v771_v33 = vld [vmem:[#allocation10 + $0x7f8] sm:$0xff] }
  0xcd   :  { %v1241_v41 = vpack.c.bf16 %v771_v33, %v769_v32  ;;  %v677_v17 = vld [vmem:[#allocation10 + $0x508] sm:$0xff]  ;;  %v679_v18 = vld [vmem:[#allocation10 + $0x518] sm:$0xff] }
  0xce   :  { %1507 = vmatpush2.bf16.msra.mxu0 %v1164_v23  ;;  %v721_v23 = vld [vmem:[#allocation10 + $0x668] sm:$0xff]  ;;  %v426_v43 = vcombine.high %v2846_v39, %v2846_v39  ;;  %v2851_v48 = vrot.slane %v411_v40, %v2829_v8  ;;  %v803_v33 = vld [vmem:[#allocation10 + $0x8f8] sm:$0xff] }
  0xcf   :  { %1522 = vmatpush1.bf16.msra.mxu1 %v1190_v42  ;;  %1508 = vmatprep.subr.bf16.mxu0 %v1163_v45  ;;  %v723_v42 = vld [vmem:[#allocation10 + $0x678] sm:$0xff]  ;;  %v1218_v45 = vpack.c.bf16 %v726_v37, %v724_v36  ;;  %v692_v37 = vld [vmem:[#allocation10 + $0x580] sm:$0xff]  ;;  %v801_v32 = vld [vmem:[#allocation10 + $0x8e8] sm:$0xff] }
  0xd0   :  { %1523 = vmatprep.subr.bf16.mxu1 %v1189_v46  ;;  %v644_v46 = vld [vmem:[#allocation10 + $0x400] sm:$0xff]  ;;  %v1217_v50 = vpack.c.bf16 %v723_v42, %v721_v23  ;;  %v770_v42 = vld [vmem:[#allocation10 + $0x7f0] sm:$0xff] }
  0xd1   :  { %v1178_v60 = vpack.c.bf16 %v646_v47, %v644_v46  ;;  %v768_v23 = vld [vmem:[#allocation10 + $0x7e0] sm:$0xff]  ;;  %v767_v46 = vld [vmem:[#allocation10 + $0x7d8] sm:$0xff]  ;;  %v1202_v47 = vpack.c.bf16 %v694_v38, %v692_v37  ;;  %v750_v38 = vld [vmem:[#allocation10 + $0x750] sm:$0xff] }
  0xd2   :  { %1509 = vmatpush2.bf16.msra.mxu0 %v1162_v53  ;;  %v705_v53 = vld [vmem:[#allocation10 + $0x5e8] sm:$0xff]  ;;  %v748_v37 = vld [vmem:[#allocation10 + $0x740] sm:$0xff] }
  0xd3   :  { %1524 = vmatpush1.bf16.msra.mxu1 %v1188_v54  ;;  %1560 = vmatprep.subr.bf16.mxu0 %v1225_v58  ;;  %v502_v54 = vpack.c.bf16 %v426_v43, %v426_v43  ;;  %v427_v58 = vcombine.high %v2851_v48, %v2851_v48  ;;  %v1209_v1 = vpack.c.bf16 %v707_v55, %v705_v53  ;;  %v689_v43 = vld [vmem:[#allocation10 + $0x568] sm:$0xff]  ;;  %v766_v55 = vld [vmem:[#allocation10 + $0x7d0] sm:$0xff] }
  0xd4   :  { %1525 = vmatprep.subr.bf16.mxu1 %v1187_v57  ;;  %v719_v57 = vld [vmem:[#allocation10 + $0x658] sm:$0xff] }
  0xd5   :  { %1511 = vmatmul.mubr.bf16.vlgmr.msra.gmra.mxu0 %v499_v2  ;;  %1551 = vmatprep.mubr.bf16.mxu1 %v502_v54  ;;  %v504_v0 = vpack.c.bf16 %v427_v58, %v427_v58  ;;  %v1215_v2 = vpack.c.bf16 %v719_v57, %v717_v56  ;;  %v764_v54 = vld [vmem:[#allocation10 + $0x7c0] sm:$0xff]  ;;  %v685_v56 = vld [vmem:[#allocation10 + $0x548] sm:$0xff]  ;;  %v687_v57 = vld [vmem:[#allocation10 + $0x558] sm:$0xff] }
  0xd6   :  { %1561 = vmatpush1.bf16.msra.mxu0 %v1224_v4  ;;  %v718_v4 = vld [vmem:[#allocation10 + $0x650] sm:$0xff]  ;;  %v761_v58 = vld [vmem:[#allocation10 + $0x7a8] sm:$0xff]  ;;  %v1238_v62 = vpack.c.bf16 %v766_v55, %v764_v54 }
  0xd7   :  { %1526 = vmatpush1.bf16.msra.mxu1 %v1186_v3  ;;  %1562 = vmatprep.subr.bf16.mxu0 %v1223_v9  ;;  %v716_v3 = vld [vmem:[#allocation10 + $0x640] sm:$0xff]  ;;  %v715_v9 = vld [vmem:[#allocation10 + $0x638] sm:$0xff] }
  0xd8   :  { %1527 = vmatprep.subr.bf16.mxu1 %v1185_v7  ;;  %v713_v7 = vld [vmem:[#allocation10 + $0x628] sm:$0xff]  ;;  %1592 = vmatprep.mubr.bf16.mxu0 %v504_v0  ;;  %v1214_v11 = vpack.c.bf16 %v718_v4, %v716_v3  ;;  %v686_v0 = vld [vmem:[#allocation10 + $0x550] sm:$0xff]  ;;  %v760_v3 = vld [vmem:[#allocation10 + $0x7a0] sm:$0xff] }
  0xd9   :  { %v1213_v15 = vpack.c.bf16 %v715_v9, %v713_v7  ;;  %v762_v4 = vld [vmem:[#allocation10 + $0x7b0] sm:$0xff]  ;;  %v757_v7 = vld [vmem:[#allocation10 + $0x788] sm:$0xff]  ;;  %v759_v9 = vld [vmem:[#allocation10 + $0x798] sm:$0xff] }
  0xda   :  { %1563 = vmatpush1.bf16.msra.mxu0 %v1222_v16  ;;  %v714_v16 = vld [vmem:[#allocation10 + $0x630] sm:$0xff] }
  0xdb   :  { %1528 = vmatpush1.bf16.msra.mxu1 %v1184_v34  ;;  %1564 = vmatprep.subr.bf16.mxu0 %v1221_v21  ;;  %v712_v34 = vld [vmem:[#allocation10 + $0x620] sm:$0xff]  ;;  %v1206_v21 = vpack.c.bf16 %v702_v13, %v700_v12  ;;  %v682_v13 = vld [vmem:[#allocation10 + $0x530] sm:$0xff] }
  0xdc   :  { %1529 = vmatprep.subr.bf16.mxu1 %v1183_v20  ;;  %v711_v20 = vld [vmem:[#allocation10 + $0x618] sm:$0xff]  ;;  %v1212_v22 = vpack.c.bf16 %v714_v16, %v712_v34  ;;  %v680_v12 = vld [vmem:[#allocation10 + $0x520] sm:$0xff]  ;;  %v758_v16 = vld [vmem:[#allocation10 + $0x790] sm:$0xff] }
  0xdd   :  { %v1211_v27 = vpack.c.bf16 %v711_v20, %v709_v19  ;;  %v756_v34 = vld [vmem:[#allocation10 + $0x780] sm:$0xff]  ;;  %v753_v19 = vld [vmem:[#allocation10 + $0x768] sm:$0xff]  ;;  %v755_v20 = vld [vmem:[#allocation10 + $0x778] sm:$0xff] }
  0xde   :  { %1565 = vmatpush1.bf16.msra.mxu0 %v1220_v29  ;;  %v710_v29 = vld [vmem:[#allocation10 + $0x610] sm:$0xff] }
  0xdf   :  { %1530 = vmatpush1.bf16.msra.mxu1 %v1182_v28  ;;  %1566 = vmatprep.subr.bf16.mxu0 %v1219_v35  ;;  %v708_v28 = vld [vmem:[#allocation10 + $0x600] sm:$0xff]  ;;  %v1204_v35 = vpack.c.bf16 %v698_v25, %v696_v24  ;;  %v678_v25 = vld [vmem:[#allocation10 + $0x510] sm:$0xff] }
  0xe0   :  { %1531 = vmatprep.subr.bf16.mxu1 %v1181_v30  ;;  %v693_v30 = vld [vmem:[#allocation10 + $0x588] sm:$0xff]  ;;  %v1210_v36 = vpack.c.bf16 %v710_v29, %v708_v28  ;;  %v676_v24 = vld [vmem:[#allocation10 + $0x500] sm:$0xff]  ;;  %v754_v29 = vld [vmem:[#allocation10 + $0x770] sm:$0xff] }
  0xe1   :  { %v1203_v40 = vpack.c.bf16 %v695_v31, %v693_v30  ;;  %v752_v28 = vld [vmem:[#allocation10 + $0x760] sm:$0xff]  ;;  %v749_v30 = vld [vmem:[#allocation10 + $0x748] sm:$0xff]  ;;  %v751_v31 = vld [vmem:[#allocation10 + $0x758] sm:$0xff] }
  0xe2   :  { %1567 = vmatpush1.bf16.msra.mxu0 %v1218_v45  ;;  %v765_v45 = vld [vmem:[#allocation10 + $0x7c8] sm:$0xff] }
  0xe3   :  { %1532 = vmatpush1.bf16.msra.mxu1 %v1180_v44  ;;  %1568 = vmatprep.subr.bf16.mxu0 %v1217_v50  ;;  %v691_v44 = vld [vmem:[#allocation10 + $0x578] sm:$0xff]  ;;  %v688_v50 = vld [vmem:[#allocation10 + $0x560] sm:$0xff]  ;;  %v1239_v53 = vpack.c.bf16 %v767_v46, %v765_v45  ;;  %v797_v45 = vld [vmem:[#allocation10 + $0x8c8] sm:$0xff] }
  0xe4   :  { %1533 = vmatprep.subr.bf16.mxu1 %v1179_v49  ;;  %v1240_v49 = vpack.c.bf16 %v770_v42, %v768_v23  ;;  %v1201_v52 = vpack.c.bf16 %v691_v44, %v689_v43  ;;  %v800_v23 = vld [vmem:[#allocation10 + $0x8e0] sm:$0xff]  ;;  %v802_v42 = vld [vmem:[#allocation10 + $0x8f0] sm:$0xff]  ;;  %v745_v43 = vld [vmem:[#allocation10 + $0x728] sm:$0xff] }
  0xe5   :  { %v747_v44 = vld [vmem:[#allocation10 + $0x738] sm:$0xff] }
  0xe6   :  { %1569 = vmatpush1.bf16.msra.mxu0 %v1216_v61  ;;  %v1200_v61 = vpack.c.bf16 %v690_v51, %v688_v50  ;;  %v799_v46 = vld [vmem:[#allocation10 + $0x8d8] sm:$0xff]  ;;  %v1230_v50 = vpack.c.bf16 %v750_v38, %v748_v37  ;;  %v1256_v51 = vpack.c.bf16 %v802_v42, %v800_v23  ;;  %v1229_v55 = vpack.c.bf16 %v747_v44, %v745_v43  ;;  %v860_v37 = vld [vmem:[#allocation10 + $0xac0] sm:$0xff]  ;;  %v862_v38 = vld [vmem:[#allocation10 + $0xad0] sm:$0xff] }
  0xe7   :  { %1534 = vmatpush1.bf16.msra.mxu1 %v1178_v60  ;;  %1570 = vmatprep.subr.bf16.mxu0 %v1215_v2  ;;  %v763_v60 = vld [vmem:[#allocation10 + $0x7b8] sm:$0xff]  ;;  %v857_v23 = vld [vmem:[#allocation10 + $0xaa8] sm:$0xff]  ;;  %v1286_v44 = vpack.c.bf16 %v862_v38, %v860_v37  ;;  %v840_v38 = vld [vmem:[#allocation10 + $0xa20] sm:$0xff] }
  0xe8   :  { %1535 = vmatprep.subr.bf16.mxu1 %v1209_v1  ;;  %v1199_v1 = vpack.c.bf16 %v687_v57, %v685_v56  ;;  %v1237_v2 = vpack.c.bf16 %v763_v60, %v761_v58  ;;  %v1255_v56 = vpack.c.bf16 %v799_v46, %v797_v45  ;;  %v796_v57 = vld [vmem:[#allocation10 + $0x8c0] sm:$0xff]  ;;  %v798_v58 = vld [vmem:[#allocation10 + $0x8d0] sm:$0xff]  ;;  %v741_v60 = vld [vmem:[#allocation10 + $0x708] sm:$0xff] }
  0xe9   :  { %v859_v42 = vld [vmem:[#allocation10 + $0xab8] sm:$0xff]  ;;  %v780_v45 = vld [vmem:[#allocation10 + $0x840] sm:$0xff]  ;;  %v782_v46 = vld [vmem:[#allocation10 + $0x850] sm:$0xff] }
  0xea   :  { %1571 = vmatpush1.bf16.msra.mxu0 %v1214_v11  ;;  %v1236_v11 = vpack.c.bf16 %v762_v4, %v760_v3  ;;  %v740_v3 = vld [vmem:[#allocation10 + $0x700] sm:$0xff]  ;;  %v742_v4 = vld [vmem:[#allocation10 + $0x710] sm:$0xff] }
  0xeb   :  { %1536 = vmatpush2.bf16.msra.mxu1 %v1208_v10  ;;  %1572 = vmatprep.subr.bf16.mxu0 %v1213_v15  ;;  %v1198_v10 = vpack.c.bf16 %v686_v0, %v684_v63  ;;  %v1235_v15 = vpack.c.bf16 %v759_v9, %v757_v7  ;;  %v792_v9 = vld [vmem:[#allocation10 + $0x8a0] sm:$0xff] }
  0xec   :  { %1537 = vmatprep.subr.bf16.mxu1 %v1207_v14  ;;  %v1197_v14 = vpack.c.bf16 %v683_v6, %v681_v5 }
  0xee   :  { %1573 = vmatpush1.bf16.msra.mxu0 %v1212_v22  ;;  %v1234_v22 = vpack.c.bf16 %v758_v16, %v756_v34  ;;  %v1226_v34 = vpack.c.bf16 %v742_v4, %v740_v3  ;;  %v849_v3 = vld [vmem:[#allocation10 + $0xa68] sm:$0xff]  ;;  %v851_v4 = vld [vmem:[#allocation10 + $0xa78] sm:$0xff] }
  0xef   :  { %1538 = vmatpush2.bf16.msra.mxu1 %v1206_v21  ;;  %1574 = vmatprep.subr.bf16.mxu0 %v1211_v27  ;;  %v1196_v21 = vpack.c.bf16 %v682_v13, %v680_v12  ;;  %v1233_v27 = vpack.c.bf16 %v755_v20, %v753_v19  ;;  %v791_v12 = vld [vmem:[#allocation10 + $0x898] sm:$0xff]  ;;  %v865_v13 = vld [vmem:[#allocation10 + $0xae8] sm:$0xff] }
  0xf0   :  { %1539 = vmatprep.subr.bf16.mxu1 %v1205_v26  ;;  %v1195_v26 = vpack.c.bf16 %v679_v18, %v677_v17  ;;  %v788_v17 = vld [vmem:[#allocation10 + $0x880] sm:$0xff]  ;;  %v790_v18 = vld [vmem:[#allocation10 + $0x890] sm:$0xff] }
  0xf2   :  { %1575 = vmatpush1.bf16.msra.mxu0 %v1210_v36  ;;  %v1232_v36 = vpack.c.bf16 %v754_v29, %v752_v28  ;;  %v503_v29 = vpack.c.bf16 %v2851_v48, %v2851_v48 }
  0xf3   :  { %1540 = vmatpush2.bf16.msra.mxu1 %v1204_v35  ;;  %1576 = vmatprep.subr.bf16.mxu0 %v1241_v41  ;;  %v1194_v35 = vpack.c.bf16 %v678_v25, %v676_v24  ;;  %v1257_v41 = vpack.c.bf16 %v803_v33, %v801_v32  ;;  %v785_v24 = vld [vmem:[#allocation10 + $0x868] sm:$0xff]  ;;  %v787_v25 = vld [vmem:[#allocation10 + $0x878] sm:$0xff]  ;;  %v784_v32 = vld [vmem:[#allocation10 + $0x860] sm:$0xff] }
  0xf4   :  { %1541 = vmatprep.subr.bf16.mxu1 %v1203_v40  ;;  %v1231_v40 = vpack.c.bf16 %v751_v31, %v749_v30  ;;  %v1250_v30 = vpack.c.bf16 %v790_v18, %v788_v17  ;;  %v786_v33 = vld [vmem:[#allocation10 + $0x870] sm:$0xff]  ;;  %v847_v17 = vld [vmem:[#allocation10 + $0xa58] sm:$0xff] }
  0xf5   :  { %v1248_v48 = vpack.c.bf16 %v786_v33, %v784_v32  ;;  %v828_v33 = vld [vmem:[#allocation10 + $0x9c0] sm:$0xff] }
  0xf6   :  { %1577 = vmatpush2.bf16.msra.mxu0 %v1240_v49  ;;  %v386_v49 = vld [vmem:[#allocation8 + $0x10] sm:$0xff] }
  0xf7   :  { %1542 = vmatpush2.bf16.msra.mxu1 %v1202_v47  ;;  %1578 = vmatprep.subr.bf16.mxu0 %v1239_v53  ;;  %v501_v47 = vpack.c.bf16 %v2846_v39, %v2846_v39  ;;  %v746_v53 = vld [vmem:[#allocation10 + $0x730] sm:$0xff]  ;;  %v2858_v54 = vrot.slane %v386_v49, %v2829_v8  ;;  %v795_v39 = vld [vmem:[#allocation10 + $0x8b8] sm:$0xff]  ;;  %v428_v0 = vcombine.high %v386_v49, %v386_v49 }
  0xf8   :  { %1543 = vmatprep.subr.bf16.mxu1 %v1201_v52  ;;  %v744_v52 = vld [vmem:[#allocation10 + $0x720] sm:$0xff]  ;;  %v1285_v49 = vpack.c.bf16 %v859_v42, %v857_v23  ;;  %v827_v23 = vld [vmem:[#allocation10 + $0x9b8] sm:$0xff]  ;;  %v837_v42 = vld [vmem:[#allocation10 + $0xa08] sm:$0xff] }
  0xf9   :  { %v443_v63 = vcombine.high %v2858_v54, %v2858_v54 }
  0xfa   :  { %1579 = vmatpush2.bf16.msra.mxu0 %v1238_v62  ;;  %v793_v62 = vld [vmem:[#allocation10 + $0x8a8] sm:$0xff] }
  0xfb   :  { %1544 = vmatpush2.bf16.msra.mxu1 %v1200_v61  ;;  %1580 = vmatprep.subr.bf16.mxu0 %v1237_v2  ;;  %v743_v61 = vld [vmem:[#allocation10 + $0x718] sm:$0xff]  ;;  %v1254_v2 = vpack.c.bf16 %v798_v58, %v796_v57  ;;  %v506_v5 = vpack.c.bf16 %v443_v63, %v443_v63  ;;  %v1253_v7 = vpack.c.bf16 %v795_v39, %v793_v62  ;;  %v852_v63 = vld [vmem:[#allocation10 + $0xa80] sm:$0xff] }
  0xfc   :  { %1545 = vmatprep.subr.bf16.mxu1 %v1199_v1  ;;  %v1228_v1 = vpack.c.bf16 %v746_v53, %v744_v52  ;;  %v1227_v6 = vpack.c.bf16 %v743_v61, %v741_v60  ;;  %v777_v52 = vld [vmem:[#allocation10 + $0x828] sm:$0xff]  ;;  %v779_v53 = vld [vmem:[#allocation10 + $0x838] sm:$0xff]  ;;  %v1246_v57 = vpack.c.bf16 %v782_v46, %v780_v45  ;;  %v776_v60 = vld [vmem:[#allocation10 + $0x820] sm:$0xff] }
  0xfd   :  { %v778_v61 = vld [vmem:[#allocation10 + $0x830] sm:$0xff]  ;;  %v1245_v62 = vpack.c.bf16 %v779_v53, %v777_v52  ;;  %v824_v45 = vld [vmem:[#allocation10 + $0x9a0] sm:$0xff]  ;;  %v821_v52 = vld [vmem:[#allocation10 + $0x988] sm:$0xff] }
  0xfe   :  { %1581 = vmatpush2.bf16.msra.mxu0 %v1236_v11  ;;  %v789_v11 = vld [vmem:[#allocation10 + $0x888] sm:$0xff]  ;;  %v826_v46 = vld [vmem:[#allocation10 + $0x9b0] sm:$0xff]  ;;  %v823_v53 = vld [vmem:[#allocation10 + $0x998] sm:$0xff] }
  0xff   :  { %1546 = vmatpush2.bf16.msra.mxu1 %v1198_v10  ;;  %1582 = vmatprep.subr.bf16.mxu0 %v1235_v15  ;;  %v794_v10 = vld [vmem:[#allocation10 + $0x8b0] sm:$0xff]  ;;  %v2863_v15 = vrot.slane %v428_v0, %v2829_v8  ;;  %v1251_v19 = vpack.c.bf16 %v791_v12, %v789_v11  ;;  %v1281_v11 = vpack.c.bf16 %v851_v4, %v849_v3  ;;  %v848_v12 = vld [vmem:[#allocation10 + $0xa60] sm:$0xff]  ;;  %v893_v3 = vld [vmem:[#allocation10 + $0xbc8] sm:$0xff] }
 0x100   :  { %1547 = vmatprep.subr.bf16.mxu1 %v1197_v14  ;;  %v867_v14 = vld [vmem:[#allocation10 + $0xaf8] sm:$0xff]  ;;  %v1252_v16 = vpack.c.bf16 %v794_v10, %v792_v9  ;;  %v854_v0 = vld [vmem:[#allocation10 + $0xa90] sm:$0xff] }
 0x101   :  { %v1289_v20 = vpack.c.bf16 %v867_v14, %v865_v13  ;;  %v444_v28 = vcombine.high %v2863_v15, %v2863_v15  ;;  %v774_v9 = vld [vmem:[#allocation10 + $0x810] sm:$0xff]  ;;  %v833_v14 = vld [vmem:[#allocation10 + $0x9e8] sm:$0xff]  ;;  %v895_v4 = vld [vmem:[#allocation10 + $0xbd8] sm:$0xff] }
 0x102   :  { %1583 = vmatpush2.bf16.msra.mxu0 %v1234_v22  ;;  %v866_v22 = vld [vmem:[#allocation10 + $0xaf0] sm:$0xff] }
 0x103   :  { %1548 = vmatpush2.bf16.msra.mxu1 %v1196_v21  ;;  %1584 = vmatprep.subr.bf16.mxu0 %v1233_v27  ;;  %v864_v21 = vld [vmem:[#allocation10 + $0xae0] sm:$0xff]  ;;  %v863_v27 = vld [vmem:[#allocation10 + $0xad8] sm:$0xff]  ;;  %v508_v43 = vpack.c.bf16 %v444_v28, %v444_v28  ;;  %v850_v13 = vld [vmem:[#allocation10 + $0xa70] sm:$0xff] }
 0x104   :  { %1549 = vmatprep.subr.bf16.mxu1 %v1195_v26  ;;  %v861_v26 = vld [vmem:[#allocation10 + $0xac8] sm:$0xff]  ;;  %v1288_v31 = vpack.c.bf16 %v866_v22, %v864_v21  ;;  %v834_v21 = vld [vmem:[#allocation10 + $0x9f0] sm:$0xff]  ;;  %v831_v28 = vld [vmem:[#allocation10 + $0x9d8] sm:$0xff] }
 0x106   :  { %1585 = vmatpush2.bf16.msra.mxu0 %v1232_v36  ;;  %v1287_v36 = vpack.c.bf16 %v863_v27, %v861_v26  ;;  %v846_v26 = vld [vmem:[#allocation10 + $0xa50] sm:$0xff]  ;;  %v829_v27 = vld [vmem:[#allocation10 + $0x9c8] sm:$0xff] }
 0x107   :  { %1550 = vmatpush2.bf16.msra.mxu1 %v1194_v35  ;;  %1586 = vmatprep.subr.bf16.mxu0 %v1231_v40  ;;  %v1249_v35 = vpack.c.bf16 %v787_v25, %v785_v24  ;;  %v781_v40 = vld [vmem:[#allocation10 + $0x848] sm:$0xff]  ;;  %v844_v25 = vld [vmem:[#allocation10 + $0xa40] sm:$0xff] }
 0x108   :  { %1601 = vmatprep.subr.bf16.mxu1 %v1257_v41  ;;  %v783_v41 = vld [vmem:[#allocation10 + $0x858] sm:$0xff]  ;;  %v1278_v32 = vpack.c.bf16 %v846_v26, %v844_v25  ;;  %v888_v25 = vld [vmem:[#allocation10 + $0xba0] sm:$0xff]  ;;  %v890_v26 = vld [vmem:[#allocation10 + $0xbb0] sm:$0xff] }
 0x10a   :  { %1552 = vmatmul.mubr.bf16.vlgmr.msra.gmra.mxu1 %v501_v47  ;;  %1587 = vmatpush2.bf16.msra.mxu0 %v1230_v50  ;;  %v1247_v47 = vpack.c.bf16 %v783_v41, %v781_v40  ;;  %v856_v50 = vld [vmem:[#allocation10 + $0xaa0] sm:$0xff]  ;;  %v842_v40 = vld [vmem:[#allocation10 + $0xa30] sm:$0xff]  ;;  %v825_v41 = vld [vmem:[#allocation10 + $0x9a8] sm:$0xff] }
 0x10b   :  { %1602 = vmatpush1.bf16.msra.mxu1 %v1256_v51  ;;  %1588 = vmatprep.subr.bf16.mxu0 %v1229_v55  ;;  %v858_v51 = vld [vmem:[#allocation10 + $0xab0] sm:$0xff]  ;;  %v853_v55 = vld [vmem:[#allocation10 + $0xa88] sm:$0xff] }
 0x10c   :  { %1603 = vmatprep.subr.bf16.mxu1 %v1255_v56  ;;  %1633 = vmatprep.mubr.bf16.mxu1 %v506_v5  ;;  %v855_v56 = vld [vmem:[#allocation10 + $0xa98] sm:$0xff]  ;;  %v1284_v58 = vpack.c.bf16 %v858_v51, %v856_v50  ;;  %v1244_v5 = vpack.c.bf16 %v778_v61, %v776_v60  ;;  %v836_v50 = vld [vmem:[#allocation10 + $0xa00] sm:$0xff]  ;;  %v838_v51 = vld [vmem:[#allocation10 + $0xa10] sm:$0xff] }
 0x10d   :  { %v1283_v39 = vpack.c.bf16 %v855_v56, %v853_v55  ;;  %v897_v55 = vld [vmem:[#allocation10 + $0xbe8] sm:$0xff]  ;;  %v899_v56 = vld [vmem:[#allocation10 + $0xbf8] sm:$0xff]  ;;  %v820_v60 = vld [vmem:[#allocation10 + $0x980] sm:$0xff] }
 0x10e   :  { %1589 = vmatpush2.bf16.msra.mxu0 %v1228_v1  ;;  %v773_v1 = vld [vmem:[#allocation10 + $0x808] sm:$0xff]  ;;  %v822_v61 = vld [vmem:[#allocation10 + $0x990] sm:$0xff] }
 0x10f   :  { %1604 = vmatpush1.bf16.msra.mxu1 %v1254_v2  ;;  %1590 = vmatprep.subr.bf16.mxu0 %v1227_v6  ;;  %v775_v2 = vld [vmem:[#allocation10 + $0x818] sm:$0xff]  ;;  %v1282_v6 = vpack.c.bf16 %v854_v0, %v852_v63  ;;  %v896_v63 = vld [vmem:[#allocation10 + $0xbe0] sm:$0xff]  ;;  %v898_v0 = vld [vmem:[#allocation10 + $0xbf0] sm:$0xff] }
 0x110   :  { %1605 = vmatprep.subr.bf16.mxu1 %v1253_v7  ;;  %v772_v7 = vld [vmem:[#allocation10 + $0x800] sm:$0xff]  ;;  %v1243_v10 = vpack.c.bf16 %v775_v2, %v773_v1  ;;  %v817_v1 = vld [vmem:[#allocation10 + $0x968] sm:$0xff]  ;;  %v819_v2 = vld [vmem:[#allocation10 + $0x978] sm:$0xff] }
 0x111   :  { %v1242_v18 = vpack.c.bf16 %v774_v9, %v772_v7  ;;  %v816_v7 = vld [vmem:[#allocation10 + $0x960] sm:$0xff]  ;;  %v818_v9 = vld [vmem:[#allocation10 + $0x970] sm:$0xff] }
 0x112   :  { %1591 = vmatpush2.bf16.msra.mxu0 %v1226_v34  ;;  %v835_v34 = vld [vmem:[#allocation10 + $0x9f8] sm:$0xff] }
 0x113   :  { %1606 = vmatpush1.bf16.msra.mxu1 %v1252_v16  ;;  %1642 = vmatprep.subr.bf16.mxu0 %v1289_v20  ;;  %v845_v16 = vld [vmem:[#allocation10 + $0xa48] sm:$0xff]  ;;  %v832_v20 = vld [vmem:[#allocation10 + $0x9e0] sm:$0xff]  ;;  %v1273_v22 = vpack.c.bf16 %v835_v34, %v833_v14  ;;  %v815_v34 = vld [vmem:[#allocation10 + $0x958] sm:$0xff] }
 0x114   :  { %1607 = vmatprep.subr.bf16.mxu1 %v1251_v19  ;;  %v1280_v19 = vpack.c.bf16 %v850_v13, %v848_v12  ;;  %v1279_v24 = vpack.c.bf16 %v847_v17, %v845_v16  ;;  %v892_v12 = vld [vmem:[#allocation10 + $0xbc0] sm:$0xff]  ;;  %v894_v13 = vld [vmem:[#allocation10 + $0xbd0] sm:$0xff]  ;;  %v813_v14 = vld [vmem:[#allocation10 + $0x948] sm:$0xff] }
 0x115   :  { %1593 = vmatmul.mubr.bf16.vlgmr.msra.gmra.mxu0 %v503_v29  ;;  %v841_v29 = vld [vmem:[#allocation10 + $0xa28] sm:$0xff]  ;;  %v891_v17 = vld [vmem:[#allocation10 + $0xbb8] sm:$0xff] }
 0x116   :  { %1643 = vmatpush1.bf16.msra.mxu0 %v1288_v31  ;;  %1674 = vmatprep.mubr.bf16.mxu0 %v508_v43  ;;  %v1272_v31 = vpack.c.bf16 %v834_v21, %v832_v20  ;;  %v839_v43 = vld [vmem:[#allocation10 + $0xa18] sm:$0xff]  ;;  %v889_v16 = vld [vmem:[#allocation10 + $0xba8] sm:$0xff]  ;;  %v812_v20 = vld [vmem:[#allocation10 + $0x940] sm:$0xff] }
 0x117   :  { %1608 = vmatpush1.bf16.msra.mxu1 %v1250_v30  ;;  %1644 = vmatprep.subr.bf16.mxu0 %v1287_v36  ;;  %v843_v30 = vld [vmem:[#allocation10 + $0xa38] sm:$0xff]  ;;  %v1271_v36 = vpack.c.bf16 %v831_v28, %v829_v27  ;;  %v814_v21 = vld [vmem:[#allocation10 + $0x950] sm:$0xff]  ;;  %v809_v27 = vld [vmem:[#allocation10 + $0x928] sm:$0xff] }
 0x118   :  { %1609 = vmatprep.subr.bf16.mxu1 %v1249_v35  ;;  %v830_v35 = vld [vmem:[#allocation10 + $0x9d0] sm:$0xff]  ;;  %v1277_v37 = vpack.c.bf16 %v843_v30, %v841_v29  ;;  %v811_v28 = vld [vmem:[#allocation10 + $0x938] sm:$0xff]  ;;  %v885_v29 = vld [vmem:[#allocation10 + $0xb88] sm:$0xff] }
 0x119   :  { %v887_v30 = vld [vmem:[#allocation10 + $0xb98] sm:$0xff] }
 0x11a   :  { %1645 = vmatpush1.bf16.msra.mxu0 %v1286_v44  ;;  %v1276_v44 = vpack.c.bf16 %v842_v40, %v840_v38  ;;  %v884_v38 = vld [vmem:[#allocation10 + $0xb80] sm:$0xff]  ;;  %v886_v40 = vld [vmem:[#allocation10 + $0xb90] sm:$0xff] }
 0x11b   :  { %1610 = vmatpush1.bf16.msra.mxu1 %v1248_v48  ;;  %1646 = vmatprep.subr.bf16.mxu0 %v1285_v49  ;;  %v1270_v48 = vpack.c.bf16 %v830_v35, %v828_v33  ;;  %v1275_v49 = vpack.c.bf16 %v839_v43, %v837_v42  ;;  %v808_v33 = vld [vmem:[#allocation10 + $0x920] sm:$0xff]  ;;  %v810_v35 = vld [vmem:[#allocation10 + $0x930] sm:$0xff]  ;;  %v881_v42 = vld [vmem:[#allocation10 + $0xb68] sm:$0xff] }
 0x11c   :  { %1611 = vmatprep.subr.bf16.mxu1 %v1247_v47  ;;  %v1269_v47 = vpack.c.bf16 %v827_v23, %v825_v41  ;;  %v805_v41 = vld [vmem:[#allocation10 + $0x908] sm:$0xff]  ;;  %v807_v23 = vld [vmem:[#allocation10 + $0x918] sm:$0xff] }
 0x11d   :  { %v883_v43 = vld [vmem:[#allocation10 + $0xb78] sm:$0xff] }
 0x11e   :  { %1647 = vmatpush1.bf16.msra.mxu0 %v1284_v58  ;;  %v1274_v58 = vpack.c.bf16 %v838_v51, %v836_v50  ;;  %v1297_v50 = vpack.c.bf16 %v883_v43, %v881_v42  ;;  %v880_v51 = vld [vmem:[#allocation10 + $0xb60] sm:$0xff] }
 0x11f   :  { %1612 = vmatpush1.bf16.msra.mxu1 %v1246_v57  ;;  %1648 = vmatprep.subr.bf16.mxu0 %v1283_v39  ;;  %v1268_v57 = vpack.c.bf16 %v826_v46, %v824_v45  ;;  %v1305_v39 = vpack.c.bf16 %v899_v56, %v897_v55  ;;  %v1298_v45 = vpack.c.bf16 %v886_v40, %v884_v38  ;;  %v804_v46 = vld [vmem:[#allocation10 + $0x900] sm:$0xff]  ;;  %v879_v55 = vld [vmem:[#allocation10 + $0xb58] sm:$0xff]  ;;  %v929_v56 = vld [vmem:[#allocation10 + $0xce8] sm:$0xff] }
 0x120   :  { %1613 = vmatprep.subr.bf16.mxu1 %v1245_v62  ;;  %v1267_v62 = vpack.c.bf16 %v823_v53, %v821_v52  ;;  %v882_v52 = vld [vmem:[#allocation10 + $0xb70] sm:$0xff]  ;;  %v877_v53 = vld [vmem:[#allocation10 + $0xb48] sm:$0xff] }
 0x122   :  { %1649 = vmatpush1.bf16.msra.mxu0 %v1282_v6  ;;  %v1304_v6 = vpack.c.bf16 %v898_v0, %v896_v63  ;;  %v1295_v63 = vpack.c.bf16 %v879_v55, %v877_v53  ;;  %v912_v55 = vld [vmem:[#allocation10 + $0xc60] sm:$0xff] }
 0x123   :  { %1614 = vmatpush1.bf16.msra.mxu1 %v1244_v5  ;;  %1650 = vmatprep.subr.bf16.mxu0 %v1281_v11  ;;  %v1266_v5 = vpack.c.bf16 %v822_v61, %v820_v60  ;;  %v1303_v11 = vpack.c.bf16 %v895_v4, %v893_v3  ;;  %v1296_v61 = vpack.c.bf16 %v882_v52, %v880_v51  ;;  %v873_v3 = vld [vmem:[#allocation10 + $0xb28] sm:$0xff]  ;;  %v875_v4 = vld [vmem:[#allocation10 + $0xb38] sm:$0xff] }
 0x124   :  { %1615 = vmatprep.subr.bf16.mxu1 %v1243_v10  ;;  %v1265_v10 = vpack.c.bf16 %v819_v2, %v817_v1  ;;  %v928_v1 = vld [vmem:[#allocation10 + $0xce0] sm:$0xff]  ;;  %v930_v2 = vld [vmem:[#allocation10 + $0xcf0] sm:$0xff]  ;;  %v507_v51 = vpack.c.bf16 %v2863_v15, %v2863_v15 }
 0x126   :  { %1651 = vmatpush1.bf16.msra.mxu0 %v1280_v19  ;;  %v1302_v19 = vpack.c.bf16 %v894_v13, %v892_v12  ;;  %v872_v12 = vld [vmem:[#allocation10 + $0xb20] sm:$0xff]  ;;  %v874_v13 = vld [vmem:[#allocation10 + $0xb30] sm:$0xff] }
 0x127   :  { %1616 = vmatpush1.bf16.msra.mxu1 %v1242_v18  ;;  %1652 = vmatprep.subr.bf16.mxu0 %v1279_v24  ;;  %v1264_v18 = vpack.c.bf16 %v818_v9, %v816_v7  ;;  %v1301_v24 = vpack.c.bf16 %v891_v17, %v889_v16  ;;  %v505_v9 = vpack.c.bf16 %v2858_v54, %v2858_v54  ;;  %v924_v16 = vld [vmem:[#allocation10 + $0xcc0] sm:$0xff]  ;;  %v926_v17 = vld [vmem:[#allocation10 + $0xcd0] sm:$0xff] }
 0x128   :  { %1617 = vmatprep.subr.bf16.mxu1 %v1273_v22  ;;  %v1263_v22 = vpack.c.bf16 %v815_v34, %v813_v14  ;;  %v1293_v14 = vpack.c.bf16 %v875_v4, %v873_v3 }
 0x12a   :  { %1653 = vmatpush1.bf16.msra.mxu0 %v1278_v32  ;;  %v1300_v32 = vpack.c.bf16 %v890_v26, %v888_v25  ;;  %v1318_v25 = vpack.c.bf16 %v926_v17, %v924_v16  ;;  %v868_v26 = vld [vmem:[#allocation10 + $0xb00] sm:$0xff]  ;;  %v983_v16 = vld [vmem:[#allocation10 + $0xe98] sm:$0xff] }
 0x12b   :  { %1618 = vmatpush2.bf16.msra.mxu1 %v1272_v31  ;;  %1654 = vmatprep.subr.bf16.mxu0 %v1277_v37  ;;  %v1262_v31 = vpack.c.bf16 %v814_v21, %v812_v20  ;;  %v1299_v37 = vpack.c.bf16 %v887_v30, %v885_v29  ;;  %v921_v20 = vld [vmem:[#allocation10 + $0xca8] sm:$0xff]  ;;  %v923_v21 = vld [vmem:[#allocation10 + $0xcb8] sm:$0xff]  ;;  %v920_v30 = vld [vmem:[#allocation10 + $0xca0] sm:$0xff] }
 0x12c   :  { %1619 = vmatprep.subr.bf16.mxu1 %v1271_v36  ;;  %v1261_v36 = vpack.c.bf16 %v811_v28, %v809_v27  ;;  %v870_v27 = vld [vmem:[#allocation10 + $0xb10] sm:$0xff]  ;;  %v1317_v29 = vpack.c.bf16 %v923_v21, %v921_v20 }
 0x12d   :  { %v1290_v38 = vpack.c.bf16 %v870_v27, %v868_v26  ;;  %v980_v27 = vld [vmem:[#allocation10 + $0xe80] sm:$0xff] }
 0x12e   :  { %1655 = vmatpush1.bf16.msra.mxu0 %v1276_v44  ;;  %v1260_v44 = vpack.c.bf16 %v810_v35, %v808_v33  ;;  %v919_v33 = vld [vmem:[#allocation10 + $0xc98] sm:$0xff]  ;;  %v993_v35 = vld [vmem:[#allocation10 + $0xee8] sm:$0xff] }
 0x12f   :  { %1620 = vmatpush2.bf16.msra.mxu1 %v1270_v48  ;;  %1656 = vmatprep.subr.bf16.mxu0 %v1275_v49  ;;  %v2869_v48 = vld [vmem:[#allocation8 + $0x18] sm:$0xff]  ;;  %v1259_v49 = vpack.c.bf16 %v807_v23, %v805_v41  ;;  %v916_v41 = vld [vmem:[#allocation10 + $0xc80] sm:$0xff] }
 0x130   :  { %1621 = vmatprep.subr.bf16.mxu1 %v1269_v47  ;;  %v806_v47 = vld [vmem:[#allocation10 + $0x910] sm:$0xff]  ;;  %v445_v54 = vcombine.high %v2869_v48, %v2869_v48 }
 0x131   :  { %v1258_v60 = vpack.c.bf16 %v806_v47, %v804_v46  ;;  %v918_v23 = vld [vmem:[#allocation10 + $0xc90] sm:$0xff]  ;;  %v915_v46 = vld [vmem:[#allocation10 + $0xc78] sm:$0xff]  ;;  %v989_v47 = vld [vmem:[#allocation10 + $0xec8] sm:$0xff] }
 0x132   :  { %1657 = vmatpush1.bf16.msra.mxu0 %v1274_v58  ;;  %v2873_v58 = vrot.slane %v2869_v48, %v2829_v8  ;;  %v992_v48 = vld [vmem:[#allocation10 + $0xee0] sm:$0xff]  ;;  %v1314_v52 = vpack.c.bf16 %v918_v23, %v916_v41 }
 0x133   :  { %1622 = vmatpush2.bf16.msra.mxu1 %v1268_v57  ;;  %1658 = vmatprep.subr.bf16.mxu0 %v1305_v39  ;;  %v931_v57 = vld [vmem:[#allocation10 + $0xcf8] sm:$0xff]  ;;  %v878_v39 = vld [vmem:[#allocation10 + $0xb50] sm:$0xff]  ;;  %v900_v23 = vld [vmem:[#allocation10 + $0xc00] sm:$0xff] }
 0x134   :  { %1623 = vmatprep.subr.bf16.mxu1 %v1267_v62  ;;  %v876_v62 = vld [vmem:[#allocation10 + $0xb40] sm:$0xff]  ;;  %v1321_v0 = vpack.c.bf16 %v931_v57, %v929_v56  ;;  %v460_v7 = vcombine.high %v2873_v58, %v2873_v58  ;;  %v914_v56 = vld [vmem:[#allocation10 + $0xc70] sm:$0xff] }
 0x135   :  { %v1312_v15 = vpack.c.bf16 %v914_v56, %v912_v55 }
 0x136   :  { %1659 = vmatpush2.bf16.msra.mxu0 %v1304_v6  ;;  %v927_v6 = vld [vmem:[#allocation10 + $0xcd8] sm:$0xff] }
 0x137   :  { %1624 = vmatpush2.bf16.msra.mxu1 %v1266_v5  ;;  %1660 = vmatprep.subr.bf16.mxu0 %v1303_v11  ;;  %v925_v5 = vld [vmem:[#allocation10 + $0xcc8] sm:$0xff]  ;;  %v1320_v11 = vpack.c.bf16 %v930_v2, %v928_v1  ;;  %v987_v1 = vld [vmem:[#allocation10 + $0xeb8] sm:$0xff] }
 0x138   :  { %1625 = vmatprep.subr.bf16.mxu1 %v1265_v10  ;;  %v1294_v10 = vpack.c.bf16 %v878_v39, %v876_v62  ;;  %v1319_v34 = vpack.c.bf16 %v927_v6, %v925_v5  ;;  %v990_v62 = vld [vmem:[#allocation10 + $0xed0] sm:$0xff]  ;;  %v909_v39 = vld [vmem:[#allocation10 + $0xc48] sm:$0xff]  ;;  %v908_v5 = vld [vmem:[#allocation10 + $0xc40] sm:$0xff] }
 0x139   :  { %v910_v6 = vld [vmem:[#allocation10 + $0xc50] sm:$0xff] }
 0x13a   :  { %1661 = vmatpush2.bf16.msra.mxu0 %v1302_v19  ;;  %v871_v19 = vld [vmem:[#allocation10 + $0xb18] sm:$0xff]  ;;  %v1310_v21 = vpack.c.bf16 %v910_v6, %v908_v5 }
 0x13b   :  { %1626 = vmatpush2.bf16.msra.mxu1 %v1264_v18  ;;  %1662 = vmatprep.subr.bf16.mxu0 %v1301_v24  ;;  %v869_v18 = vld [vmem:[#allocation10 + $0xb08] sm:$0xff]  ;;  %v1292_v24 = vpack.c.bf16 %v874_v13, %v872_v12  ;;  %v986_v12 = vld [vmem:[#allocation10 + $0xeb0] sm:$0xff] }
 0x13c   :  { %1627 = vmatprep.subr.bf16.mxu1 %v1263_v22  ;;  %v510_v22 = vpack.c.bf16 %v460_v7, %v460_v7  ;;  %v1291_v28 = vpack.c.bf16 %v871_v19, %v869_v18  ;;  %v905_v13 = vld [vmem:[#allocation10 + $0xc28] sm:$0xff] }
 0x13e   :  { %1663 = vmatpush2.bf16.msra.mxu0 %v1300_v32  ;;  %v917_v32 = vld [vmem:[#allocation10 + $0xc88] sm:$0xff] }
 0x13f   :  { %1628 = vmatpush2.bf16.msra.mxu1 %v1262_v31  ;;  %1664 = vmatprep.subr.bf16.mxu0 %v1299_v37  ;;  %v922_v31 = vld [vmem:[#allocation10 + $0xcb0] sm:$0xff]  ;;  %v2882_v37 = vrot.slane %v445_v54, %v2829_v8  ;;  %v1315_v42 = vpack.c.bf16 %v919_v33, %v917_v32  ;;  %v904_v54 = vld [vmem:[#allocation10 + $0xc20] sm:$0xff]  ;;  %v977_v32 = vld [vmem:[#allocation10 + $0xe68] sm:$0xff] }
 0x140   :  { %1629 = vmatprep.subr.bf16.mxu1 %v1261_v36  ;;  %v995_v36 = vld [vmem:[#allocation10 + $0xef8] sm:$0xff]  ;;  %v1316_v40 = vpack.c.bf16 %v922_v31, %v920_v30 }
 0x141   :  { %v1353_v43 = vpack.c.bf16 %v995_v36, %v993_v35  ;;  %v903_v31 = vld [vmem:[#allocation10 + $0xc18] sm:$0xff] }
 0x142   :  { %1665 = vmatpush2.bf16.msra.mxu0 %v1298_v45  ;;  %v913_v45 = vld [vmem:[#allocation10 + $0xc68] sm:$0xff]  ;;  %v979_v33 = vld [vmem:[#allocation10 + $0xe78] sm:$0xff] }
 0x143   :  { %1630 = vmatpush2.bf16.msra.mxu1 %v1260_v44  ;;  %1666 = vmatprep.subr.bf16.mxu0 %v1297_v50  ;;  %v994_v44 = vld [vmem:[#allocation10 + $0xef0] sm:$0xff]  ;;  %v461_v50 = vcombine.high %v2882_v37, %v2882_v37  ;;  %v1313_v57 = vpack.c.bf16 %v915_v46, %v913_v45  ;;  %v961_v46 = vld [vmem:[#allocation10 + $0xde8] sm:$0xff] }
 0x144   :  { %1631 = vmatprep.subr.bf16.mxu1 %v1259_v49  ;;  %v991_v49 = vld [vmem:[#allocation10 + $0xed8] sm:$0xff]  ;;  %v1352_v53 = vpack.c.bf16 %v994_v44, %v992_v48  ;;  %v1345_v48 = vpack.c.bf16 %v979_v33, %v977_v32  ;;  %v976_v44 = vld [vmem:[#allocation10 + $0xe60] sm:$0xff]  ;;  %v978_v45 = vld [vmem:[#allocation10 + $0xe70] sm:$0xff] }
 0x145   :  { %v512_v2 = vpack.c.bf16 %v461_v50, %v461_v50  ;;  %v973_v50 = vld [vmem:[#allocation10 + $0xe48] sm:$0xff]  ;;  %v1344_v56 = vpack.c.bf16 %v978_v45, %v976_v44  ;;  %v964_v33 = vld [vmem:[#allocation10 + $0xe00] sm:$0xff] }
 0x146   :  { %1667 = vmatpush2.bf16.msra.mxu0 %v1296_v61  ;;  %v988_v61 = vld [vmem:[#allocation10 + $0xec0] sm:$0xff] }
 0x147   :  { %1632 = vmatpush2.bf16.msra.mxu1 %v1258_v60  ;;  %1668 = vmatprep.subr.bf16.mxu0 %v1295_v63  ;;  %v1351_v60 = vpack.c.bf16 %v991_v49, %v989_v47  ;;  %v911_v63 = vld [vmem:[#allocation10 + $0xc58] sm:$0xff]  ;;  %v1350_v4 = vpack.c.bf16 %v990_v62, %v988_v61 }
 0x148   :  { %1683 = vmatprep.subr.bf16.mxu1 %v1321_v0  ;;  %v985_v0 = vld [vmem:[#allocation10 + $0xea8] sm:$0xff]  ;;  %v963_v49 = vld [vmem:[#allocation10 + $0xdf8] sm:$0xff] }
 0x149   :  { %v1337_v61 = vpack.c.bf16 %v963_v49, %v961_v46  ;;  %v948_v46 = vld [vmem:[#allocation10 + $0xd80] sm:$0xff]  ;;  %v950_v49 = vld [vmem:[#allocation10 + $0xd90] sm:$0xff] }
 0x14a   :  { %1634 = vmatmul.mubr.bf16.vlgmr.msra.gmra.mxu1 %v505_v9  ;;  %1669 = vmatpush2.bf16.msra.mxu0 %v1294_v10  ;;  %v1311_v9 = vpack.c.bf16 %v911_v63, %v909_v39  ;;  %v1349_v10 = vpack.c.bf16 %v987_v1, %v985_v0  ;;  %v972_v39 = vld [vmem:[#allocation10 + $0xe40] sm:$0xff]  ;;  %v974_v63 = vld [vmem:[#allocation10 + $0xe50] sm:$0xff]  ;;  %v957_v0 = vld [vmem:[#allocation10 + $0xdc8] sm:$0xff] }
 0x14b   :  { %1684 = vmatpush1.bf16.msra.mxu1 %v1320_v11  ;;  %1670 = vmatprep.subr.bf16.mxu0 %v1293_v14  ;;  %v984_v11 = vld [vmem:[#allocation10 + $0xea0] sm:$0xff]  ;;  %v907_v14 = vld [vmem:[#allocation10 + $0xc38] sm:$0xff] }
 0x14c   :  { %1685 = vmatprep.subr.bf16.mxu1 %v1319_v34  ;;  %1715 = vmatprep.mubr.bf16.mxu1 %v510_v22  ;;  %v981_v34 = vld [vmem:[#allocation10 + $0xe88] sm:$0xff]  ;;  %v1348_v22 = vpack.c.bf16 %v986_v12, %v984_v11  ;;  %v1342_v11 = vpack.c.bf16 %v974_v63, %v972_v39  ;;  %v956_v12 = vld [vmem:[#allocation10 + $0xdc0] sm:$0xff]  ;;  %v1330_v39 = vpack.c.bf16 %v950_v49, %v948_v46  ;;  %v1010_v49 = vld [vmem:[#allocation10 + $0xf70] sm:$0xff] }
 0x14d   :  { %v1347_v26 = vpack.c.bf16 %v983_v16, %v981_v34  ;;  %v968_v16 = vld [vmem:[#allocation10 + $0xe20] sm:$0xff] }
 0x14e   :  { %1671 = vmatpush2.bf16.msra.mxu0 %v1292_v24  ;;  %v906_v24 = vld [vmem:[#allocation10 + $0xc30] sm:$0xff] }
 0x14f   :  { %1686 = vmatpush1.bf16.msra.mxu1 %v1318_v25  ;;  %1672 = vmatprep.subr.bf16.mxu0 %v1291_v28  ;;  %v1309_v25 = vpack.c.bf16 %v907_v14, %v905_v13  ;;  %v982_v28 = vld [vmem:[#allocation10 + $0xe90] sm:$0xff] }
 0x150   :  { %1687 = vmatprep.subr.bf16.mxu1 %v1317_v29  ;;  %v901_v29 = vld [vmem:[#allocation10 + $0xc08] sm:$0xff]  ;;  %v1346_v41 = vpack.c.bf16 %v982_v28, %v980_v27  ;;  %v958_v13 = vld [vmem:[#allocation10 + $0xdd0] sm:$0xff] }
 0x151   :  { %v1334_v27 = vpack.c.bf16 %v958_v13, %v956_v12  ;;  %v1019_v12 = vld [vmem:[#allocation10 + $0xfb8] sm:$0xff] }
 0x152   :  { %1673 = vmatpush2.bf16.msra.mxu0 %v1290_v38 }
 0x153   :  { %1688 = vmatpush1.bf16.msra.mxu1 %v1316_v40  ;;  %1724 = vmatprep.subr.bf16.mxu0 %v1353_v43  ;;  %v1308_v40 = vpack.c.bf16 %v906_v24, %v904_v54  ;;  %v1307_v43 = vpack.c.bf16 %v903_v31, %v901_v29  ;;  %v967_v54 = vld [vmem:[#allocation10 + $0xe18] sm:$0xff]  ;;  %v952_v29 = vld [vmem:[#allocation10 + $0xda0] sm:$0xff] }
 0x154   :  { %1689 = vmatprep.subr.bf16.mxu1 %v1315_v42  ;;  %v902_v42 = vld [vmem:[#allocation10 + $0xc10] sm:$0xff] }
 0x155   :  { %v2888_v3 = vpop.f32.mrf.mxu0  ;;  %1675 = vmatmul.mubr.bf16.vlgmr.msra.gmra.mxu0 %v507_v51  ;;  %v975_v51 = vld [vmem:[#allocation10 + $0xe58] sm:$0xff]  ;;  %v1306_v55 = vpack.c.bf16 %v902_v42, %v900_v23 }
 0x156   :  { %1725 = vmatpush1.bf16.msra.mxu0 %v1352_v53  ;;  %1756 = vmatprep.mubr.bf16.mxu0 %v512_v2  ;;  %v265_v18 = vrot.slane %v2888_v3, 1  ;;  %v288_v38 = vrot.slane %v2888_v3, 2  ;;  %v311_v53 = vrot.slane %v2888_v3, 3  ;;  %v1343_v62 = vpack.c.bf16 %v975_v51, %v973_v50  ;;  %v959_v2 = vld [vmem:[#allocation10 + $0xdd8] sm:$0xff] }
 0x157   :  { %1690 = vmatpush1.bf16.msra.mxu1 %v1314_v52  ;;  %v2890_v7 = vpop.f32.mrf.mxu0  ;;  %1726 = vmatprep.subr.bf16.mxu0 %v1351_v60  ;;  %v962_v60 = vld [vmem:[#allocation10 + $0xdf0] sm:$0xff]  ;;  %v334_v6 = vrot.slane %v2888_v3, 4  ;;  %v1335_v14 = vpack.c.bf16 %v959_v2, %v957_v0  ;;  %v1027_v23 = vld [vmem:[#allocation10 + $0xff8] sm:$0xff]  ;;  %v944_v0 = vld [vmem:[#allocation10 + $0xd60] sm:$0xff] }
 0x158   :  { %1691 = vmatprep.subr.bf16.mxu1 %v1313_v57  ;;  %v960_v57 = vld [vmem:[#allocation10 + $0xde0] sm:$0xff] }
 0x159   :  { %v2892_v17 = vpop.f32.mrf.mxu0 }
 0x15a   :  { %1727 = vmatpush1.bf16.msra.mxu0 %v1350_v4  ;;  %v289_v19 = vrot.slane %v2892_v17, 2  ;;  %v266_v20 = vrot.slane %v2892_v17, 1  ;;  %v312_v30 = vrot.slane %v2892_v17, 3  ;;  %v971_v4 = vld [vmem:[#allocation10 + $0xe38] sm:$0xff] }
 0x15b   :  { %1692 = vmatpush1.bf16.msra.mxu1 %v1312_v15  ;;  %1728 = vmatprep.subr.bf16.mxu0 %v1349_v10  ;;  %v2901_v36 = vpop.f32.mrf.mxu0  ;;  %v969_v15 = vld [vmem:[#allocation10 + $0xe28] sm:$0xff]  ;;  %v1336_v10 = vpack.c.bf16 %v962_v60, %v960_v57  ;;  %v1023_v57 = vld [vmem:[#allocation10 + $0xfd8] sm:$0xff] }
 0x15c   :  { %1693 = vmatprep.subr.bf16.mxu1 %v1311_v9  ;;  %297 = vrot.lane.b32.xlu1 %v289_v19, %s2701_s9  ;;  %v267_v35 = vsel %vm261_vm2, %v265_v18, %v266_v20  ;;  %v263_v47 = vrot.slane %v2901_v36, 1  ;;  %v290_v52 = vsel %vm284_vm3, %v288_v38, %v289_v19  ;;  %v286_v1 = vrot.slane %v2901_v36, 2  ;;  %v970_v18 = vld [vmem:[#allocation10 + $0xe30] sm:$0xff]  ;;  %v953_v19 = vld [vmem:[#allocation10 + $0xda8] sm:$0xff] }
 0x15d   :  { %274 = vrot.lane.b32.xlu0 %v266_v20, %s2702_s12  ;;  %v313_v5 = vsel %vm307_vm4, %v311_v53, %v312_v30  ;;  %v335_v9 = vrot.slane %v2892_v17, 4  ;;  %v1341_v34 = vpack.c.bf16 %v971_v4, %v969_v15  ;;  %v309_v20 = vrot.slane %v2901_v36, 3  ;;  %v949_v38 = vld [vmem:[#allocation10 + $0xd88] sm:$0xff]  ;;  %v1026_v53 = vld [vmem:[#allocation10 + $0xff0] sm:$0xff]  ;;  %v1020_v4 = vld [vmem:[#allocation10 + $0xfc0] sm:$0xff] }
 0x15e   :  { %1729 = vmatpush1.bf16.msra.mxu0 %v1348_v22  ;;  %v965_v22 = vld [vmem:[#allocation10 + $0xe08] sm:$0xff]  ;;  %v1340_v28 = vpack.c.bf16 %v970_v18, %v968_v16  ;;  %v940_v16 = vld [vmem:[#allocation10 + $0xd40] sm:$0xff]  ;;  %v942_v18 = vld [vmem:[#allocation10 + $0xd50] sm:$0xff] }
 0x15f   :  { %1694 = vmatpush1.bf16.msra.mxu1 %v1310_v21  ;;  %1730 = vmatprep.subr.bf16.mxu0 %v1347_v26  ;;  %v955_v21 = vld [vmem:[#allocation10 + $0xdb8] sm:$0xff]  ;;  %v336_v24 = vsel %vm330_vm5, %v334_v6, %v335_v9  ;;  %v262_v26 = vrot.slane %v2890_v7, 1  ;;  %v1339_v32 = vpack.c.bf16 %v967_v54, %v965_v22  ;;  %v941_v6 = vld [vmem:[#allocation10 + $0xd48] sm:$0xff]  ;;  %v1018_v22 = vld [vmem:[#allocation10 + $0xfb0] sm:$0xff] }
 0x160   :  { %1695 = vmatprep.subr.bf16.mxu1 %v1309_v25  ;;  %320 = vrot.lane.b32.xlu1 %v312_v30, %s2703_s30  ;;  %v285_v25 = vrot.slane %v2890_v7, 2  ;;  %v954_v30 = vld [vmem:[#allocation10 + $0xdb0] sm:$0xff]  ;;  %v1333_v31 = vpack.c.bf16 %v955_v21, %v953_v19  ;;  %v1016_v21 = vld [vmem:[#allocation10 + $0xfa0] sm:$0xff]  ;;  %v937_v54 = vld [vmem:[#allocation10 + $0xd28] sm:$0xff] }
 0x161   :  { %272 = vrot.lane.b32.xlu0 %v267_v35, %s2702_s12  ;;  %v966_v35 = vld [vmem:[#allocation10 + $0xe10] sm:$0xff]  ;;  %v1332_v44 = vpack.c.bf16 %v954_v30, %v952_v29 }
 0x162   :  { %1731 = vmatpush1.bf16.msra.mxu0 %v1346_v41  ;;  %v1025_v41 = vld [vmem:[#allocation10 + $0xfe8] sm:$0xff]  ;;  %v287_v42 = vsel %vm284_vm3, %v285_v25, %v286_v1  ;;  %v1338_v45 = vpack.c.bf16 %v966_v35, %v964_v33  ;;  %v1015_v25 = vld [vmem:[#allocation10 + $0xf98] sm:$0xff]  ;;  %v938_v29 = vld [vmem:[#allocation10 + $0xd30] sm:$0xff] }
 0x163   :  { %1696 = vmatpush1.bf16.msra.mxu1 %v1308_v40  ;;  %1732 = vmatprep.subr.bf16.mxu0 %v1345_v48  ;;  %v951_v40 = vld [vmem:[#allocation10 + $0xd98] sm:$0xff]  ;;  %v308_v48 = vrot.slane %v2890_v7, 3  ;;  %v1369_v51 = vpack.c.bf16 %v1027_v23, %v1025_v41  ;;  %v1014_v33 = vld [vmem:[#allocation10 + $0xf90] sm:$0xff]  ;;  %v933_v35 = vld [vmem:[#allocation10 + $0xd08] sm:$0xff] }
 0x164   :  { %1697 = vmatprep.subr.bf16.mxu1 %v1307_v43  ;;  %270 = vrot.lane.b32.xlu1 %v263_v47, %s2702_s12  ;;  %v264_v43 = vsel %vm261_vm2, %v262_v26, %v263_v47  ;;  %v1331_v50 = vpack.c.bf16 %v951_v40, %v949_v38  ;;  %v947_v47 = vld [vmem:[#allocation10 + $0xd78] sm:$0xff]  ;;  %v1326_v26 = vpack.c.bf16 %v942_v18, %v940_v16  ;;  %v1009_v40 = vld [vmem:[#allocation10 + $0xf68] sm:$0xff]  ;;  %v1052_v16 = vld [vmem:[#allocation10 + $0x10c0] sm:$0xff] }
 0x165   :  { %295 = vrot.lane.b32.xlu0 %v290_v52, %s2701_s9  ;;  %v1024_v52 = vld [vmem:[#allocation10 + $0xfe0] sm:$0xff]  ;;  %v310_v60 = vsel %vm307_vm4, %v308_v48, %v309_v20  ;;  %v935_v38 = vld [vmem:[#allocation10 + $0xd18] sm:$0xff]  ;;  %v934_v48 = vld [vmem:[#allocation10 + $0xd10] sm:$0xff] }
 0x166   :  { %1733 = vmatpush1.bf16.msra.mxu0 %v1344_v56  ;;  %v1021_v56 = vld [vmem:[#allocation10 + $0xfc8] sm:$0xff]  ;;  %v1368_v63 = vpack.c.bf16 %v1026_v53, %v1024_v52  ;;  %v1011_v41 = vld [vmem:[#allocation10 + $0xf78] sm:$0xff]  ;;  %v1054_v18 = vld [vmem:[#allocation10 + $0x10d0] sm:$0xff] }
 0x167   :  { %1698 = vmatpush1.bf16.msra.mxu1 %v1306_v55  ;;  %1734 = vmatprep.subr.bf16.mxu0 %v1343_v62  ;;  %v945_v55 = vld [vmem:[#allocation10 + $0xd68] sm:$0xff]  ;;  %v332_v62 = vrot.slane %v2901_v36, 4  ;;  %v1367_v15 = vpack.c.bf16 %v1023_v57, %v1021_v56  ;;  %v1361_v46 = vpack.c.bf16 %v1011_v41, %v1009_v40  ;;  %v1007_v52 = vld [vmem:[#allocation10 + $0xf58] sm:$0xff]  ;;  %v1112_v40 = vld [vmem:[#allocation10 + $0x12a0] sm:$0x3f] }
 0x168   :  { %1699 = vmatprep.subr.bf16.mxu1 %v1337_v61  ;;  %293 = vrot.lane.b32.xlu1 %v286_v1, %s2701_s9  ;;  %v331_v61 = vrot.slane %v2890_v7, 4  ;;  %v946_v1 = vld [vmem:[#allocation10 + $0xd70] sm:$0xff]  ;;  %v1329_v2 = vpack.c.bf16 %v947_v47, %v945_v55  ;;  %v1057_v53 = vld [vmem:[#allocation10 + $0x10e8] sm:$0xff]  ;;  %v1059_v55 = vld [vmem:[#allocation10 + $0x10f8] sm:$0xff] }
 0x169   :  { %318 = vrot.lane.b32.xlu0 %v313_v5, %s2703_s30  ;;  %v1022_v5 = vld [vmem:[#allocation10 + $0xfd0] sm:$0xff] }
 0x16a   :  { %1735 = vmatpush1.bf16.msra.mxu0 %v1342_v11  ;;  %v1017_v11 = vld [vmem:[#allocation10 + $0xfa8] sm:$0xff]  ;;  %v333_v13 = vsel %vm330_vm5, %v331_v61, %v332_v62  ;;  %v1006_v61 = vld [vmem:[#allocation10 + $0xf50] sm:$0xff] }
 0x16b   :  { %1700 = vmatpush2.bf16.msra.mxu1 %v1336_v10  ;;  %1736 = vmatprep.subr.bf16.mxu0 %v1341_v34  ;;  %v943_v10 = vld [vmem:[#allocation10 + $0xd58] sm:$0xff]  ;;  %v1366_v34 = vpack.c.bf16 %v1022_v5, %v1020_v4  ;;  %v1414_v41 = vld [vmem:[#allocation11] sm:$0x3] }
 0x16c   :  { %1701 = vmatprep.subr.bf16.mxu1 %v1335_v14  ;;  %316 = vrot.lane.b32.xlu1 %v309_v20, %s2703_s30  ;;  %v1328_v14 = vpack.c.bf16 %v946_v1, %v944_v0  ;;  %v1327_v19 = vpack.c.bf16 %v943_v10, %v941_v6  ;;  %v1365_v20 = vpack.c.bf16 %v1019_v12, %v1017_v11  ;;  %v1058_v0 = vld [vmem:[#allocation10 + $0x10f0] sm:$0xff]  ;;  %v1001_v1 = vld [vmem:[#allocation10 + $0xf28] sm:$0xff]  ;;  %v1055_v4 = vld [vmem:[#allocation10 + $0x10d8] sm:$0xff] }
 0x16d   :  { %341 = vrot.lane.b32.xlu0 %v336_v24, %s2704_s14  ;;  %v1013_v24 = vld [vmem:[#allocation10 + $0xf88] sm:$0xff]  ;;  %v509_v6 = vpack.c.bf16 %v2873_v58, %v2873_v58  ;;  %v1000_v12 = vld [vmem:[#allocation10 + $0xf20] sm:$0xff] }
 0x16e   :  { %1737 = vmatpush1.bf16.msra.mxu0 %v1340_v28  ;;  %v936_v28 = vld [vmem:[#allocation10 + $0xd20] sm:$0xff] }
 0x16f   :  { %1702 = vmatpush2.bf16.msra.mxu1 %v1334_v27  ;;  %1738 = vmatprep.subr.bf16.mxu0 %v1339_v32  ;;  %v1364_v27 = vpack.c.bf16 %v1018_v22, %v1016_v21  ;;  %v1012_v32 = vld [vmem:[#allocation10 + $0xf80] sm:$0xff]  ;;  %v1324_v23 = vpack.c.bf16 %v938_v29, %v936_v28  ;;  %v1049_v21 = vld [vmem:[#allocation10 + $0x10a8] sm:$0xff]  ;;  %v1051_v22 = vld [vmem:[#allocation10 + $0x10b8] sm:$0xff] }
 0x170   :  { %1703 = vmatprep.subr.bf16.mxu1 %v1333_v31  ;;  %268 = vrot.lane.b32.xlu1 %v264_v43, %s2702_s12  ;;  %v1363_v31 = vpack.c.bf16 %v1015_v25, %v1013_v24  ;;  %v932_v43 = vld [vmem:[#allocation10 + $0xd00] sm:$0xff]  ;;  %v1382_v24 = vpack.c.bf16 %v1054_v18, %v1052_v16  ;;  %v1381_v29 = vpack.c.bf16 %v1051_v22, %v1049_v21  ;;  %v1038_v18 = vld [vmem:[#allocation10 + $0x1050] sm:$0xff]  ;;  %v1033_v22 = vld [vmem:[#allocation10 + $0x1028] sm:$0xff] }
 0x171   :  { %291 = vrot.lane.b32.xlu0 %v287_v42, %s2701_s9  ;;  %v1362_v42 = vpack.c.bf16 %v1014_v33, %v1012_v32  ;;  %v1322_v56 = vpack.c.bf16 %v934_v48, %v932_v43  ;;  %v996_v25 = vld [vmem:[#allocation10 + $0xf00] sm:$0xff]  ;;  %v1045_v32 = vld [vmem:[#allocation10 + $0x1088] sm:$0xff]  ;;  %v1418_v33 = vsub.s32 0, %v2826_v59 }
 0x172   :  { %1739 = vmatpush1.bf16.msra.mxu0 %v1338_v45  ;;  %v1323_v45 = vpack.c.bf16 %v935_v38, %v933_v35  ;;  %v1047_v35 = vld [vmem:[#allocation10 + $0x1098] sm:$0xff]  ;;  %v1113_v38 = vld [vmem:[#allocation10 + $0x12a8] sm:$0x3f]  ;;  %v1036_v16 = vld [vmem:[#allocation10 + $0x1040] sm:$0xff] }
 0x173   :  { %1704 = vmatpush2.bf16.msra.mxu1 %v1332_v44  ;;  %1740 = vmatprep.subr.bf16.mxu0 %v1369_v51  ;;  %v1008_v44 = vld [vmem:[#allocation10 + $0xf60] sm:$0xff]  ;;  %v2944_v51 = vld [vmem:[#allocation8 + $0x20] sm:$0x3f] }
 0x174   :  { %1705 = vmatprep.subr.bf16.mxu1 %v1331_v50  ;;  %343 = vrot.lane.b32.xlu1 %v335_v9, %s2704_s14  ;;  %v939_v9 = vld [vmem:[#allocation10 + $0xd38] sm:$0xff]  ;;  %v1005_v50 = vld [vmem:[#allocation10 + $0xf48] sm:$0xff]  ;;  %v2948_v47 = vrot.slane %v2944_v51, %v2829_v8  ;;  %v1360_v57 = vpack.c.bf16 %v1010_v49, %v1008_v44  ;;  %v1046_v49 = vld [vmem:[#allocation10 + $0x1090] sm:$0xff] }
 0x175   :  { %314 = vrot.lane.b32.xlu0 %v310_v60, %s2703_s30  ;;  %v1325_v30 = vpack.c.bf16 %v939_v9, %v937_v54  ;;  %v1004_v60 = vld [vmem:[#allocation10 + $0xf40] sm:$0xff] }
 0x176   :  { %1741 = vmatpush2.bf16.msra.mxu0 %v1368_v63  ;;  %v1056_v63 = vld [vmem:[#allocation10 + $0x10e0] sm:$0xff]  ;;  %v477_v5 = vcombine.high %v2948_v47, %v2948_v47  ;;  %v1358_v10 = vpack.c.bf16 %v1006_v61, %v1004_v60  ;;  %v1111_v60 = vld [vmem:[#allocation10 + $0x1298] sm:$0xff] }
 0x177   :  { %1706 = vmatpush2.bf16.msra.mxu1 %v1330_v39  ;;  %1742 = vmatprep.subr.bf16.mxu0 %v1367_v15  ;;  %v1385_v39 = vpack.c.bf16 %v1059_v55, %v1057_v53  ;;  %v1053_v15 = vld [vmem:[#allocation10 + $0x10c8] sm:$0xff]  ;;  %v1384_v11 = vpack.c.bf16 %v1058_v0, %v1056_v63  ;;  %v1412_v53 = vpack.c.bf16 %v1112_v40, %v1112_v40  ;;  %v1042_v63 = vld [vmem:[#allocation10 + $0x1070] sm:$0xff] }
 0x178   :  { %1707 = vmatprep.subr.bf16.mxu1 %v1329_v2  ;;  %339 = vrot.lane.b32.xlu1 %v332_v62, %s2704_s14  ;;  %v1359_v62 = vpack.c.bf16 %v1007_v52, %v1005_v50  ;;  %v1003_v2 = vld [vmem:[#allocation10 + $0xf38] sm:$0xff]  ;;  %v514_v54 = vpack.c.bf16 %v477_v5, %v477_v5  ;;  %v1041_v50 = vld [vmem:[#allocation10 + $0x1068] sm:$0xff]  ;;  %v1413_v52 = vpack.c.bf16 %v1113_v38, %v1113_v38  ;;  %v1110_v5 = vld [vmem:[#allocation10 + $0x1290] sm:$0xff] }
 0x179   :  { %337 = vrot.lane.b32.xlu0 %v333_v13, %s2704_s14  ;;  %v1002_v13 = vld [vmem:[#allocation10 + $0xf30] sm:$0xff]  ;;  %v1419_v55 = vrot.slane %v1414_v41, %v1418_v33  ;;  %v1029_v38 = vld [vmem:[#allocation10 + $0x1008] sm:$0xff] }
 0x17a   :  { %1743 = vmatpush2.bf16.msra.mxu0 %v1366_v34  ;;  %v1383_v34 = vpack.c.bf16 %v1055_v4, %v1053_v15  ;;  %v1356_v58 = vpack.c.bf16 %v1002_v13, %v1000_v12  ;;  %v1108_v4 = vld [vmem:[#allocation10 + $0x1280] sm:$0xff]  ;;  %v1107_v12 = vld [vmem:[#allocation10 + $0x1278] sm:$0xff] }
 0x17b   :  { %1708 = vmatpush2.bf16.msra.mxu1 %v1328_v14  ;;  %1744 = vmatprep.subr.bf16.mxu0 %v1365_v20  ;;  %v1357_v14 = vpack.c.bf16 %v1003_v2, %v1001_v1  ;;  %v999_v20 = vld [vmem:[#allocation10 + $0xf18] sm:$0xff]  ;;  %v1037_v1 = vld [vmem:[#allocation10 + $0x1048] sm:$0xff]  ;;  %v1432_v2 = vsel %vm1430_vm6, %v1412_v53, 0 }
 0x17c   :  { %1709 = vmatprep.subr.bf16.mxu1 %v1327_v19  ;;  %v997_v19 = vld [vmem:[#allocation10 + $0xf08] sm:$0xff] }
 0x17d   :  { %v1355_v28 = vpack.c.bf16 %v999_v20, %v997_v19  ;;  %v1410_v19 = vpack.c.bf16 %v1110_v5, %v1108_v4  ;;  %v1089_v53 = vld [vmem:[#allocation10 + $0x11e8] sm:$0xff]  ;;  %v1092_v4 = vld [vmem:[#allocation10 + $0x1200] sm:$0xff]  ;;  %v1094_v5 = vld [vmem:[#allocation10 + $0x1210] sm:$0xff] }
 0x17e   :  { %1745 = vmatpush2.bf16.msra.mxu0 %v1364_v27 }
 0x17f   :  { %1710 = vmatpush2.bf16.msra.mxu1 %v1326_v26  ;;  %1746 = vmatprep.subr.bf16.mxu0 %v1363_v31  ;;  %v998_v26 = vld [vmem:[#allocation10 + $0xf10] sm:$0xff] }
 0x180   :  { %1711 = vmatprep.subr.bf16.mxu1 %v1325_v30  ;;  %v1048_v30 = vld [vmem:[#allocation10 + $0x10a0] sm:$0xff]  ;;  %v1050_v31 = vld [vmem:[#allocation10 + $0x10b0] sm:$0xff]  ;;  %v1354_v43 = vpack.c.bf16 %v998_v26, %v996_v25  ;;  %v1035_v25 = vld [vmem:[#allocation10 + $0x1038] sm:$0xff] }
 0x181   :  { %v1380_v48 = vpack.c.bf16 %v1050_v31, %v1048_v30  ;;  %v1101_v26 = vld [vmem:[#allocation10 + $0x1248] sm:$0xff]  ;;  %v1374_v30 = vpack.c.bf16 %v1038_v18, %v1036_v16  ;;  %v1032_v31 = vld [vmem:[#allocation10 + $0x1020] sm:$0xff]  ;;  %v1083_v18 = vld [vmem:[#allocation10 + $0x11b8] sm:$0xff] }
 0x182   :  { %1747 = vmatpush2.bf16.msra.mxu0 %v1362_v42  ;;  %v1422_v42 = vsub.s32 1, %v2826_v59  ;;  %v511_v59 = vpack.c.bf16 %v2882_v37, %v2882_v37  ;;  %v1081_v16 = vld [vmem:[#allocation10 + $0x11a8] sm:$0xff] }
 0x183   :  { %1712 = vmatpush2.bf16.msra.mxu1 %v1324_v23  ;;  %1748 = vmatprep.subr.bf16.mxu0 %v1361_v46  ;;  %v1044_v46 = vld [vmem:[#allocation10 + $0x1080] sm:$0xff] }
 0x184   :  { %1713 = vmatprep.subr.bf16.mxu1 %v1323_v45  ;;  %v1379_v45 = vpack.c.bf16 %v1047_v35, %v1045_v32  ;;  %v1423_v61 = vrot.slane %v1414_v41, %v1422_v42  ;;  %v1034_v32 = vld [vmem:[#allocation10 + $0x1030] sm:$0xff]  ;;  %v1373_v35 = vpack.c.bf16 %v1035_v25, %v1033_v22  ;;  %v1080_v22 = vld [vmem:[#allocation10 + $0x11a0] sm:$0xff] }
 0x185   :  { %v1102_v42 = vld [vmem:[#allocation10 + $0x1250] sm:$0xff] }
 0x186   :  { %1749 = vmatpush2.bf16.msra.mxu0 %v1360_v57  ;;  %v1109_v57 = vld [vmem:[#allocation10 + $0x1288] sm:$0xff] }
 0x187   :  { %1714 = vmatpush2.bf16.msra.mxu1 %v1322_v56  ;;  %1750 = vmatprep.subr.bf16.mxu0 %v1359_v62  ;;  %v1043_v56 = vld [vmem:[#allocation10 + $0x1078] sm:$0xff]  ;;  %v1378_v62 = vpack.c.bf16 %v1046_v49, %v1044_v46  ;;  %v1411_v15 = vpack.c.bf16 %v1111_v60, %v1109_v57  ;;  %v1028_v46 = vld [vmem:[#allocation10 + $0x1000] sm:$0xff]  ;;  %v1030_v49 = vld [vmem:[#allocation10 + $0x1010] sm:$0xff] }
 0x188   :  { %1765 = vmatprep.subr.bf16.mxu1 %v1385_v39  ;;  %v1040_v39 = vld [vmem:[#allocation10 + $0x1060] sm:$0xff]  ;;  %v1377_v0 = vpack.c.bf16 %v1043_v56, %v1041_v50  ;;  %v1098_v57 = vld [vmem:[#allocation10 + $0x1230] sm:$0xff]  ;;  %v1091_v60 = vld [vmem:[#allocation10 + $0x11f8] sm:$0xff] }
 0x189   :  { %v1376_v37 = vpack.c.bf16 %v1042_v63, %v1040_v39  ;;  %v1096_v56 = vld [vmem:[#allocation10 + $0x1220] sm:$0xff]  ;;  %v1370_v39 = vpack.c.bf16 %v1030_v49, %v1028_v46  ;;  %v1066_v49 = vld [vmem:[#allocation10 + $0x1130] sm:$0xff] }
 0x18a   :  { %v1471_v9 = vpop.f32.mrf.mxu1  ;;  %1716 = vmatmul.mubr.bf16.vlgmr.msra.gmra.mxu1 %v509_v6  ;;  %1751 = vmatpush2.bf16.msra.mxu0 %v1358_v10  ;;  %v1039_v10 = vld [vmem:[#allocation10 + $0x1058] sm:$0xff]  ;;  %v1088_v63 = vld [vmem:[#allocation10 + $0x11e0] sm:$0xff] }
 0x18b   :  { %1766 = vmatpush1.bf16.msra.mxu1 %v1384_v11  ;;  %1752 = vmatprep.subr.bf16.mxu0 %v1357_v14  ;;  %v1472_v6 = vadd.f32 %v1471_v9, %v1419_v55  ;;  %v1105_v11 = vld [vmem:[#allocation10 + $0x1268] sm:$0xff]  ;;  %v1375_v21 = vpack.c.bf16 %v1039_v10, %v1037_v1  ;;  %v1104_v9 = vld [vmem:[#allocation10 + $0x1260] sm:$0xff]  ;;  %v1401_v1 = vpack.c.bf16 %v1091_v60, %v1089_v53  ;;  %v1087_v10 = vld [vmem:[#allocation10 + $0x11d8] sm:$0xff] }
 0x18c   :  { %v1473_v27 = vpop.f32.mrf.mxu1  ;;  %1767 = vmatprep.subr.bf16.mxu1 %v1383_v34  ;;  %1797 = vmatprep.mubr.bf16.mxu1 %v514_v54  ;;  %v1409_v54 = vpack.c.bf16 %v1107_v12, %v1105_v11  ;;  %v1064_v46 = vld [vmem:[#allocation10 + $0x1120] sm:$0xff] }
 0x18d   :  { %v1474_v14 = vadd.f32 %v1473_v27, %v1423_v61  ;;  %v1103_v27 = vld [vmem:[#allocation10 + $0x1258] sm:$0xff]  ;;  %v1388_v53 = vpack.c.bf16 %v1066_v49, %v1064_v46  ;;  %v2706_v46 = vmov 0.0  }
 0x18e   :  { %v1475_v23 = vpop.f32.mrf.mxu1  ;;  %1753 = vmatpush2.bf16.msra.mxu0 %v1356_v58  ;;  %v1106_v58 = vld [vmem:[#allocation10 + $0x1270] sm:$0xff]  ;;  %v1407_v41 = vpack.c.bf16 %v1103_v27, %v1101_v26  ;;  %v1095_v61 = vld [vmem:[#allocation10 + $0x1218] sm:$0xff]  ;;  %v1076_v26 = vld [vmem:[#allocation10 + $0x1180] sm:$0xff] }
 0x18f   :  { %1768 = vmatpush1.bf16.msra.mxu1 %v1382_v24  ;;  %1754 = vmatprep.subr.bf16.mxu0 %v1355_v28  ;;  %v2705_v28 = vmov 0   ;;  %v1408_v33 = vpack.c.bf16 %v1106_v58, %v1104_v9  ;;  %v1100_v23 = vld [vmem:[#allocation10 + $0x1240] sm:$0xff]  ;;  %v1079_v9 = vld [vmem:[#allocation10 + $0x1198] sm:$0xff]  ;;  %v1078_v27 = vld [vmem:[#allocation10 + $0x1190] sm:$0xff] }
 0x190   :  { %v1476_v44 = vpop.f32.mrf.mxu1  ;;  %1769 = vmatprep.subr.bf16.mxu1 %v1381_v29  ;;  %v1406_v50 = vpack.c.bf16 %v1102_v42, %v1100_v23  ;;  %v1068_v23 = vld [vmem:[#allocation10 + $0x1140] sm:$0xff]  ;;  %v1070_v42 = vld [vmem:[#allocation10 + $0x1150] sm:$0xff] }
 0x191   :  { %v1099_v44 = vld [vmem:[#allocation10 + $0x1238] sm:$0xff] }
 0x192   :  { %1755 = vmatpush2.bf16.msra.mxu0 %v1354_v43  ;;  %v1031_v43 = vld [vmem:[#allocation10 + $0x1018] sm:$0xff] }
 0x193   :  { %1770 = vmatpush1.bf16.msra.mxu1 %v1380_v48  ;;  %2258 = vmatprep.subr.msk.bf16.mxu0 %vm1430_vm6, %v1413_v52  ;;  %v1097_v48 = vld [vmem:[#allocation10 + $0x1228] sm:$0xff]  ;;  %v1371_v52 = vpack.c.bf16 %v1031_v43, %v1029_v38  ;;  %v1071_v38 = vld [vmem:[#allocation10 + $0x1158] sm:$0xff] }
 0x194   :  { %1771 = vmatprep.subr.bf16.mxu1 %v1379_v45  ;;  %v1372_v45 = vpack.c.bf16 %v1034_v32, %v1032_v31  ;;  %v1405_v55 = vpack.c.bf16 %v1099_v44, %v1097_v48  ;;  %v1072_v32 = vld [vmem:[#allocation10 + $0x1160] sm:$0xff]  ;;  %v1065_v43 = vld [vmem:[#allocation10 + $0x1128] sm:$0xff]  ;;  %v1067_v48 = vld [vmem:[#allocation10 + $0x1138] sm:$0xff]  ;;  %v1390_v44 = vpack.c.bf16 %v1070_v42, %v1068_v23 }
 0x195   :  { %v1512_v13 = vpop.f32.mrf.mxu0  ;;  %1757 = vmatmul.mubr.bf16.vlgmr.msra.gmra.mxu0 %v511_v59  ;;  %v1093_v59 = vld [vmem:[#allocation10 + $0x1208] sm:$0xff]  ;;  %v1851_v23 = vld [vmem:[%s3162_s6 + $0x10] sm:$0xff]  ;;  %v1866_v42 = vld [vmem:[%s3162_s6 + $0x88] sm:$0xff] }
 0x196   :  { %v2958_v34 = vadd.f32 %v1512_v13, %v1472_v6  ;;  %1811 = vmatpush1.bf16.msra.mxu0 %v1432_v2  ;;  %1838 = vmatprep.mubr.bf16.mxu0 %v2705_v28  ;;  %v1090_v2 = vld [vmem:[#allocation10 + $0x11f0] sm:$0xff]  ;;  %v1085_v6 = vld [vmem:[#allocation10 + $0x11c8] sm:$0xff] }
 0x197   :  { %1772 = vmatpush1.bf16.msra.mxu1 %v1378_v62  ;;  %v1514_v20 = vpop.f32.mrf.mxu0  ;;  %1812 = vmatprep.subr.bf16.mxu0 %v1411_v15  ;;  %v462_v62 = vcombine.high %v2944_v51, %v2944_v51  ;;  %v1403_v15 = vpack.c.bf16 %v1095_v61, %v1093_v59  ;;  %v1400_v12 = vpack.c.bf16 %v1090_v2, %v1088_v63  ;;  %v1073_v28 = vld [vmem:[#allocation10 + $0x1168] sm:$0xff] }
 0x198   :  { %1773 = vmatprep.subr.bf16.mxu1 %v1377_v0  ;;  %v2960_v24 = vadd.f32 %v1514_v20, %v1474_v14  ;;  %v1404_v0 = vpack.c.bf16 %v1098_v57, %v1096_v56  ;;  %v1402_v51 = vpack.c.bf16 %v1094_v5, %v1092_v4  ;;  %v1399_v13 = vpack.c.bf16 %v1087_v10, %v1085_v6  ;;  %v1086_v14 = vld [vmem:[#allocation10 + $0x11d0] sm:$0xff]  ;;  %v1060_v56 = vld [vmem:[#allocation10 + $0x1100] sm:$0xff]  ;;  %v1880_v10 = vld [vmem:[%s3162_s6 + $0xf8] sm:$0xff] }
 0x199   :  { %v1516_v29 = vpop.f32.mrf.mxu0  ;;  %v476_v11 = vrot.slane %v462_v62, %v2829_v8  ;;  %v1082_v8 = vld [vmem:[#allocation10 + $0x11b0] sm:$0xff]  ;;  %v513_v59 = vpack.c.bf16 %v2948_v47, %v2948_v47 }
 0x19a   :  { %1813 = vmatpush1.bf16.msra.mxu0 %v1410_v19  ;;  %v1396_v58 = vpack.c.bf16 %v1082_v8, %v1080_v22  ;;  %v1075_v29 = vld [vmem:[#allocation10 + $0x1178] sm:$0xff]  ;;  %v1062_v57 = vld [vmem:[#allocation10 + $0x1110] sm:$0xff] }
 0x19b   :  { %1774 = vmatpush1.bf16.msra.mxu1 %v1376_v37  ;;  %v1517_v40 = vpop.f32.mrf.mxu0  ;;  %1814 = vmatprep.subr.bf16.mxu0 %v1409_v54  ;;  %v1084_v37 = vld [vmem:[#allocation10 + $0x11c0] sm:$0xff]  ;;  %v515_v19 = vpack.c.bf16 %v476_v11, %v476_v11  ;;  %v1077_v54 = vld [vmem:[#allocation10 + $0x1188] sm:$0xff]  ;;  %v1393_v31 = vpack.c.bf16 %v1075_v29, %v1073_v28  ;;  %v1386_v60 = vpack.c.bf16 %v1062_v57, %v1060_v56  ;;  %v1873_v22 = vld [vmem:[%s3162_s6 + $0xc0] sm:$0xff] }
 0x19c   :  { %1775 = vmatprep.subr.bf16.mxu1 %v1375_v21  ;;  %v1398_v20 = vpack.c.bf16 %v1086_v14, %v1084_v37  ;;  %v1397_v21 = vpack.c.bf16 %v1083_v18, %v1081_v16  ;;  %v1395_v25 = vpack.c.bf16 %v1079_v9, %v1077_v54  ;;  %v1863_v11 = vld [vmem:[%s3162_s6 + $0x70] sm:$0xff]  ;;  %v1861_v37 = vld [vmem:[%s3162_s6 + $0x60] sm:$0xff]  ;;  %v1876_v14 = vld [vmem:[%s3162_s6 + $0xd8] sm:$0xff] }
 0x19d   :  { %v1860_v16 = vld [vmem:[%s3162_s6 + $0x58] sm:$0xff]  ;;  %v1875_v18 = vld [vmem:[%s3162_s6 + $0xd0] sm:$0xff]  ;;  %v1857_v8 = vld [vmem:[%s3162_s6 + $0x40] sm:$0xff] }
 0x19e   :  { %1815 = vmatpush1.bf16.msra.mxu0 %v1408_v33  ;;  %v1074_v33 = vld [vmem:[#allocation10 + $0x1170] sm:$0xff]  ;;  %v1872_v54 = vld [vmem:[%s3162_s6 + $0xb8] sm:$0xff] }
 0x19f   :  { %1776 = vmatpush1.bf16.msra.mxu1 %v1374_v30  ;;  %1816 = vmatprep.subr.bf16.mxu0 %v1407_v41  ;;  %v1394_v30 = vpack.c.bf16 %v1078_v27, %v1076_v26  ;;  %v1392_v40 = vpack.c.bf16 %v1074_v33, %v1072_v32  ;;  %v1856_v9 = vld [vmem:[%s3162_s6 + $0x38] sm:$0xff]  ;;  %v1870_v26 = vld [vmem:[%s3162_s6 + $0xa8] sm:$0xff]  ;;  %v1869_v28 = vld [vmem:[%s3162_s6 + $0xa0] sm:$0xff] }
 0x1a0   :  { %1777 = vmatprep.subr.bf16.mxu1 %v1373_v35  ;;  %v1069_v35 = vld [vmem:[#allocation10 + $0x1148] sm:$0xff]  ;;  %v1854_v27 = vld [vmem:[%s3162_s6 + $0x28] sm:$0xff] }
 0x1a1   :  { %v1391_v41 = vpack.c.bf16 %v1071_v38, %v1069_v35  ;;  %v1868_v32 = vld [vmem:[%s3162_s6 + $0x98] sm:$0xff] }
 0x1a2   :  { %1817 = vmatpush1.bf16.msra.mxu0 %v1406_v50  ;;  %v1061_v50 = vld [vmem:[#allocation10 + $0x1108] sm:$0xff] }
 0x1a3   :  { %1778 = vmatpush1.bf16.msra.mxu1 %v1372_v45  ;;  %1818 = vmatprep.subr.bf16.mxu0 %v1405_v55  ;;  %v1389_v45 = vpack.c.bf16 %v1067_v48, %v1065_v43  ;;  %v1852_v35 = vld [vmem:[%s3162_s6 + $0x18] sm:$0xff]  ;;  %v1850_v48 = vld [vmem:[%s3162_s6 + $0x8] sm:$0xff] }
 0x1a4   :  { %1779 = vmatprep.subr.bf16.mxu1 %v1371_v52  ;;  %v1063_v52 = vld [vmem:[#allocation10 + $0x1118] sm:$0xff] }
 0x1a5   :  { %v1387_v55 = vpack.c.bf16 %v1063_v52, %v1061_v50 }
 0x1a6   :  { %1819 = vmatpush1.bf16.msra.mxu0 %v1404_v0 }
 0x1a7   :  { %1780 = vmatpush1.bf16.msra.mxu1 %v1370_v39  ;;  %1820 = vmatprep.subr.bf16.mxu0 %v1403_v15 }
 0x1a8   :  { %1781 = vmatprep.subr.bf16.mxu1 %v1401_v1 }
 0x1aa   :  { %1821 = vmatpush1.bf16.msra.mxu0 %v1402_v51  ;;  %v1862_v51 = vld [vmem:[%s3162_s6 + $0x68] sm:$0xff] }
 0x1ab   :  { %1782 = vmatpush2.bf16.msra.mxu1 %v1400_v12  ;;  %2271 = vmatprep.subr.mxu0 %v1880_v10  ;;  %v1878_v12 = vld [vmem:[%s3162_s6 + $0xe8] sm:$0xff] }
 0x1ac   :  { %1783 = vmatprep.subr.bf16.mxu1 %v1399_v13  ;;  %v1877_v13 = vld [vmem:[%s3162_s6 + $0xe0] sm:$0xff] }
 0x1ad   :  { %2259 = vmatmul.mubr.msk.bf16.vlgmr.msra.gmra.mxu0 %vm1426_vm7, %v515_v19  ;;  %v1859_v19 = vld [vmem:[%s3162_s6 + $0x50] sm:$0xff] }
 0x1af   :  { %1784 = vmatpush2.bf16.msra.mxu1 %v1398_v20  ;;  %v1874_v20 = vld [vmem:[%s3162_s6 + $0xc8] sm:$0xff] }
 0x1b0   :  { %1785 = vmatprep.subr.bf16.mxu1 %v1397_v21  ;;  %v1858_v21 = vld [vmem:[%s3162_s6 + $0x48] sm:$0xff] }
 0x1b3   :  { %1786 = vmatpush2.bf16.msra.mxu1 %v1396_v58  ;;  %v1871_v58 = vld [vmem:[%s3162_s6 + $0xb0] sm:$0xff] }
 0x1b4   :  { %1787 = vmatprep.subr.bf16.mxu1 %v1395_v25  ;;  %v1855_v25 = vld [vmem:[%s3162_s6 + $0x30] sm:$0xff] }
 0x1b7   :  { %1788 = vmatpush2.bf16.msra.mxu1 %v1394_v30  ;;  %v1853_v30 = vld [vmem:[%s3162_s6 + $0x20] sm:$0xff] }
 0x1b8   :  { %1789 = vmatprep.subr.bf16.mxu1 %v1393_v31 }
 0x1bb   :  { %1790 = vmatpush2.bf16.msra.mxu1 %v1392_v40  ;;  %v1867_v40 = vld [vmem:[%s3162_s6 + $0x90] sm:$0xff] }
 0x1bc   :  { %1791 = vmatprep.subr.bf16.mxu1 %v1391_v41 }
 0x1bf   :  { %1792 = vmatpush2.bf16.msra.mxu1 %v1390_v44  ;;  %v1865_v44 = vld [vmem:[%s3162_s6 + $0x80] sm:$0xff] }
 0x1c0   :  { %1793 = vmatprep.subr.bf16.mxu1 %v1389_v45  ;;  %v1849_v45 = vld [vmem:[%s3162_s6] sm:$0xff] }
 0x1c3   :  { %1794 = vmatpush2.bf16.msra.mxu1 %v1388_v53 }
 0x1c4   :  { %1795 = vmatprep.subr.bf16.mxu1 %v1387_v55 }
 0x1c7   :  { %1796 = vmatpush2.bf16.msra.mxu1 %v1386_v60 }
 0x1c8   :  { %2362 = vmatprep.subr.mxu1 %v2706_v46 }
 0x1ca   :  { %v1553_v61 = vpop.f32.mrf.mxu1  ;;  %1798 = vmatmul.mubr.bf16.vlgmr.msra.gmra.mxu1 %v513_v59 }
 0x1cb   :  { %v1554_v62 = vadd.f32 %v1553_v61, %v2958_v34  ;;  %v1864_v34 = vld [vmem:[%s3162_s6 + $0x78] sm:$0xff]  ;;  %2394 = vmatprep.mubr.msk.f32.mxu1 %vm2707_vm8, %v2706_v46 }
 0x1cc   :  { %v1555_v39 = vpop.f32.mrf.mxu1  ;;  %2272 = vmatpush3.msra.mxu0 %v1864_v34 }
 0x1cd   :  { %v1556_v63 = vadd.f32 %v1555_v39, %v2960_v24  ;;  %v1879_v24 = vld [vmem:[%s3162_s6 + $0xf0] sm:$0xff] }
 0x1ce   :  { %v1557_v0 = vpop.f32.mrf.mxu1  ;;  %2273 = vmatprep.subr.mxu0 %v1879_v24 }
 0x1cf   :  { %2274 = vmatpush3.msra.mxu0 %v1863_v11 }
 0x1d0   :  { %v1558_v1 = vpop.f32.mrf.mxu1  ;;  %2275 = vmatprep.subr.mxu0 %v1878_v12 }
 0x1d1   :  { %2276 = vmatpush3.msra.mxu0 %v1862_v51 }
 0x1d2   :  { %2277 = vmatprep.subr.mxu0 %v1877_v13 }
 0x1d3   :  { %2278 = vmatpush3.msra.mxu0 %v1861_v37 }
 0x1d4   :  { %2279 = vmatprep.subr.mxu0 %v1876_v14 }
 0x1d5   :  { %v1594_v2 = vpop.f32.mrf.mxu0  ;;  %2280 = vmatpush3.msra.mxu0 %v1860_v16 }
 0x1d6   :  { %v1595_v15 = vadd.f32 %v1594_v2, %v1554_v62  ;;  %2281 = vmatprep.subr.mxu0 %v1875_v18 }
 0x1d7   :  { %v1596_v4 = vpop.f32.mrf.mxu0  ;;  %2282 = vmatpush3.msra.mxu0 %v1859_v19  ;;  %v1964_v19 = vld [vmem:[#allocation16 + $0x18] sm:$0xff] }
 0x1d8   :  { %v1597_v5 = vadd.f32 %v1596_v4, %v1556_v63  ;;  %2283 = vmatprep.subr.mxu0 %v1874_v20  ;;  %v1963_v20 = vld [vmem:[#allocation16 + $0x10] sm:$0xff] }
 0x1d9   :  { %v1598_v6 = vpop.f32.mrf.mxu0  ;;  %2284 = vmatpush3.msra.mxu0 %v1858_v21  ;;  %v1962_v21 = vld [vmem:[#allocation16 + $0x8] sm:$0xff] }
 0x1da   :  { %2285 = vmatprep.subr.mxu0 %v1873_v22  ;;  %v1961_v22 = vld [vmem:[#allocation16] sm:$0xff] }
 0x1db   :  { %v1599_v47 = vpop.f32.mrf.mxu0  ;;  %2286 = vmatpush3.msra.mxu0 %v1857_v8  ;;  %v2143_v8 = vld [vmem:[%s3167_s11 + $0x78] sm:$0xff] }
 0x1dc   :  { %2287 = vmatprep.subr.mxu0 %v1872_v54  ;;  %v2142_v54 = vld [vmem:[%s3167_s11 + $0x70] sm:$0xff]  ;;  %2363 = vmatpush3.msra.mxu1 %v2143_v8 }
 0x1dd   :  { %2288 = vmatpush3.msra.mxu0 %v1856_v9  ;;  %2364 = vmatprep.subr.mxu1 %v2706_v46  ;;  %v2141_v9 = vld [vmem:[%s3167_s11 + $0x68] sm:$0xff] }
 0x1de   :  { %2289 = vmatprep.subr.mxu0 %v1871_v58  ;;  %2365 = vmatpush3.msra.mxu1 %v2142_v54  ;;  %v2140_v58 = vld [vmem:[%s3167_s11 + $0x60] sm:$0xff] }
 0x1df   :  { %2290 = vmatpush3.msra.mxu0 %v1855_v25  ;;  %2366 = vmatprep.subr.mxu1 %v2706_v46  ;;  %v2139_v25 = vld [vmem:[%s3167_s11 + $0x58] sm:$0xff] }
 0x1e0   :  { %2291 = vmatprep.subr.mxu0 %v1870_v26  ;;  %2367 = vmatpush3.msra.mxu1 %v2141_v9  ;;  %v2138_v26 = vld [vmem:[%s3167_s11 + $0x50] sm:$0xff] }
 0x1e1   :  { %2292 = vmatpush3.msra.mxu0 %v1854_v27  ;;  %2368 = vmatprep.subr.mxu1 %v2706_v46  ;;  %v2137_v27 = vld [vmem:[%s3167_s11 + $0x48] sm:$0xff] }
 0x1e2   :  { %2293 = vmatprep.subr.mxu0 %v1869_v28  ;;  %2369 = vmatpush3.msra.mxu1 %v2140_v58  ;;  %v2136_v28 = vld [vmem:[%s3167_s11 + $0x40] sm:$0xff] }
 0x1e3   :  { %2294 = vmatpush3.msra.mxu0 %v1853_v30  ;;  %2370 = vmatprep.subr.mxu1 %v2706_v46  ;;  %v2134_v30 = vld [vmem:[%s3167_s11 + $0x30] sm:$0xff] }
 0x1e4   :  { %2295 = vmatprep.subr.mxu0 %v1868_v32  ;;  %2371 = vmatpush3.msra.mxu1 %v2139_v25  ;;  %v275_v32 = vpop.permute.xlu0 %274 }
 0x1e5   :  { %2296 = vmatpush3.msra.mxu0 %v1852_v35  ;;  %2372 = vmatprep.subr.mxu1 %v2706_v46 }
 0x1e6   :  { %2297 = vmatprep.subr.mxu0 %v1867_v40  ;;  %2373 = vmatpush3.msra.mxu1 %v2138_v26  ;;  %v1960_v26 = vld [vmem:[#allocation14 + $0x10] sm:$0xf] }
 0x1e7   :  { %2298 = vmatpush3.msra.mxu0 %v1851_v23  ;;  %2374 = vmatprep.subr.mxu1 %v2706_v46 }
 0x1e8   :  { %2299 = vmatprep.subr.mxu0 %v1866_v42  ;;  %2375 = vmatpush3.msra.mxu1 %v2137_v27  ;;  %v273_v35 = vpop.permute.xlu0 %272 }
 0x1e9   :  { %2300 = vmatpush3.msra.mxu0 %v1850_v48  ;;  %2376 = vmatprep.subr.mxu1 %v2706_v46 }
 0x1ea   :  { %2301 = vmatprep.subr.mxu0 %v1865_v44  ;;  %2377 = vmatpush3.msra.mxu1 %v2136_v28  ;;  %v1959_v28 = vld [vmem:[#allocation14 + $0x8] sm:$0xff] }
 0x1eb   :  { %2302 = vmatpush3.msra.mxu0 %v1849_v45  ;;  %2378 = vmatprep.subr.mxu1 %v2706_v46  ;;  %v283_v45 = vadd.f32 %v2892_v17, %v275_v32 }
 0x1ec   :  { %2342 = vmatprep.subr.mxu0 %v2706_v46 }
 0x20a   :  { %v1635_v29 = vpop.f32.mrf.mxu1 }
 0x20b   :  { %v1636_v31 = vadd.f32 %v1635_v29, %v1595_v15  ;;  %v2135_v29 = vld [vmem:[%s3167_s11 + $0x38] sm:$0xff] }
 0x20c   :  { %v1637_v33 = vpop.f32.mrf.mxu1  ;;  %2379 = vmatpush3.msra.mxu1 %v2135_v29 }
 0x20d   :  { %v1638_v38 = vadd.f32 %v1637_v33, %v1597_v5  ;;  %2380 = vmatprep.subr.mxu1 %v2706_v46 }
 0x20e   :  { %v1639_v41 = vpop.f32.mrf.mxu1  ;;  %2381 = vmatpush3.msra.mxu1 %v2134_v30  ;;  %v1958_v30 = vld [vmem:[#allocation14] sm:$0xff] }
 0x20f   :  { %2382 = vmatprep.subr.mxu1 %v2706_v46 }
 0x210   :  { %v1640_v43 = vpop.f32.mrf.mxu1 }
 0x215   :  { %v1676_v49 = vpop.f32.mrf.mxu0 }
 0x216   :  { %v1677_v50 = vadd.f32 %v1676_v49, %v1636_v31  ;;  %v298_v31 = vpop.permute.xlu1 %297 }
 0x217   :  { %v1678_v52 = vpop.f32.mrf.mxu0 }
 0x218   :  { %v1679_v53 = vadd.f32 %v1678_v52, %v1638_v38  ;;  %v296_v38 = vpop.permute.xlu0 %295 }
 0x219   :  { %v1680_v55 = vpop.f32.mrf.mxu0 }
 0x21a   :  { %v321_v33 = vpop.permute.xlu1 %320  ;;  %v282_v55 = vadd.f32 %v2888_v3, %v273_v35  ;;  %v2132_v35 = vld [vmem:[%s3167_s11 + $0x20] sm:$0xff] }
 0x21b   :  { %v1681_v56 = vpop.f32.mrf.mxu0 }
 0x21c   :  { %v319_v41 = vpop.permute.xlu0 %318 }
 0x21e   :  { %v271_v40 = vpop.permute.xlu1 %270 }
 0x21f   :  { %v281_v56 = vadd.f32 %v271_v40, %v2901_v36  ;;  %v2130_v40 = vld [vmem:[%s3167_s11 + $0x10] sm:$0xff] }
 0x220   :  { %v342_v42 = vpop.permute.xlu0 %341 }
 0x222   :  { %v294_v23 = vpop.permute.xlu1 %293 }
 0x224   :  { %v292_v48 = vpop.permute.xlu0 %291 }
 0x226   :  { %v317_v43 = vpop.permute.xlu1 %316 }
 0x22a   :  { %v269_v44 = vpop.permute.xlu1 %268 }
 0x22b   :  { %v280_v49 = vadd.f32 %v269_v44, %v2890_v7  ;;  %v2264_v44 = vld [vmem:[#allocation17] ss:$0 sm:$0xff] }
 0x22e   :  { %v344_v52 = vpop.permute.xlu1 %343 }
 0x24a   :  { %v1717_v57 = vpop.f32.mrf.mxu1 }
 0x24b   :  { %v1718_v5 = vadd.f32 %v1717_v57, %v1677_v50  ;;  %v315_v50 = vpop.permute.xlu0 %314  ;;  %v303_v57 = vadd.f32 %v292_v48, %v280_v49 }
 0x24c   :  { %v1719_v60 = vpop.f32.mrf.mxu1 }
 0x24d   :  { %v1720_v6 = vadd.f32 %v1719_v60, %v1679_v53  ;;  %v306_v53 = vadd.f32 %v298_v31, %v283_v45 }
 0x24e   :  { %v1721_v59 = vpop.f32.mrf.mxu1 }
 0x24f   :  { %v329_v60 = vadd.f32 %v321_v33, %v306_v53  ;;  %v305_v59 = vadd.f32 %v296_v38, %v282_v55  ;;  %v2133_v33 = vld [vmem:[%s3167_s11 + $0x28] sm:$0xff]  ;;  %v2131_v38 = vld [vmem:[%s3167_s11 + $0x18] sm:$0xff] }
 0x250   :  { %v1722_v61 = vpop.f32.mrf.mxu1  ;;  %2383 = vmatpush3.msra.mxu1 %v2133_v33  ;;  %v2265_v53 = vld [vmem:[#allocation19] ss:$0 sm:$0xff] }
 0x251   :  { %v304_v61 = vadd.f32 %v294_v23, %v281_v56  ;;  %2384 = vmatprep.subr.mxu1 %v2706_v46  ;;  %v2128_v23 = vld [vmem:[%s3167_s11] sm:$0xff] }
 0x252   :  { %2385 = vmatpush3.msra.mxu1 %v2132_v35 }
 0x253   :  { %2386 = vmatprep.subr.mxu1 %v2706_v46 }
 0x254   :  { %2387 = vmatpush3.msra.mxu1 %v2131_v38 }
 0x255   :  { %v1758_v62 = vpop.f32.mrf.mxu0  ;;  %2388 = vmatprep.subr.mxu1 %v2706_v46 }
 0x256   :  { %v1759_v10 = vadd.f32 %v1758_v62, %v1718_v5  ;;  %v338_v62 = vpop.permute.xlu0 %337  ;;  %2389 = vmatpush3.msra.mxu1 %v2130_v40 }
 0x257   :  { %v1760_v39 = vpop.f32.mrf.mxu0  ;;  %2390 = vmatprep.subr.mxu1 %v2706_v46 }
 0x258   :  { %v1761_v34 = vadd.f32 %v1760_v39, %v1720_v6  ;;  %v340_v39 = vpop.permute.xlu1 %339 }
 0x259   :  { %v1762_v63 = vpop.f32.mrf.mxu0 }
 0x25a   :  { %v328_v63 = vadd.f32 %v319_v41, %v305_v59  ;;  %v2129_v41 = vld [vmem:[%s3167_s11 + $0x8] sm:$0xff]  ;;  %s2708_s11 = smov [#allocation20]  }
 0x25b   :  { %v1763_v0 = vpop.f32.mrf.mxu0  ;;  %2391 = vmatpush3.msra.mxu1 %v2129_v41  ;;  %s2241_s18 = sshll.u32 %s2708_s11, 4  ;;  %s2242_s18 = int_to_ptr.vmem [resolvable:$true] %s2241_s18 }
 0x25c   :  { %v327_v0 = vadd.f32 %v317_v43, %v304_v61  ;;  %v351_v17 = vadd.f32 %v342_v42, %v328_v63  ;;  %2392 = vmatprep.subr.mxu1 %v2706_v46  ;;  %s2651_s2 = scalar_lea.vmem %s2242_s18, 32  ;;  %p2656_p0 = scmp.lt.s32.totalorder %s2242_s18, %s2242_s18 }
 0x25d   :  { %2393 = vmatpush3.msra.mxu1 %v2128_v23  ;;  %p2652_p13 = scmp.ne.s32.totalorder %s2242_s18, %s2651_s2  ;;  %p2657_p1 = scmp.lt.s32.totalorder %s2651_s2, %s2651_s2 }
 0x25e   :  { %v364_v3 = vsel %vm353_vm10, %v351_v17, -inf }
 0x25f   :  { %p2658_p2 = por %p2657_p1, %p2656_p0 }
 0x261   :  { %p2659_p3 = pnand %p2658_p2, %p2652_p13 }
 0x26d   :  { %v1840_v1 = vpop.f32.mrf.mxu0 }
 0x26f   :  { %v1842_v2 = vpop.f32.mrf.mxu0 }
 0x271   :  { %v1844_v15 = vpop.f32.mrf.mxu0 }
 0x272   :  { %v350_v15 = vadd.f32 %v340_v39, %v327_v0 }
 0x273   :  { %v1845_v4 = vpop.f32.mrf.mxu0 }
 0x274   :  { %v356_v5 = vsel %vm355_vm9, %v350_v15, -inf }
 0x28a   :  { %v1799_v47 = vpop.f32.mrf.mxu1 }
 0x28b   :  { %v1800_v24 = vadd.f32 %v1799_v47, %v1759_v10 }
 0x28c   :  { %v1801_v11 = vpop.f32.mrf.mxu1 }
 0x28d   :  { %v1802_v12 = vadd.f32 %v1801_v11, %v1761_v34  ;;  %v1841_v51 = vadd.f32 %v1840_v1, %v1800_v24  ;;  %v326_v1 = vadd.f32 %v315_v50, %v303_v57 }
 0x28e   :  { %v1803_v13 = vpop.f32.mrf.mxu1 }
 0x28f   :  { %v1843_v37 = vadd.f32 %v1842_v2, %v1802_v12  ;;  %v1847_v18 = vmax.f32 %v1841_v51, 0.0  ;;  %v352_v2 = vadd.f32 %v344_v52, %v329_v60  ;;  %v349_v7 = vadd.f32 %v338_v62, %v326_v1 }
 0x290   :  { %v1804_v14 = vpop.f32.mrf.mxu1 }
 0x291   :  { %v1848_v16 = vmax.f32 %v1843_v37, 0.0  ;;  %v365_v4 = vsel %vm355_vm9, %v352_v2, -inf  ;;  %v354_v36 = vsel %vm353_vm10, %v349_v7, -inf }
 0x292   :  { %v366_v6 = vmax.f32 %v364_v3, %v365_v4  ;;  %v357_v10 = vmax.f32 %v354_v36, %v356_v5 }
 0x293   :  { %1952 = vmatprep.mubr.f32.mxu0 %v1848_v16 }
 0x294   :  { %1953 = vmatmul.mubr.f32.vlgmr.msra.gmra.mxu0 %v1847_v18  ;;  %v367_v47 = vrot.slane %v366_v6, 4  ;;  %v358_v34 = vrot.slane %v357_v10, 4 }
 0x295   :  { %2343 = vmatpush3.msra.mxu0 %v1964_v19  ;;  %2350 = vmatprep.mubr.msk.f32.mxu0 %vm2707_vm8, %v2706_v46  ;;  %v2257_v19 = vld [vmem:[#allocation7] ss:$0 sm:$0xff] }
 0x296   :  { %2344 = vmatprep.subr.mxu0 %v2706_v46  ;;  %v368_v24 = vmax.f32 %v366_v6, %v367_v47  ;;  %v359_v11 = vmax.f32 %v357_v10, %v358_v34 }
 0x297   :  { %2345 = vmatpush3.msra.mxu0 %v1963_v20 }
 0x298   :  { %2346 = vmatprep.subr.mxu0 %v2706_v46  ;;  %v369_v12 = vrot.slane %v368_v24, 2  ;;  %v360_v51 = vrot.slane %v359_v11, 2 }
 0x299   :  { %2347 = vmatpush3.msra.mxu0 %v1962_v21 }
 0x29a   :  { %2348 = vmatprep.subr.mxu0 %v2706_v46  ;;  %v370_v13 = vmax.f32 %v368_v24, %v369_v12  ;;  %v361_v37 = vmax.f32 %v359_v11, %v360_v51 }
 0x29b   :  { %2349 = vmatpush3.msra.mxu0 %v1961_v22  ;;  %v2260_v22 = vld [vmem:[#allocation13] ss:$0 sm:$0xff] }
 0x29c   :  { %2353 = vmatprep.subr.mxu0 %v2706_v46  ;;  %v371_v14 = vrot.slane %v370_v13, 1  ;;  %v362_v16 = vrot.slane %v361_v37, 1 }
 0x29e   :  { %v372_v18 = vmax.f32 %v370_v13, %v371_v14  ;;  %v363_v20 = vmax.f32 %v361_v37, %v362_v16 }
 0x2a0   :  { %v381_v54 = vadd.f32 %v2257_v19, %v372_v18  ;;  %v380_v58 = vadd.f32 %v2257_v19, %v363_v20 }
 0x2a2   :  { %v383_v27 = vmax.f32 %v381_v54, 0.0  ;;  %v382_v29 = vmax.f32 %v380_v58, 0.0 }
 0x2a4   :  { %v2041_v31 = vrot.slane %v383_v27, 7 }
 0x2a6   :  { %v2043_v32 = vsel %vm2042_vm12, %v2041_v31, %v382_v29 }
 0x354   :  { %v2303_v21 = vpop.f32.mrf.mxu0 }
 0x356   :  { %v2304_v8 = vpop.f32.mrf.mxu0 }
 0x357   :  { %v2305_v9 = vadd.f32 %v2304_v8, %v2303_v21 }
 0x359   :  { %v1955_v25 = vadd.f32 %v2305_v9, %v2260_v22 }
 0x35b   :  { %2351 = vmatmul.mubr.msk.f32.vlgmr.msra.gmra.mxu0 %vm1965_vm11, %v1955_v25 }
 0x35c   :  { %2354 = vmatpush3.msk.msra.mxu0 %vm330_vm5, %v1960_v26  ;;  %2359 = vmatprep.mubr.msk.f32.mxu0 %vm2707_vm8, %v2706_v46 }
 0x35d   :  { %2355 = vmatprep.subr.mxu0 %v2706_v46 }
 0x35e   :  { %2356 = vmatpush3.msra.mxu0 %v1959_v28 }
 0x35f   :  { %2357 = vmatprep.subr.mxu0 %v2706_v46 }
 0x360   :  { %2358 = vmatpush3.msra.mxu0 %v1958_v30 }
 0x361   :  { %2360 = vmatmul.mubr.msk.f32.vlgmr.msra.gmra.mxu0 %vm353_vm10, %v2043_v32 }
 0x41b   :  { %v2035_v42 = vpop.f32.mrf.mxu0 }
 0x41d   :  { %v2352_v43 = vpop.f32.mrf.mxu0 }
 0x421   :  { %v2115_v48 = vpop.f32.mrf.mxu0 }
 0x422   :  { %v2116_v45 = vadd.f32 %v2115_v48, %v2035_v42 }
 0x423   :  { %v2361_v49 = vpop.f32.mrf.mxu0 }
 0x424   :  { %v2126_v50 = vadd.f32 %v2264_v44, %v2116_v45 }
 0x426   :  { %v2127_v52 = vmax.f32 %v2126_v50, 0.0 }
 0x428   :  { %2395 = vmatmul.mubr.f32.vlgmr.msra.gmra.mxu1 %v2127_v52 }
 0x4e8   :  { %v2217_v55 = vpop.f32.mrf.mxu1 }
 0x4e9   :  { %v2218_v56 = vadd.f32 %v2265_v53, %v2217_v55 }
 0x4ea   :  { %v2396_v57 = vpop.f32.mrf.mxu1 }
 0x4eb   :  { %v2222_v46 = vsel %vm2221_vm13, %v2218_v56, -inf }
 0x4ec   :  { %2223 = vmax.xlane.f32.xlu0 %v2222_v46 }
 0x575   :  { %v2224_v60 = vpop.xlane.xlu0 %2223 }
 0x576   :  { %v2225_v59 = vsub.f32 %v2218_v56, %v2224_v60 }
 0x578   :  { %v2226_v61 = vmul.f32 1.442695, %v2225_v59 }
 0x57a   :  { %2427 = vpow2.f32 %v2226_v61 }
 0x587   :  { %v2428_v62 = vpop.eup %2427 }
 0x588   :  { %v2228_v39 = vsel %vm2221_vm13, %v2428_v62, 0.0 }
 0x589   :  { %2229 = vadd.xlane.f32.xlu1 %v2228_v39 }
 0x612   :  { %v2230_v63 = vpop.xlane.xlu1 %2229 }
 0x613   :  { %2429 = vlog2.f32 %v2230_v63 }
 0x620   :  { %v2430_v0 = vpop.eup %2429 }
 0x621   :  { %v2232_v1 = vmul.f32 0.6931472, %v2430_v0 }
 0x623   :  { %v2233_v2 = vsub.f32 %v2225_v59, %v2232_v1 }
 0x625   :  { %2234 = vst.msk [vmem:[#allocation20] sm:$0x3] %vm2221_vm13, %v2233_v2 }
 0x626   :  { %2662 = shalt.err (!%p2659_p3)
}
 0x627   :  { %2244 = dma.vmem_to_hbm [thread:$0]  %s2242_s18, 32, %s3169_s13, [#allocation4]  }
 0x628   :  { %2683 = dma.done.wait [#allocation4], 32  }
 0x629   :  { %2684 = vsyncadd [#allocation4], 4294967264 }
 0x62a   :  { %2248 = vsyncpa [#allocation3], 1 }
 0x62b   :  { %2249 = vsyncpa [#allocation6], 1 }
 0x62c   :  { %2250 = vsyncpa [#allocation9], 1 }
 0x62d   :  { %2251 = vsyncpa [#allocation12], 1 }
 0x62e   :  { %2252 = vsyncpa [#allocation15], 1 }
 0x62f   :  { %2253 = vsyncpa [#allocation18], 1 }
 0x630   :  { %2254 = vsyncpa [#allocation4], 1 }

</bundles_post_ra>
